<compile_context>
chip_gen: v7x
topology: tpu7x:2x2x1
jax: 0.10.0
libtpu: 0.0.40
codegen_flags: <defaults>
</compile_context>

<pallas_src>
import functools

import jax
import jax.numpy as jnp
from jax.experimental import pallas as pl
from jax.experimental.pallas import tpu as pltpu

EPS = 1e-5
LANE = 128


def _round_up(v, m):
    return -(-v // m) * m


def _vmem_budget_bytes():
    """Per-generation VMEM budget: v5e/v6e (128 MiB physical) -> ~96 MiB,
    v7x (64 MiB per TC) -> ~48 MiB.  Conservative fallback if the query fails."""
    cap = 64 * 1024 * 1024
    try:
        cap = int(getattr(pltpu.get_tpu_info(), "vmem_capacity_bytes", cap)) or cap
    except Exception:
        pass
    return int(min(cap * 3 // 4, 100 * 1024 * 1024))


def _pick_tile_h(H, W, cp, kp1, vmem_budget):
    """Row-band height: as large as the VMEM budget / a ~2K MXU-M target allow,
    preferring an exact divisor of H (then no row padding / stat masking)."""
    # dominant per-output-row VMEM bytes (bf16): pass-2 in/out blocks (double
    # buffered) + im2col slab + band scratch; pass-1 in/out blocks.
    per_row2 = 2 * W * cp * (2 * 2 + 9) + 2 * (W + 2) * cp
    per_row1 = 2 * W * (2 * kp1 + 2 * cp)
    per_row = max(per_row1, per_row2)
    th = max(1, (vmem_budget // 3) // per_row)           # ~3x headroom
    th = min(th, max(1, 2048 // max(W, 1)), 256, H)      # keep M = th*W <= ~2K
    for d in range(th, 0, -1):                           # largest divisor <= th
        if H % d == 0:
            if d == th or d >= max(8, th // 2):
                return d                                 # no padding needed
            break
    return th - th % 8 if th >= 8 else th                # pad rows + mask


# --------------------------- pass 1: conv1 matmul ---------------------------

def _conv1_kernel(x_ref, w_ref, z_ref, st_ref, *, th, w, kin, h_valid, need_mask):
    """One (image, row-band): lane-dense (M, Kp) @ (Kp, cp) matmul + stats."""
    i = pl.program_id(1)
    m = th * w
    lhs = x_ref[0].reshape(m, kin)                                   # bf16
    z = jnp.dot(lhs, w_ref[...], preferred_element_type=jnp.float32)  # (m, cp)
    z_ref[0] = z.reshape(th, w, z.shape[-1]).astype(z_ref.dtype)      # bf16 out
    if need_mask:   # zero-padded rows (row >= H) must not enter the BN stats
        row = jax.lax.broadcasted_iota(jnp.int32, (th, w), 0) + i * th
        zm = z * (row < h_valid).astype(jnp.float32).reshape(m, 1)
    else:
        zm = z
    s = jnp.sum(zm, axis=0, keepdims=True)
    ss = jnp.sum(zm * z, axis=0, keepdims=True)
    st_ref[0, 0, :, :] = jnp.concatenate([s, ss], axis=0)             # (2, cp)


def _conv1_pass(stack, w_mat, *, th, h_valid, vmem_limit):
    N, H_pad, W, kp1 = stack.shape
    cp = w_mat.shape[-1]
    n_h = H_pad // th
    kernel = functools.partial(_conv1_kernel, th=th, w=W, kin=kp1,
                               h_valid=h_valid, need_mask=(H_pad != h_valid))
    return pl.pallas_call(
        kernel,
        grid=(N, n_h),
        in_specs=[
            pl.BlockSpec((1, th, W, kp1), lambda n, i: (n, i, 0, 0)),
            pl.BlockSpec(w_mat.shape, lambda n, i: (0, 0)),
        ],
        out_specs=[
            pl.BlockSpec((1, th, W, cp), lambda n, i: (n, i, 0, 0)),
            pl.BlockSpec((1, 1, 2, cp), lambda n, i: (n, i, 0, 0)),
        ],
        out_shape=[
            jax.ShapeDtypeStruct((N, H_pad, W, cp), jnp.bfloat16),
            jax.ShapeDtypeStruct((N, n_h, 2, cp), jnp.float32),
        ],
        compiler_params=pltpu.CompilerParams(
            dimension_semantics=("parallel", "parallel"),
            vmem_limit_bytes=vmem_limit),
    )(stack, w_mat)


# ------------------- pass 2: BN1+ReLU fused with conv2 ----------------------

def _conv2_kernel(x_mid_ref, x_top_ref, x_bot_ref, sc_ref, sh_ref, w_ref,
                  z_ref, st_ref, band_ref, slab_ref,
                  *, th, w, cin, h_valid, need_mask):
    """One (image, row-band): BN1+ReLU -> bf16 padded band -> bf16 im2col slab
    -> single big-K MXU matmul -> raw conv2 tile (bf16) + f32 stats."""
    i = pl.program_id(1)
    f32 = jnp.float32
    bf16 = jnp.bfloat16
    m = th * w

    def act(v):
        # BN1 via precomputed scale/shift in f32, ReLU, then one cast to bf16.
        y = jnp.maximum(v.astype(f32) * sc_ref[...] + sh_ref[...], 0.0)
        return y.astype(bf16)

    mid = act(x_mid_ref[0])                                  # (th, w, cin) bf16
    if need_mask:   # zero-padded rows (>= H) must act as conv zero padding
        row = jax.lax.broadcasted_iota(jnp.int32, (th, w), 0) + i * th
        valid = row < h_valid
        mid = jnp.where(valid[:, :, None], mid, jnp.zeros_like(mid))

    # ---- zero-padded (th+2, w+2, cin) input band in VMEM (bf16) ----
    band_ref[1:th + 1, 1:w + 1, :] = mid
    band_ref[:, 0:1, :] = jnp.zeros((th + 2, 1, cin), bf16)
    band_ref[:, w + 1:w + 2, :] = jnp.zeros((th + 2, 1, cin), bf16)

    @pl.when(i > 0)
    def _():
        band_ref[0:1, 1:w + 1, :] = act(x_top_ref[0])

    @pl.when(i == 0)
    def _():
        band_ref[0:1, 1:w + 1, :] = jnp.zeros((1, w, cin), bf16)

    bot_real = (i + 1) * th < h_valid          # row below the band is a real row
    @pl.when(bot_real)
    def _():
        band_ref[th + 1:th + 2, 1:w + 1, :] = act(x_bot_ref[0])

    @pl.when(jnp.logical_not(bot_real))
    def _():
        band_ref[th + 1:th + 2, 1:w + 1, :] = jnp.zeros((1, w, cin), bf16)

    # ---- im2col: 9 shifted windows -> (M, 9*cin) bf16 slab (cin == cp lanes) ----
    for t in range(9):
        ky, kx = divmod(t, 3)
        slab_ref[:, t * cin:(t + 1) * cin] = (
            band_ref[ky:ky + th, kx:kx + w, :].reshape(m, cin))

    # ---- one MXU matmul: (M, 9*cp) @ (9*cp, cp), bf16 operands, f32 accum ----
    z = jnp.dot(slab_ref[...], w_ref[...], preferred_element_type=f32)
    z_ref[0] = z.reshape(th, w, z.shape[-1]).astype(z_ref.dtype)       # bf16 out

    if need_mask:
        zm = z * valid.astype(f32).reshape(m, 1)
    else:
        zm = z
    s = jnp.sum(zm, axis=0, keepdims=True)
    ss = jnp.sum(zm * z, axis=0, keepdims=True)
    st_ref[0, 0, :, :] = jnp.concatenate([s, ss], axis=0)


def _conv2_pass(z1, scale, shift, w_mat, *, th, h_valid, vmem_limit):
    N, H_pad, W, cp = z1.shape
    n_h = H_pad // th
    kernel = functools.partial(_conv2_kernel, th=th, w=W, cin=cp,
                               h_valid=h_valid, need_mask=(H_pad != h_valid))

    mid_map = lambda n, i: (n, i, 0, 0)
    top_map = lambda n, i: (n, jnp.maximum(i * th - 1, 0), 0, 0)     # row i*th-1
    bot_map = lambda n, i: (n, jnp.minimum((i + 1) * th, H_pad - 1), 0, 0)
    const2 = lambda n, i: (0, 0)

    return pl.pallas_call(
        kernel,
        grid=(N, n_h),
        in_specs=[
            pl.BlockSpec((1, th, W, cp), mid_map),
            pl.BlockSpec((1, 1, W, cp), top_map),
            pl.BlockSpec((1, 1, W, cp), bot_map),
            pl.BlockSpec((1, cp), const2),
            pl.BlockSpec((1, cp), const2),
            pl.BlockSpec(w_mat.shape, const2),
        ],
        out_specs=[
            pl.BlockSpec((1, th, W, cp), mid_map),
            pl.BlockSpec((1, 1, 2, cp), lambda n, i: (n, i, 0, 0)),
        ],
        out_shape=[
            jax.ShapeDtypeStruct((N, H_pad, W, cp), jnp.bfloat16),
            jax.ShapeDtypeStruct((N, n_h, 2, cp), jnp.float32),
        ],
        scratch_shapes=[
            pltpu.VMEM((th + 2, W + 2, cp), jnp.bfloat16),   # padded input band
            pltpu.VMEM((th * W, 9 * cp), jnp.bfloat16),      # im2col slab
        ],
        compiler_params=pltpu.CompilerParams(
            dimension_semantics=("parallel", "parallel"),
            vmem_limit_bytes=vmem_limit),
    )(z1, z1, z1, scale, shift, w_mat)


# ----------------------------- BN reductions --------------------------------

def _bn_scale_shift(stats, gamma_p, beta_p, count):
    """Reduce per-tile (sum, sumsq) -> BN scale/shift (training-mode batch
    stats, biased variance).  f32 with a clamp against E[x^2]-E[x]^2 rounding.
    """
    tot = jnp.sum(stats, axis=(0, 1))                       # (2, cp)
    mean = tot[0] / count
    var = jnp.maximum(tot[1] / count - mean * mean, 0.0)
    scale = gamma_p * jax.lax.rsqrt(var + EPS)
    shift = beta_p - mean * scale
    return scale.reshape(1, -1), shift.reshape(1, -1)


# --------------------------------- wrapper ----------------------------------

def inconv_forward(x_nchw, params, tile_h=None):
    """Forward of inconv(in_ch, out_ch). x_nchw: (N, Cin, H, W) float32."""
    w1, g1, be1, w2, g2, be2 = params
    N, Cin, H, W = x_nchw.shape
    Cout = w1.shape[-1]
    cp = _round_up(Cout, LANE)                   # lane-dense channels
    kp1 = _round_up(9 * Cin, LANE)               # lane-dense conv1 K

    vmem_budget = _vmem_budget_bytes()
    th = tile_h if tile_h is not None else _pick_tile_h(H, W, cp, kp1, vmem_budget)
    th = max(1, min(th, H))
    H_pad = _round_up(H, th)

    x = jnp.transpose(x_nchw, (0, 2, 3, 1)).astype(jnp.float32)      # NHWC

    # conv1's 9-tap shifted stack built in XLA (zero 'SAME' padding + zero row
    # padding to H_pad), channels padded to kp1, bf16 -> pass 1 is lane-dense.
    xp = jnp.pad(x, ((0, 0), (1, 1 + H_pad - H), (1, 1), (0, 0)))
    stack = jnp.concatenate(
        [xp[:, ky:ky + H_pad, kx:kx + W, :] for ky in range(3) for kx in range(3)],
        axis=-1)
    stack = jnp.pad(stack, ((0, 0), (0, 0), (0, 0), (0, kp1 - 9 * Cin)))
    stack = stack.astype(jnp.bfloat16)

    # Weights as bf16 matmul operands, zero-padded channels.  Conv biases are
    # dropped: a per-channel constant is exactly cancelled by the BN batch-mean
    # subtraction that immediately follows each conv.
    w1m = jnp.pad(w1.reshape(9 * Cin, Cout),
                  ((0, kp1 - 9 * Cin), (0, cp - Cout))).astype(jnp.bfloat16)
    w2m = jnp.pad(w2, ((0, 0), (0, 0), (0, cp - Cout), (0, cp - Cout))
                  ).reshape(9 * cp, cp).astype(jnp.bfloat16)
    g1p = jnp.pad(g1.astype(jnp.float32), (0, cp - Cout))
    b1p = jnp.pad(be1.astype(jnp.float32), (0, cp - Cout))
    g2p = jnp.pad(g2.astype(jnp.float32), (0, cp - Cout))
    b2p = jnp.pad(be2.astype(jnp.float32), (0, cp - Cout))

    count = float(N * H * W)

    # pass 1: conv1 + stats;  pass 2: BN1+ReLU fused with conv2 + stats
    z1, st1 = _conv1_pass(stack, w1m, th=th, h_valid=H, vmem_limit=vmem_budget)
    sc1, sh1 = _bn_scale_shift(st1, g1p, b1p, count)
    z2, st2 = _conv2_pass(z1, sc1, sh1, w2m, th=th, h_valid=H,
                          vmem_limit=vmem_budget)
    sc2, sh2 = _bn_scale_shift(st2, g2p, b2p, count)

    # epilogue: BN2 + ReLU + row/channel slice + NCHW transpose in plain jnp so
    # XLA fuses it into a single pass over z2 (no extra pointwise pallas_call).
    y = jnp.maximum(z2[:, :H].astype(jnp.float32) * sc2[0] + sh2[0], 0.0)
    return jnp.transpose(y[..., :Cout], (0, 3, 1, 2))                 # NCHW f32


# ------------------------------ test scaffolding -----------------------------

def init_params(key, in_ch, out_ch):
    """Deterministic synthetic parameters (conv weights HWIO; BN affine).
    Conv biases omitted: cancelled exactly by the BN mean subtraction."""
    ks = jax.random.split(key, 6)
    w1 = jax.random.normal(ks[0], (3, 3, in_ch, out_ch), jnp.float32) * 0.1
    g1 = 1.0 + 0.1 * jax.random.normal(ks[1], (out_ch,), jnp.float32)
    be1 = 0.1 * jax.random.normal(ks[2], (out_ch,), jnp.float32)
    w2 = jax.random.normal(ks[3], (3, 3, out_ch, out_ch), jnp.float32) * 0.1
    g2 = 1.0 + 0.1 * jax.random.normal(ks[4], (out_ch,), jnp.float32)
    be2 = 0.1 * jax.random.normal(ks[5], (out_ch,), jnp.float32)
    return (w1, g1, be1, w2, g2, be2)


def _reference(x_nchw, params):
    """Pure-JAX f32 reference of the same semantics (for a tolerance check)."""
    w1, g1, be1, w2, g2, be2 = params
    x = jnp.transpose(x_nchw, (0, 2, 3, 1))

    def conv(v, w):
        return jax.lax.conv_general_dilated(
            v, w, window_strides=(1, 1), padding="SAME",
            dimension_numbers=("NHWC", "HWIO", "NHWC"))

    def bn_relu(z, gamma, beta):
        mean = jnp.mean(z, axis=(0, 1, 2))
        var = jnp.mean((z - mean) ** 2, axis=(0, 1, 2))
        return jnp.maximum((z - mean) * jax.lax.rsqrt(var + EPS) * gamma + beta, 0.0)

    y1 = bn_relu(conv(x, w1), g1, be1)
    y2 = bn_relu(conv(y1, w2), g2, be2)
    return jnp.transpose(y2, (0, 3, 1, 2))


if __name__ == "__main__":
    key = jax.random.PRNGKey(0)
    k_x, k_p = jax.random.split(key)

    N, Cin, Cout, H, W = 2, 4, 8, 16, 16
    x = jax.random.normal(k_x, (N, Cin, H, W), jnp.float32)
    params = init_params(k_p, Cin, Cout)

    out = jax.jit(inconv_forward)(x, params)
    jax.block_until_ready(out)

    assert out.shape == (N, Cout, H, W), out.shape
    assert out.dtype == jnp.float32

    ref = _reference(x, params)
    err = float(jnp.max(jnp.abs(out - ref)))
    assert err < 0.3, f"max abs error vs f32 reference: {err}"  # bf16 MXU/intermediates

    print("KERNEL_OK")
</pallas_src>

<mosaic_0001>
module attributes {stable_mosaic.version = 11 : i64} {
  func.func @_conv1_kernel(%arg0: i32, %arg1: i32, %arg2: memref<1x16x16x128xbf16, #tpu.memory_space<vmem>>, %arg3: memref<128x128xbf16, #tpu.memory_space<vmem>>, %arg4: memref<1x16x16x128xbf16, #tpu.memory_space<vmem>>, %arg5: memref<1x1x2x128xf32, #tpu.memory_space<vmem>>) attributes {dimension_semantics = [#tpu.dimension_semantics<parallel>, #tpu.dimension_semantics<parallel>], iteration_bounds = array<i64: 2, 1>, scalar_prefetch = 0 : i64, scratch_operands = 0 : i64, tpu.core_type = #tpu.core_type<tc>, window_params = [{transform_indices = @transform_0, window_bounds = array<i64: 1, 16, 16, 128>}, {pipeline_mode = #tpu.pipeline_mode<synchronous>, transform_indices = @transform_1, window_bounds = array<i64: 128, 128>}, {transform_indices = @transform_2, window_bounds = array<i64: 1, 16, 16, 128>}, {transform_indices = @transform_3, window_bounds = array<i64: 1, 1, 2, 128>}]} {
    %c0 = arith.constant 0 : index
    %c0_0 = arith.constant 0 : index
    %c0_1 = arith.constant 0 : index
    %c0_2 = arith.constant 0 : index
    %0 = vector.load %arg2[%c0, %c0_0, %c0_1, %c0_2] : memref<1x16x16x128xbf16, #tpu.memory_space<vmem>>, vector<1x16x16x128xbf16>
    %1 = vector.shape_cast %0 : vector<1x16x16x128xbf16> to vector<16x16x128xbf16>
    %2 = vector.shape_cast %1 : vector<16x16x128xbf16> to vector<256x128xbf16>
    %c0_3 = arith.constant 0 : index
    %c0_4 = arith.constant 0 : index
    %3 = vector.load %arg3[%c0_3, %c0_4] : memref<128x128xbf16, #tpu.memory_space<vmem>>, vector<128x128xbf16>
    %cst = arith.constant dense<0.000000e+00> : vector<256x128xf32>
    %4 = tpu.matmul %2, %3, %cst {dimension_numbers = #tpu.dot_dimension_numbers<[1], [0], [0], [1], [0, 0, 1, 1], [], []>} : vector<256x128xbf16>, vector<128x128xbf16>, vector<256x128xf32> -> vector<256x128xf32>
    %5 = vector.shape_cast %4 : vector<256x128xf32> to vector<16x16x128xf32>
    %6 = arith.truncf %5 : vector<16x16x128xf32> to vector<16x16x128xbf16>
    %c0_5 = arith.constant 0 : index
    %c0_6 = arith.constant 0 : index
    %c0_7 = arith.constant 0 : index
    %c0_8 = arith.constant 0 : index
    %7 = vector.load %arg4[%c0_5, %c0_6, %c0_7, %c0_8] : memref<1x16x16x128xbf16, #tpu.memory_space<vmem>>, vector<1x16x16x128xbf16>
    %8 = vector.shape_cast %7 : vector<1x16x16x128xbf16> to vector<16x16x128xbf16>
    %9 = vector.shape_cast %6 : vector<16x16x128xbf16> to vector<1x16x16x128xbf16>
    tpu.vector_store %arg4[%c0_5, %c0_6, %c0_7, %c0_8], %9 {strides = array<i32>} : memref<1x16x16x128xbf16, #tpu.memory_space<vmem>>, vector<1x16x16x128xbf16>,
    %cst_9 = arith.constant dense<0.000000e+00> : vector<128xf32>
    %10 = vector.multi_reduction <add>, %4, %cst_9 [0] : vector<256x128xf32> to vector<128xf32>
    %11 = vector.shape_cast %10 : vector<128xf32> to vector<1x128xf32>
    %12 = arith.mulf %4, %4 : vector<256x128xf32>
    %cst_10 = arith.constant dense<0.000000e+00> : vector<128xf32>
    %13 = vector.multi_reduction <add>, %12, %cst_10 [0] : vector<256x128xf32> to vector<128xf32>
    %14 = vector.shape_cast %13 : vector<128xf32> to vector<1x128xf32>
    %15 = tpu.concatenate %11, %14 in 0 : vector<1x128xf32>, vector<1x128xf32> -> vector<2x128xf32>
    %c0_11 = arith.constant 0 : index
    %c0_12 = arith.constant 0 : index
    %c0_13 = arith.constant 0 : index
    %c0_14 = arith.constant 0 : index
    %16 = vector.load %arg5[%c0_11, %c0_12, %c0_13, %c0_14] : memref<1x1x2x128xf32, #tpu.memory_space<vmem>>, vector<1x1x2x128xf32>
    %17 = vector.shape_cast %16 : vector<1x1x2x128xf32> to vector<2x128xf32>
    %18 = vector.shape_cast %15 : vector<2x128xf32> to vector<1x1x2x128xf32>
    tpu.vector_store %arg5[%c0_11, %c0_12, %c0_13, %c0_14], %18 {strides = array<i32>} : memref<1x1x2x128xf32, #tpu.memory_space<vmem>>, vector<1x1x2x128xf32>,
    return
  }
  func.func @transform_0(%arg0: i32, %arg1: i32) -> (i32, i32, i32, i32) {
    %c0_i32 = arith.constant 0 : i32
    %c0_i32_0 = arith.constant 0 : i32
    %c0_i32_1 = arith.constant 0 : i32
    return %arg0, %arg1, %c0_i32, %c0_i32_0 : i32, i32, i32, i32
  }
  func.func @transform_1(%arg0: i32, %arg1: i32) -> (i32, i32) {
    %c0_i32 = arith.constant 0 : i32
    %c0_i32_0 = arith.constant 0 : i32
    %c0_i32_1 = arith.constant 0 : i32
    return %c0_i32, %c0_i32_0 : i32, i32
  }
  func.func @transform_2(%arg0: i32, %arg1: i32) -> (i32, i32, i32, i32) {
    %c0_i32 = arith.constant 0 : i32
    %c0_i32_0 = arith.constant 0 : i32
    %c0_i32_1 = arith.constant 0 : i32
    return %arg0, %arg1, %c0_i32, %c0_i32_0 : i32, i32, i32, i32
  }
  func.func @transform_3(%arg0: i32, %arg1: i32) -> (i32, i32, i32, i32) {
    %c0_i32 = arith.constant 0 : i32
    %c0_i32_0 = arith.constant 0 : i32
    %c0_i32_1 = arith.constant 0 : i32
    return %arg0, %arg1, %c0_i32, %c0_i32_0 : i32, i32, i32, i32
  }
}

module attributes {stable_mosaic.version = 11 : i64} {
  func.func @_conv2_kernel(%arg0: i32, %arg1: i32, %arg2: memref<1x16x16x128xbf16, #tpu.memory_space<vmem>>, %arg3: memref<1x1x16x128xbf16, #tpu.memory_space<vmem>>, %arg4: memref<1x1x16x128xbf16, #tpu.memory_space<vmem>>, %arg5: memref<1x128xf32, #tpu.memory_space<vmem>>, %arg6: memref<1x128xf32, #tpu.memory_space<vmem>>, %arg7: memref<1152x128xbf16, #tpu.memory_space<vmem>>, %arg8: memref<1x16x16x128xbf16, #tpu.memory_space<vmem>>, %arg9: memref<1x1x2x128xf32, #tpu.memory_space<vmem>>, %arg10: memref<18x18x128xbf16, #tpu.memory_space<vmem>>, %arg11: memref<256x1152xbf16, #tpu.memory_space<vmem>>) attributes {dimension_semantics = [#tpu.dimension_semantics<parallel>, #tpu.dimension_semantics<parallel>], iteration_bounds = array<i64: 2, 1>, scalar_prefetch = 0 : i64, scratch_operands = 2 : i64, tpu.core_type = #tpu.core_type<tc>, window_params = [{transform_indices = @transform_0, window_bounds = array<i64: 1, 16, 16, 128>}, {transform_indices = @transform_1, window_bounds = array<i64: 1, 1, 16, 128>}, {transform_indices = @transform_2, window_bounds = array<i64: 1, 1, 16, 128>}, {pipeline_mode = #tpu.pipeline_mode<synchronous>, transform_indices = @transform_3, window_bounds = array<i64: 1, 128>}, {pipeline_mode = #tpu.pipeline_mode<synchronous>, transform_indices = @transform_4, window_bounds = array<i64: 1, 128>}, {pipeline_mode = #tpu.pipeline_mode<synchronous>, transform_indices = @transform_5, window_bounds = array<i64: 1152, 128>}, {transform_indices = @transform_6, window_bounds = array<i64: 1, 16, 16, 128>}, {transform_indices = @transform_7, window_bounds = array<i64: 1, 1, 2, 128>}]} {
    %c0 = arith.constant 0 : index
    %c0_0 = arith.constant 0 : index
    %c0_1 = arith.constant 0 : index
    %c0_2 = arith.constant 0 : index
    %0 = vector.load %arg2[%c0, %c0_0, %c0_1, %c0_2] : memref<1x16x16x128xbf16, #tpu.memory_space<vmem>>, vector<1x16x16x128xbf16>
    %1 = vector.shape_cast %0 : vector<1x16x16x128xbf16> to vector<16x16x128xbf16>
    %2 = arith.extf %1 : vector<16x16x128xbf16> to vector<16x16x128xf32>
    %c0_3 = arith.constant 0 : index
    %c0_4 = arith.constant 0 : index
    %3 = vector.load %arg5[%c0_3, %c0_4] : memref<1x128xf32, #tpu.memory_space<vmem>>, vector<1x128xf32>
    %4 = vector.shape_cast %3 : vector<1x128xf32> to vector<1x1x128xf32>
    %5 = vector.broadcast %4 : vector<1x1x128xf32> to vector<16x16x128xf32>
    %6 = arith.mulf %2, %5 : vector<16x16x128xf32>
    %c0_5 = arith.constant 0 : index
    %c0_6 = arith.constant 0 : index
    %7 = vector.load %arg6[%c0_5, %c0_6] : memref<1x128xf32, #tpu.memory_space<vmem>>, vector<1x128xf32>
    %8 = vector.shape_cast %7 : vector<1x128xf32> to vector<1x1x128xf32>
    %9 = vector.broadcast %8 : vector<1x1x128xf32> to vector<16x16x128xf32>
    %10 = arith.addf %6, %9 : vector<16x16x128xf32>
    %cst = arith.constant 0.000000e+00 : f32
    %11 = vector.broadcast %cst : f32 to vector<16x16x128xf32>
    %12 = arith.maximumf %10, %11 : vector<16x16x128xf32>
    %13 = arith.truncf %12 : vector<16x16x128xf32> to vector<16x16x128xbf16>
    %c1 = arith.constant 1 : index
    %c1_7 = arith.constant 1 : index
    %c0_8 = arith.constant 0 : index
    %14 = vector.load %arg10[%c1, %c1_7, %c0_8] : memref<18x18x128xbf16, #tpu.memory_space<vmem>>, vector<16x16x128xbf16>
    tpu.vector_store %arg10[%c1, %c1_7, %c0_8], %13 {strides = array<i32>} : memref<18x18x128xbf16, #tpu.memory_space<vmem>>, vector<16x16x128xbf16>,
    %cst_9 = arith.constant 0.000000e+00 : bf16
    %15 = vector.broadcast %cst_9 : bf16 to vector<18x1x128xbf16>
    %c0_10 = arith.constant 0 : index
    %c0_11 = arith.constant 0 : index
    %c0_12 = arith.constant 0 : index
    %16 = vector.load %arg10[%c0_10, %c0_11, %c0_12] : memref<18x18x128xbf16, #tpu.memory_space<vmem>>, vector<18x1x128xbf16>
    tpu.vector_store %arg10[%c0_10, %c0_11, %c0_12], %15 {strides = array<i32>} : memref<18x18x128xbf16, #tpu.memory_space<vmem>>, vector<18x1x128xbf16>,
    %cst_13 = arith.constant 0.000000e+00 : bf16
    %17 = vector.broadcast %cst_13 : bf16 to vector<18x1x128xbf16>
    %c0_14 = arith.constant 0 : index
    %c17 = arith.constant 17 : index
    %c0_15 = arith.constant 0 : index
    %18 = vector.load %arg10[%c0_14, %c17, %c0_15] : memref<18x18x128xbf16, #tpu.memory_space<vmem>>, vector<18x1x128xbf16>
    tpu.vector_store %arg10[%c0_14, %c17, %c0_15], %17 {strides = array<i32>} : memref<18x18x128xbf16, #tpu.memory_space<vmem>>, vector<18x1x128xbf16>,
    %c0_i32 = arith.constant 0 : i32
    %19 = arith.cmpi sgt, %arg1, %c0_i32 : i32
    %20 = arith.extui %19 : i1 to i32
    %c0_i32_16 = arith.constant 0 : i32
    %21 = arith.cmpi ne, %20, %c0_i32_16 : i32
    scf.if %21 {
      %c0_73 = arith.constant 0 : index
      %c0_74 = arith.constant 0 : index
      %c0_75 = arith.constant 0 : index
      %c0_76 = arith.constant 0 : index
      %77 = vector.load %arg3[%c0_73, %c0_74, %c0_75, %c0_76] : memref<1x1x16x128xbf16, #tpu.memory_space<vmem>>, vector<1x1x16x128xbf16>
      %78 = vector.shape_cast %77 : vector<1x1x16x128xbf16> to vector<1x16x128xbf16>
      %79 = arith.extf %78 : vector<1x16x128xbf16> to vector<1x16x128xf32>
      %c0_77 = arith.constant 0 : index
      %c0_78 = arith.constant 0 : index
      %80 = vector.load %arg5[%c0_77, %c0_78] : memref<1x128xf32, #tpu.memory_space<vmem>>, vector<1x128xf32>
      %81 = vector.shape_cast %80 : vector<1x128xf32> to vector<1x1x128xf32>
      %82 = vector.broadcast %81 : vector<1x1x128xf32> to vector<1x16x128xf32>
      %83 = arith.mulf %79, %82 : vector<1x16x128xf32>
      %c0_79 = arith.constant 0 : index
      %c0_80 = arith.constant 0 : index
      %84 = vector.load %arg6[%c0_79, %c0_80] : memref<1x128xf32, #tpu.memory_space<vmem>>, vector<1x128xf32>
      %85 = vector.shape_cast %84 : vector<1x128xf32> to vector<1x1x128xf32>
      %86 = vector.broadcast %85 : vector<1x1x128xf32> to vector<1x16x128xf32>
      %87 = arith.addf %83, %86 : vector<1x16x128xf32>
      %cst_81 = arith.constant 0.000000e+00 : f32
      %88 = vector.broadcast %cst_81 : f32 to vector<1x16x128xf32>
      %89 = arith.maximumf %87, %88 : vector<1x16x128xf32>
      %90 = arith.truncf %89 : vector<1x16x128xf32> to vector<1x16x128xbf16>
      %c0_82 = arith.constant 0 : index
      %c1_83 = arith.constant 1 : index
      %c0_84 = arith.constant 0 : index
      %91 = vector.load %arg10[%c0_82, %c1_83, %c0_84] : memref<18x18x128xbf16, #tpu.memory_space<vmem>>, vector<1x16x128xbf16>
      tpu.vector_store %arg10[%c0_82, %c1_83, %c0_84], %90 {strides = array<i32>} : memref<18x18x128xbf16, #tpu.memory_space<vmem>>, vector<1x16x128xbf16>,
    } else {
    }
    %c0_i32_17 = arith.constant 0 : i32
    %22 = arith.cmpi eq, %arg1, %c0_i32_17 : i32
    %23 = arith.extui %22 : i1 to i32
    %c0_i32_18 = arith.constant 0 : i32
    %24 = arith.cmpi ne, %23, %c0_i32_18 : i32
    scf.if %24 {
      %cst_73 = arith.constant 0.000000e+00 : bf16
      %77 = vector.broadcast %cst_73 : bf16 to vector<1x16x128xbf16>
      %c0_74 = arith.constant 0 : index
      %c1_75 = arith.constant 1 : index
      %c0_76 = arith.constant 0 : index
      %78 = vector.load %arg10[%c0_74, %c1_75, %c0_76] : memref<18x18x128xbf16, #tpu.memory_space<vmem>>, vector<1x16x128xbf16>
      tpu.vector_store %arg10[%c0_74, %c1_75, %c0_76], %77 {strides = array<i32>} : memref<18x18x128xbf16, #tpu.memory_space<vmem>>, vector<1x16x128xbf16>,
    } else {
    }
    %c1_i32 = arith.constant 1 : i32
    %25 = arith.addi %arg1, %c1_i32 : i32
    %c16_i32 = arith.constant 16 : i32
    %26 = arith.muli %25, %c16_i32 : i32
    %c16_i32_19 = arith.constant 16 : i32
    %27 = arith.cmpi slt, %26, %c16_i32_19 : i32
    %28 = arith.extui %27 : i1 to i32
    %c0_i32_20 = arith.constant 0 : i32
    %29 = arith.cmpi ne, %28, %c0_i32_20 : i32
    scf.if %29 {
      %c0_73 = arith.constant 0 : index
      %c0_74 = arith.constant 0 : index
      %c0_75 = arith.constant 0 : index
      %c0_76 = arith.constant 0 : index
      %77 = vector.load %arg4[%c0_73, %c0_74, %c0_75, %c0_76] : memref<1x1x16x128xbf16, #tpu.memory_space<vmem>>, vector<1x1x16x128xbf16>
      %78 = vector.shape_cast %77 : vector<1x1x16x128xbf16> to vector<1x16x128xbf16>
      %79 = arith.extf %78 : vector<1x16x128xbf16> to vector<1x16x128xf32>
      %c0_77 = arith.constant 0 : index
      %c0_78 = arith.constant 0 : index
      %80 = vector.load %arg5[%c0_77, %c0_78] : memref<1x128xf32, #tpu.memory_space<vmem>>, vector<1x128xf32>
      %81 = vector.shape_cast %80 : vector<1x128xf32> to vector<1x1x128xf32>
      %82 = vector.broadcast %81 : vector<1x1x128xf32> to vector<1x16x128xf32>
      %83 = arith.mulf %79, %82 : vector<1x16x128xf32>
      %c0_79 = arith.constant 0 : index
      %c0_80 = arith.constant 0 : index
      %84 = vector.load %arg6[%c0_79, %c0_80] : memref<1x128xf32, #tpu.memory_space<vmem>>, vector<1x128xf32>
      %85 = vector.shape_cast %84 : vector<1x128xf32> to vector<1x1x128xf32>
      %86 = vector.broadcast %85 : vector<1x1x128xf32> to vector<1x16x128xf32>
      %87 = arith.addf %83, %86 : vector<1x16x128xf32>
      %cst_81 = arith.constant 0.000000e+00 : f32
      %88 = vector.broadcast %cst_81 : f32 to vector<1x16x128xf32>
      %89 = arith.maximumf %87, %88 : vector<1x16x128xf32>
      %90 = arith.truncf %89 : vector<1x16x128xf32> to vector<1x16x128xbf16>
      %c17_82 = arith.constant 17 : index
      %c1_83 = arith.constant 1 : index
      %c0_84 = arith.constant 0 : index
      %91 = vector.load %arg10[%c17_82, %c1_83, %c0_84] : memref<18x18x128xbf16, #tpu.memory_space<vmem>>, vector<1x16x128xbf16>
      tpu.vector_store %arg10[%c17_82, %c1_83, %c0_84], %90 {strides = array<i32>} : memref<18x18x128xbf16, #tpu.memory_space<vmem>>, vector<1x16x128xbf16>,
    } else {
    }
    %true = arith.constant true
    %30 = arith.xori %27, %true : i1
    %31 = arith.extui %30 : i1 to i32
    %c0_i32_21 = arith.constant 0 : i32
    %32 = arith.cmpi ne, %31, %c0_i32_21 : i32
    scf.if %32 {
      %cst_73 = arith.constant 0.000000e+00 : bf16
      %77 = vector.broadcast %cst_73 : bf16 to vector<1x16x128xbf16>
      %c17_74 = arith.constant 17 : index
      %c1_75 = arith.constant 1 : index
      %c0_76 = arith.constant 0 : index
      %78 = vector.load %arg10[%c17_74, %c1_75, %c0_76] : memref<18x18x128xbf16, #tpu.memory_space<vmem>>, vector<1x16x128xbf16>
      tpu.vector_store %arg10[%c17_74, %c1_75, %c0_76], %77 {strides = array<i32>} : memref<18x18x128xbf16, #tpu.memory_space<vmem>>, vector<1x16x128xbf16>,
    } else {
    }
    %c0_22 = arith.constant 0 : index
    %c0_23 = arith.constant 0 : index
    %c0_24 = arith.constant 0 : index
    %33 = vector.load %arg10[%c0_22, %c0_23, %c0_24] : memref<18x18x128xbf16, #tpu.memory_space<vmem>>, vector<16x16x128xbf16>
    %34 = vector.shape_cast %33 : vector<16x16x128xbf16> to vector<256x128xbf16>
    %c0_25 = arith.constant 0 : index
    %c0_26 = arith.constant 0 : index
    %35 = vector.load %arg11[%c0_25, %c0_26] : memref<256x1152xbf16, #tpu.memory_space<vmem>>, vector<256x128xbf16>
    tpu.vector_store %arg11[%c0_25, %c0_26], %34 {strides = array<i32>} : memref<256x1152xbf16, #tpu.memory_space<vmem>>, vector<256x128xbf16>,
    %c0_27 = arith.constant 0 : index
    %c1_28 = arith.constant 1 : index
    %c0_29 = arith.constant 0 : index
    %36 = vector.load %arg10[%c0_27, %c1_28, %c0_29] : memref<18x18x128xbf16, #tpu.memory_space<vmem>>, vector<16x16x128xbf16>
    %37 = vector.shape_cast %36 : vector<16x16x128xbf16> to vector<256x128xbf16>
    %c0_30 = arith.constant 0 : index
    %c128 = arith.constant 128 : index
    %38 = vector.load %arg11[%c0_30, %c128] : memref<256x1152xbf16, #tpu.memory_space<vmem>>, vector<256x128xbf16>
    tpu.vector_store %arg11[%c0_30, %c128], %37 {strides = array<i32>} : memref<256x1152xbf16, #tpu.memory_space<vmem>>, vector<256x128xbf16>,
    %c0_31 = arith.constant 0 : index
    %c2 = arith.constant 2 : index
    %c0_32 = arith.constant 0 : index
    %39 = vector.load %arg10[%c0_31, %c2, %c0_32] : memref<18x18x128xbf16, #tpu.memory_space<vmem>>, vector<16x16x128xbf16>
    %40 = vector.shape_cast %39 : vector<16x16x128xbf16> to vector<256x128xbf16>
    %c0_33 = arith.constant 0 : index
    %c256 = arith.constant 256 : index
    %41 = vector.load %arg11[%c0_33, %c256] : memref<256x1152xbf16, #tpu.memory_space<vmem>>, vector<256x128xbf16>
    tpu.vector_store %arg11[%c0_33, %c256], %40 {strides = array<i32>} : memref<256x1152xbf16, #tpu.memory_space<vmem>>, vector<256x128xbf16>,
    %c1_34 = arith.constant 1 : index
    %c0_35 = arith.constant 0 : index
    %c0_36 = arith.constant 0 : index
    %42 = vector.load %arg10[%c1_34, %c0_35, %c0_36] : memref<18x18x128xbf16, #tpu.memory_space<vmem>>, vector<16x16x128xbf16>
    %43 = vector.shape_cast %42 : vector<16x16x128xbf16> to vector<256x128xbf16>
    %c0_37 = arith.constant 0 : index
    %c384 = arith.constant 384 : index
    %44 = vector.load %arg11[%c0_37, %c384] : memref<256x1152xbf16, #tpu.memory_space<vmem>>, vector<256x128xbf16>
    tpu.vector_store %arg11[%c0_37, %c384], %43 {strides = array<i32>} : memref<256x1152xbf16, #tpu.memory_space<vmem>>, vector<256x128xbf16>,
    %c1_38 = arith.constant 1 : index
    %c1_39 = arith.constant 1 : index
    %c0_40 = arith.constant 0 : index
    %45 = vector.load %arg10[%c1_38, %c1_39, %c0_40] : memref<18x18x128xbf16, #tpu.memory_space<vmem>>, vector<16x16x128xbf16>
    %46 = vector.shape_cast %45 : vector<16x16x128xbf16> to vector<256x128xbf16>
    %c0_41 = arith.constant 0 : index
    %c512 = arith.constant 512 : index
    %47 = vector.load %arg11[%c0_41, %c512] : memref<256x1152xbf16, #tpu.memory_space<vmem>>, vector<256x128xbf16>
    tpu.vector_store %arg11[%c0_41, %c512], %46 {strides = array<i32>} : memref<256x1152xbf16, #tpu.memory_space<vmem>>, vector<256x128xbf16>,
    %c1_42 = arith.constant 1 : index
    %c2_43 = arith.constant 2 : index
    %c0_44 = arith.constant 0 : index
    %48 = vector.load %arg10[%c1_42, %c2_43, %c0_44] : memref<18x18x128xbf16, #tpu.memory_space<vmem>>, vector<16x16x128xbf16>
    %49 = vector.shape_cast %48 : vector<16x16x128xbf16> to vector<256x128xbf16>
    %c0_45 = arith.constant 0 : index
    %c640 = arith.constant 640 : index
    %50 = vector.load %arg11[%c0_45, %c640] : memref<256x1152xbf16, #tpu.memory_space<vmem>>, vector<256x128xbf16>
    tpu.vector_store %arg11[%c0_45, %c640], %49 {strides = array<i32>} : memref<256x1152xbf16, #tpu.memory_space<vmem>>, vector<256x128xbf16>,
    %c2_46 = arith.constant 2 : index
    %c0_47 = arith.constant 0 : index
    %c0_48 = arith.constant 0 : index
    %51 = vector.load %arg10[%c2_46, %c0_47, %c0_48] : memref<18x18x128xbf16, #tpu.memory_space<vmem>>, vector<16x16x128xbf16>
    %52 = vector.shape_cast %51 : vector<16x16x128xbf16> to vector<256x128xbf16>
    %c0_49 = arith.constant 0 : index
    %c768 = arith.constant 768 : index
    %53 = vector.load %arg11[%c0_49, %c768] : memref<256x1152xbf16, #tpu.memory_space<vmem>>, vector<256x128xbf16>
    tpu.vector_store %arg11[%c0_49, %c768], %52 {strides = array<i32>} : memref<256x1152xbf16, #tpu.memory_space<vmem>>, vector<256x128xbf16>,
    %c2_50 = arith.constant 2 : index
    %c1_51 = arith.constant 1 : index
    %c0_52 = arith.constant 0 : index
    %54 = vector.load %arg10[%c2_50, %c1_51, %c0_52] : memref<18x18x128xbf16, #tpu.memory_space<vmem>>, vector<16x16x128xbf16>
    %55 = vector.shape_cast %54 : vector<16x16x128xbf16> to vector<256x128xbf16>
    %c0_53 = arith.constant 0 : index
    %c896 = arith.constant 896 : index
    %56 = vector.load %arg11[%c0_53, %c896] : memref<256x1152xbf16, #tpu.memory_space<vmem>>, vector<256x128xbf16>
    tpu.vector_store %arg11[%c0_53, %c896], %55 {strides = array<i32>} : memref<256x1152xbf16, #tpu.memory_space<vmem>>, vector<256x128xbf16>,
    %c2_54 = arith.constant 2 : index
    %c2_55 = arith.constant 2 : index
    %c0_56 = arith.constant 0 : index
    %57 = vector.load %arg10[%c2_54, %c2_55, %c0_56] : memref<18x18x128xbf16, #tpu.memory_space<vmem>>, vector<16x16x128xbf16>
    %58 = vector.shape_cast %57 : vector<16x16x128xbf16> to vector<256x128xbf16>
    %c0_57 = arith.constant 0 : index
    %c1024 = arith.constant 1024 : index
    %59 = vector.load %arg11[%c0_57, %c1024] : memref<256x1152xbf16, #tpu.memory_space<vmem>>, vector<256x128xbf16>
    tpu.vector_store %arg11[%c0_57, %c1024], %58 {strides = array<i32>} : memref<256x1152xbf16, #tpu.memory_space<vmem>>, vector<256x128xbf16>,
    %c0_58 = arith.constant 0 : index
    %c0_59 = arith.constant 0 : index
    %60 = vector.load %arg11[%c0_58, %c0_59] : memref<256x1152xbf16, #tpu.memory_space<vmem>>, vector<256x1152xbf16>
    %c0_60 = arith.constant 0 : index
    %c0_61 = arith.constant 0 : index
    %61 = vector.load %arg7[%c0_60, %c0_61] : memref<1152x128xbf16, #tpu.memory_space<vmem>>, vector<1152x128xbf16>
    %cst_62 = arith.constant dense<0.000000e+00> : vector<256x128xf32>
    %62 = tpu.matmul %60, %61, %cst_62 {dimension_numbers = #tpu.dot_dimension_numbers<[1], [0], [0], [1], [0, 0, 1, 1], [], []>} : vector<256x1152xbf16>, vector<1152x128xbf16>, vector<256x128xf32> -> vector<256x128xf32>
    %63 = vector.shape_cast %62 : vector<256x128xf32> to vector<16x16x128xf32>
    %64 = arith.truncf %63 : vector<16x16x128xf32> to vector<16x16x128xbf16>
    %c0_63 = arith.constant 0 : index
    %c0_64 = arith.constant 0 : index
    %c0_65 = arith.constant 0 : index
    %c0_66 = arith.constant 0 : index
    %65 = vector.load %arg8[%c0_63, %c0_64, %c0_65, %c0_66] : memref<1x16x16x128xbf16, #tpu.memory_space<vmem>>, vector<1x16x16x128xbf16>
    %66 = vector.shape_cast %65 : vector<1x16x16x128xbf16> to vector<16x16x128xbf16>
    %67 = vector.shape_cast %64 : vector<16x16x128xbf16> to vector<1x16x16x128xbf16>
    tpu.vector_store %arg8[%c0_63, %c0_64, %c0_65, %c0_66], %67 {strides = array<i32>} : memref<1x16x16x128xbf16, #tpu.memory_space<vmem>>, vector<1x16x16x128xbf16>,
    %cst_67 = arith.constant dense<0.000000e+00> : vector<128xf32>
    %68 = vector.multi_reduction <add>, %62, %cst_67 [0] : vector<256x128xf32> to vector<128xf32>
    %69 = vector.shape_cast %68 : vector<128xf32> to vector<1x128xf32>
    %70 = arith.mulf %62, %62 : vector<256x128xf32>
    %cst_68 = arith.constant dense<0.000000e+00> : vector<128xf32>
    %71 = vector.multi_reduction <add>, %70, %cst_68 [0] : vector<256x128xf32> to vector<128xf32>
    %72 = vector.shape_cast %71 : vector<128xf32> to vector<1x128xf32>
    %73 = tpu.concatenate %69, %72 in 0 : vector<1x128xf32>, vector<1x128xf32> -> vector<2x128xf32>
    %c0_69 = arith.constant 0 : index
    %c0_70 = arith.constant 0 : index
    %c0_71 = arith.constant 0 : index
    %c0_72 = arith.constant 0 : index
    %74 = vector.load %arg9[%c0_69, %c0_70, %c0_71, %c0_72] : memref<1x1x2x128xf32, #tpu.memory_space<vmem>>, vector<1x1x2x128xf32>
    %75 = vector.shape_cast %74 : vector<1x1x2x128xf32> to vector<2x128xf32>
    %76 = vector.shape_cast %73 : vector<2x128xf32> to vector<1x1x2x128xf32>
    tpu.vector_store %arg9[%c0_69, %c0_70, %c0_71, %c0_72], %76 {strides = array<i32>} : memref<1x1x2x128xf32, #tpu.memory_space<vmem>>, vector<1x1x2x128xf32>,
    return
  }
  func.func @transform_0(%arg0: i32, %arg1: i32) -> (i32, i32, i32, i32) {
    %c0_i32 = arith.constant 0 : i32
    %c0_i32_0 = arith.constant 0 : i32
    %c0_i32_1 = arith.constant 0 : i32
    return %arg0, %arg1, %c0_i32, %c0_i32_0 : i32, i32, i32, i32
  }
  func.func @transform_1(%arg0: i32, %arg1: i32) -> (i32, i32, i32, i32) {
    %c16_i32 = arith.constant 16 : i32
    %0 = arith.muli %arg1, %c16_i32 : i32
    %c1_i32 = arith.constant 1 : i32
    %1 = arith.subi %0, %c1_i32 : i32
    %c0_i32 = arith.constant 0 : i32
    %2 = arith.maxsi %1, %c0_i32 : i32
    %c0_i32_0 = arith.constant 0 : i32
    %c0_i32_1 = arith.constant 0 : i32
    %c0_i32_2 = arith.constant 0 : i32
    return %arg0, %2, %c0_i32_0, %c0_i32_1 : i32, i32, i32, i32
  }
  func.func @transform_2(%arg0: i32, %arg1: i32) -> (i32, i32, i32, i32) {
    %c1_i32 = arith.constant 1 : i32
    %0 = arith.addi %arg1, %c1_i32 : i32
    %c16_i32 = arith.constant 16 : i32
    %1 = arith.muli %0, %c16_i32 : i32
    %c15_i32 = arith.constant 15 : i32
    %2 = arith.minsi %1, %c15_i32 : i32
    %c0_i32 = arith.constant 0 : i32
    %c0_i32_0 = arith.constant 0 : i32
    %c0_i32_1 = arith.constant 0 : i32
    return %arg0, %2, %c0_i32, %c0_i32_0 : i32, i32, i32, i32
  }
  func.func @transform_3(%arg0: i32, %arg1: i32) -> (i32, i32) {
    %c0_i32 = arith.constant 0 : i32
    %c0_i32_0 = arith.constant 0 : i32
    %c0_i32_1 = arith.constant 0 : i32
    return %c0_i32, %c0_i32_0 : i32, i32
  }
  func.func @transform_4(%arg0: i32, %arg1: i32) -> (i32, i32) {
    %c0_i32 = arith.constant 0 : i32
    %c0_i32_0 = arith.constant 0 : i32
    %c0_i32_1 = arith.constant 0 : i32
    return %c0_i32, %c0_i32_0 : i32, i32
  }
  func.func @transform_5(%arg0: i32, %arg1: i32) -> (i32, i32) {
    %c0_i32 = arith.constant 0 : i32
    %c0_i32_0 = arith.constant 0 : i32
    %c0_i32_1 = arith.constant 0 : i32
    return %c0_i32, %c0_i32_0 : i32, i32
  }
  func.func @transform_6(%arg0: i32, %arg1: i32) -> (i32, i32, i32, i32) {
    %c0_i32 = arith.constant 0 : i32
    %c0_i32_0 = arith.constant 0 : i32
    %c0_i32_1 = arith.constant 0 : i32
    return %arg0, %arg1, %c0_i32, %c0_i32_0 : i32, i32, i32, i32
  }
  func.func @transform_7(%arg0: i32, %arg1: i32) -> (i32, i32, i32, i32) {
    %c0_i32 = arith.constant 0 : i32
    %c0_i32_0 = arith.constant 0 : i32
    %c0_i32_1 = arith.constant 0 : i32
    return %arg0, %arg1, %c0_i32, %c0_i32_0 : i32, i32, i32, i32
  }
}

</mosaic_0001>

<bundles_post_ra>
// kernel: inconv_forward.2
= control target key start
LH: loop header
LB: loop body
LE: loop exit
PB: predicated region body
PF: predicated region fallthrough
CT: control target
= control target key end

     0   :  { %s1371_s12 = smov 0   ;;  %s1373_s13 = smov 0   ;;  %s1559_s0 = inlined_call_operand.vmem [shape: bf16[2,16,16,128], index: 0, kind: input, shape index: {}]   ;;  %s1560_s1 = inlined_call_operand.vmem [shape: bf16[128,128], index: 1, kind: input, shape index: {}]   ;;  %s1561_s2 = inlined_call_operand.vmem [shape: bf16[2,16,16,128], index: 2, kind: output, shape index: {0}]   ;;  %s1562_s3 = inlined_call_operand.vmem [shape: f32[2,1,2,128], index: 3, kind: output, shape index: {1}]  }
   0x1   :  { %s1375_s14 = smov 0  }
   0x2 LB: > { %s26_s15 = sadd.s32 1, %s1345_s13  ;;  %p998_p0 = scmp.ge.s32.totalorder %s1349_s14, 1  ;;  %s1349_s14 = sphi %s1375_s14, %s14_s14   ;;  %s1345_s13 = sphi %s1373_s13, %s1564_s13   ;;  %s1341_s12 = sphi %s1371_s12, %s1563_s12  }
   0x3   : > { %p28_p1 = scmp.ge.s32.totalorder %s26_s15, 2  ;;  %p164_p2 = scmp.lt.s32.totalorder %s1349_s14, 3 }
   0x5   : > { %s1566_s15 = smov (%p28_p1, %s26_s15), 0  ;;  %p165_p3 = pnand %p998_p0, %p164_p2 }
   0x6   : > { %v1303_v0 = vld [vmem:[%s1560_s1] sm:$0xff] (!%p165_p3)   ;;  %p206_p4 = scmp.lt.s32.totalorder (!%p165_p3), %s1341_s12, 1  ;;  %v1304_v1 = vld [vmem:[%s1560_s1 + $0x8] sm:$0xff] (!%p165_p3)   ;;  %v1305_v2 = vld [vmem:[%s1560_s1 + $0x10] sm:$0xff] (!%p165_p3)   ;;  %vm854_vm0 = vcmask (!%p165_p3), 1040384  }
   0x7   : > { %168 = sbr.rel (%p165_p3) target bundleno = 332 (0x14c), region = 28  ;;  %1215 = vmatprep.subr.bf16.mxu0 (!%p165_p3), %v1303_v0  ;;  %1263 = vmatprep.subr.bf16.mxu1 (!%p165_p3), %v1303_v0  ;;  %v1306_v3 = vld [vmem:[%s1560_s1 + $0x18] sm:$0xff] (!%p165_p3)   ;;  %v1307_v5 = vld [vmem:[%s1560_s1 + $0x20] sm:$0xff] (!%p165_p3)   ;;  %v1308_v6 = vld [vmem:[%s1560_s1 + $0x28] sm:$0xff] (!%p165_p3)  }
   0x8   : > { %1216 = vmatpush3.bf16.msra.mxu0 (!%p165_p3), %v1303_v0  ;;  %1271 = vmatpush3.bf16.msra.mxu1 (!%p165_p3), %v1303_v0  ;;  %v1309_v8 = vld [vmem:[%s1560_s1 + $0x30] sm:$0xff] (!%p165_p3)   ;;  %v1310_v9 = vld [vmem:[%s1560_s1 + $0x38] sm:$0xff] (!%p165_p3)  }
   0x9   : > { %1217 = vmatprep.subr.bf16.mxu0 (!%p165_p3), %v1304_v1  ;;  %1264 = vmatprep.subr.bf16.mxu1 (!%p165_p3), %v1304_v1 }
   0xc   : > { %1218 = vmatpush3.bf16.msra.mxu0 (!%p165_p3), %v1304_v1  ;;  %1272 = vmatpush3.bf16.msra.mxu1 (!%p165_p3), %v1304_v1 }
   0xd   : > { %1219 = vmatprep.subr.bf16.mxu0 (!%p165_p3), %v1305_v2  ;;  %1265 = vmatprep.subr.bf16.mxu1 (!%p165_p3), %v1305_v2 }
   0xe   : > { %s1568_s12 = smov (!%p206_p4, %s1341_s12), 1 }
   0xf   : > { %s1062_s22 = sshll.u32 %s1568_s12, 7  ;;  %s1003_s16 = sshll.u32 %s1568_s12, 1 }
  0x10   : > { %s1406_s25 = scalar_lea.vmem %s1559_s0, %s1062_s22  ;;  %1220 = vmatpush3.bf16.msra.mxu0 %v1305_v2  ;;  %1273 = vmatpush3.bf16.msra.mxu1 %v1305_v2  ;;  %s1448_s11 = scalar_lea.vmem %s1561_s2, %s1062_s22 }
  0x11   : > { %v1311_v4 = vld [vmem:[%s1406_s25] sm:$0xff]   ;;  %1221 = vmatprep.subr.bf16.mxu0 %v1306_v3  ;;  %1266 = vmatprep.subr.bf16.mxu1 %v1306_v3  ;;  %v1312_v10 = vld [vmem:[%s1406_s25 + $0x8] sm:$0xff]   ;;  %v1313_v12 = vld [vmem:[%s1406_s25 + $0x10] sm:$0xff]   ;;  %s233_s19 = scalar_lea.vmem %s1562_s3, %s1003_s16 }
  0x12   : > { %1231 = vmatprep.mubr.bf16.mxu0 %v1311_v4  ;;  %v1319_v7 = vld [vmem:[%s1406_s25 + $0x40] sm:$0xff]   ;;  %v1320_v11 = vld [vmem:[%s1406_s25 + $0x48] sm:$0xff]   ;;  %v1321_v13 = vld [vmem:[%s1406_s25 + $0x50] sm:$0xff]  }
  0x13   : > { %1247 = vmatprep.mubr.bf16.mxu1 %v1319_v7  ;;  %v1314_v14 = vld [vmem:[%s1406_s25 + $0x18] sm:$0xff]   ;;  %v1315_v16 = vld [vmem:[%s1406_s25 + $0x20] sm:$0xff]   ;;  %v1316_v18 = vld [vmem:[%s1406_s25 + $0x28] sm:$0xff]  }
  0x14   : > { %1222 = vmatpush3.bf16.msra.mxu0 %v1306_v3  ;;  %1274 = vmatpush3.bf16.msra.mxu1 %v1306_v3  ;;  %v1322_v15 = vld [vmem:[%s1406_s25 + $0x58] sm:$0xff]   ;;  %v1323_v17 = vld [vmem:[%s1406_s25 + $0x60] sm:$0xff]   ;;  %v1324_v19 = vld [vmem:[%s1406_s25 + $0x68] sm:$0xff]  }
  0x15   : > { %1223 = vmatprep.subr.bf16.mxu0 %v1307_v5  ;;  %1267 = vmatprep.subr.bf16.mxu1 %v1307_v5  ;;  %v1317_v20 = vld [vmem:[%s1406_s25 + $0x30] sm:$0xff]   ;;  %v1318_v22 = vld [vmem:[%s1406_s25 + $0x38] sm:$0xff]  }
  0x16   : > { %v1325_v21 = vld [vmem:[%s1406_s25 + $0x70] sm:$0xff]   ;;  %v1326_v23 = vld [vmem:[%s1406_s25 + $0x78] sm:$0xff]  }
  0x18   : > { %1224 = vmatpush3.bf16.msra.mxu0 %v1307_v5  ;;  %1275 = vmatpush3.bf16.msra.mxu1 %v1307_v5 }
  0x19   : > { %1225 = vmatprep.subr.bf16.mxu0 %v1308_v6  ;;  %1268 = vmatprep.subr.bf16.mxu1 %v1308_v6 }
  0x1c   : > { %1226 = vmatpush3.bf16.msra.mxu0 %v1308_v6  ;;  %1276 = vmatpush3.bf16.msra.mxu1 %v1308_v6 }
  0x1d   : > { %1227 = vmatprep.subr.bf16.mxu0 %v1309_v8  ;;  %1269 = vmatprep.subr.bf16.mxu1 %v1309_v8 }
  0x20   : > { %1228 = vmatpush3.bf16.msra.mxu0 %v1309_v8  ;;  %1277 = vmatpush3.bf16.msra.mxu1 %v1309_v8 }
  0x21   : > { %1229 = vmatprep.subr.bf16.mxu0 %v1310_v9  ;;  %1270 = vmatprep.subr.bf16.mxu1 %v1310_v9 }
  0x24   : > { %1230 = vmatpush3.bf16.msra.mxu0 %v1310_v9  ;;  %1278 = vmatpush3.bf16.msra.mxu1 %v1310_v9 }
  0x27   : > { %1232 = vmatmul.mubr.bf16.vlgmr.msra.gmra.mrb[0].mxu0 %v1312_v10  ;;  %1248 = vmatmul.mubr.bf16.vlgmr.msra.gmra.mrb[0].mxu1 %v1320_v11 }
  0x28   : > { %1235 = vmatprep.mubr.bf16.mxu0 %v1313_v12  ;;  %1251 = vmatprep.mubr.bf16.mxu1 %v1321_v13 }
  0x2f   : > { %1236 = vmatmul.mubr.bf16.gmra.mrb[4].mxu0 %v1314_v14  ;;  %1252 = vmatmul.mubr.bf16.gmra.mrb[4].mxu1 %v1322_v15 }
  0x30   : > { %1239 = vmatprep.mubr.bf16.mxu0 %v1315_v16  ;;  %1255 = vmatprep.mubr.bf16.mxu1 %v1323_v17 }
  0x37   : > { %1240 = vmatmul.mubr.bf16.gmra.mrb[8].mxu0 %v1316_v18  ;;  %1256 = vmatmul.mubr.bf16.gmra.mrb[8].mxu1 %v1324_v19 }
  0x38   : > { %1243 = vmatprep.mubr.bf16.mxu0 %v1317_v20  ;;  %1259 = vmatprep.mubr.bf16.mxu1 %v1325_v21 }
  0x3f   : > { %1244 = vmatmul.mubr.bf16.gmra.mrb[12].mxu0 %v1318_v22  ;;  %1260 = vmatmul.mubr.bf16.gmra.mrb[12].mxu1 %v1326_v23 }
  0xfa   : > { %v1233_v24 = vpop.f32.mrb[0].mxu0  ;;  %v1439_v25 = vpop.f32.mrb[0].mxu1 }
  0xfb   : > { %v461_v26 = vpop.f32.mrb[1].mxu0  ;;  %v1441_v27 = vpop.f32.mrb[1].mxu1  ;;  %v787_v39 = vmul.f32 %v1233_v24, %v1233_v24 }
  0xfc   : > { %v1234_v28 = vpop.f32.mrb[2].mxu0  ;;  %v1450_v29 = vpop.f32.mrb[2].mxu1  ;;  %v785_v30 = vmul.f32 %v461_v26, %v461_v26 }
  0xfd   : > { %v1104_v31 = vpack.c.bf16 %v1234_v28, %v1233_v24  ;;  %v464_v32 = vpop.f32.mrb[3].mxu0  ;;  %v1144_v33 = vpack.c.bf16 %v1450_v29, %v1439_v25  ;;  %v1454_v34 = vpop.f32.mrb[3].mxu1  ;;  %v788_v42 = vmul.f32 %v1234_v28, %v1234_v28 }
  0xfe   : > { %v1099_v35 = vpack.c.bf16 %v464_v32, %v461_v26  ;;  %v748_v36 = vadd.f32 %v464_v32, %v461_v26  ;;  %v786_v37 = vmul.f32 %v464_v32, %v464_v32  ;;  %v1139_v38 = vpack.c.bf16 %v1454_v34, %v1441_v27 }
  0xff   : > { %1176 = vst [vmem:[%s1448_s11 + $0x8] sm:$0xff] %v1104_v31   ;;  %1184 = vst [vmem:[%s1448_s11 + $0x48] sm:$0xff] %v1144_v33  }
 0x100   : > { %1100 = vst [vmem:[%s1448_s11] sm:$0xff] %v1099_v35   ;;  %v749_v40 = vadd.f32 %v1233_v24, %v748_v36  ;;  %v817_v41 = vadd.f32 %v786_v37, %v785_v30  ;;  %1183 = vst [vmem:[%s1448_s11 + $0x40] sm:$0xff] %v1139_v38  }
 0x102   : > { %v818_v43 = vadd.f32 %v817_v41, %v787_v39  ;;  %v1237_v44 = vpop.f32.mrb[4].mxu0  ;;  %v750_v45 = vadd.f32 %v1234_v28, %v749_v40  ;;  %v1462_v46 = vpop.f32.mrb[4].mxu1 }
 0x103   : > { %v477_v47 = vpop.f32.mrb[5].mxu0  ;;  %v1464_v48 = vpop.f32.mrb[5].mxu1  ;;  %v791_v63 = vmul.f32 %v1237_v44, %v1237_v44 }
 0x104   : > { %v751_v49 = vadd.f32 %v750_v45, %v477_v47  ;;  %v789_v50 = vmul.f32 %v477_v47, %v477_v47  ;;  %v819_v51 = vadd.f32 %v818_v43, %v788_v42  ;;  %v1238_v52 = vpop.f32.mrb[6].mxu0  ;;  %v1466_v53 = vpop.f32.mrb[6].mxu1 }
 0x105   : > { %v1114_v54 = vpack.c.bf16 %v1238_v52, %v1237_v44  ;;  %v480_v55 = vpop.f32.mrb[7].mxu0  ;;  %v1154_v56 = vpack.c.bf16 %v1466_v53, %v1462_v46  ;;  %v1470_v57 = vpop.f32.mrb[7].mxu1  ;;  %v792_v2 = vmul.f32 %v1238_v52, %v1238_v52 }
 0x106   : > { %v820_v58 = vadd.f32 %v819_v51, %v789_v50  ;;  %v1109_v59 = vpack.c.bf16 %v480_v55, %v477_v47  ;;  %v752_v60 = vadd.f32 %v751_v49, %v480_v55  ;;  %v790_v61 = vmul.f32 %v480_v55, %v480_v55 }
 0x107   : > { %1178 = vst [vmem:[%s1448_s11 + $0x18] sm:$0xff] %v1114_v54   ;;  %1186 = vst [vmem:[%s1448_s11 + $0x58] sm:$0xff] %v1154_v56   ;;  %v1149_v62 = vpack.c.bf16 %v1470_v57, %v1464_v48 }
 0x108   : > { %1177 = vst [vmem:[%s1448_s11 + $0x10] sm:$0xff] %v1109_v59   ;;  %v753_v0 = vadd.f32 %v1237_v44, %v752_v60  ;;  %v821_v1 = vadd.f32 %v820_v58, %v790_v61  ;;  %v801_v61 = vmul.f32 %v1441_v27, %v1441_v27 }
 0x109   : > { %1185 = vst [vmem:[%s1448_s11 + $0x50] sm:$0xff] %v1149_v62  }
 0x10a   : > { %v822_v3 = vadd.f32 %v821_v1, %v791_v63  ;;  %v1241_v4 = vpop.f32.mrb[8].mxu0  ;;  %v754_v5 = vadd.f32 %v1238_v52, %v753_v0  ;;  %v1478_v6 = vpop.f32.mrb[8].mxu1 }
 0x10b   : > { %v493_v7 = vpop.f32.mrb[9].mxu0  ;;  %v1480_v8 = vpop.f32.mrb[9].mxu1  ;;  %v795_v23 = vmul.f32 %v1241_v4, %v1241_v4 }
 0x10c   : > { %v755_v9 = vadd.f32 %v754_v5, %v493_v7  ;;  %v793_v10 = vmul.f32 %v493_v7, %v493_v7  ;;  %v823_v11 = vadd.f32 %v822_v3, %v792_v2  ;;  %v1242_v12 = vpop.f32.mrb[10].mxu0  ;;  %v1482_v13 = vpop.f32.mrb[10].mxu1  ;;  %v802_v2 = vmul.f32 %v1454_v34, %v1454_v34 }
 0x10d   : > { %v1124_v14 = vpack.c.bf16 %v1242_v12, %v1241_v4  ;;  %v496_v15 = vpop.f32.mrb[11].mxu0  ;;  %v1164_v16 = vpack.c.bf16 %v1482_v13, %v1478_v6  ;;  %v1486_v17 = vpop.f32.mrb[11].mxu1  ;;  %v796_v28 = vmul.f32 %v1242_v12, %v1242_v12  ;;  %v803_v3 = vmul.f32 %v1439_v25, %v1439_v25 }
 0x10e   : > { %v824_v18 = vadd.f32 %v823_v11, %v793_v10  ;;  %v1119_v19 = vpack.c.bf16 %v496_v15, %v493_v7  ;;  %v756_v20 = vadd.f32 %v755_v9, %v496_v15  ;;  %v794_v21 = vmul.f32 %v496_v15, %v496_v15 }
 0x10f   : > { %1180 = vst [vmem:[%s1448_s11 + $0x28] sm:$0xff] %v1124_v14   ;;  %1188 = vst [vmem:[%s1448_s11 + $0x68] sm:$0xff] %v1164_v16   ;;  %v1159_v22 = vpack.c.bf16 %v1486_v17, %v1480_v8  ;;  %v804_v7 = vmul.f32 %v1450_v29, %v1450_v29  ;;  %v806_v15 = vmul.f32 %v1470_v57, %v1470_v57 }
 0x110   : > { %1179 = vst [vmem:[%s1448_s11 + $0x20] sm:$0xff] %v1119_v19   ;;  %v757_v24 = vadd.f32 %v1241_v4, %v756_v20  ;;  %v825_v26 = vadd.f32 %v824_v18, %v794_v21 }
 0x111   : > { %1187 = vst [vmem:[%s1448_s11 + $0x60] sm:$0xff] %v1159_v22  }
 0x112   : > { %v826_v30 = vadd.f32 %v825_v26, %v795_v23  ;;  %v1245_v31 = vpop.f32.mrb[12].mxu0  ;;  %v758_v32 = vadd.f32 %v1242_v12, %v757_v24  ;;  %v1494_v33 = vpop.f32.mrb[12].mxu1  ;;  %v810_v24 = vmul.f32 %v1486_v17, %v1486_v17 }
 0x113   : > { %v509_v35 = vpop.f32.mrb[13].mxu0  ;;  %v573_v36 = vpop.f32.mrb[13].mxu1  ;;  %v799_v54 = vmul.f32 %v1245_v31, %v1245_v31 }
 0x114   : > { %v759_v37 = vadd.f32 %v758_v32, %v509_v35  ;;  %v797_v38 = vmul.f32 %v509_v35, %v509_v35  ;;  %v827_v39 = vadd.f32 %v826_v30, %v796_v28  ;;  %v1246_v40 = vpop.f32.mrb[14].mxu0  ;;  %v1496_v41 = vpop.f32.mrb[14].mxu1 }
 0x115   : > { %v1134_v42 = vpack.c.bf16 %v1246_v40, %v1245_v31  ;;  %v512_v43 = vpop.f32.mrb[15].mxu0  ;;  %v1174_v44 = vpack.c.bf16 %v1496_v41, %v1494_v33  ;;  %v576_v45 = vpop.f32.mrb[15].mxu1  ;;  %v800_v58 = vmul.f32 %v1246_v40, %v1246_v40 }
 0x116   : > { %v828_v47 = vadd.f32 %v827_v39, %v797_v38  ;;  %v1129_v49 = vpack.c.bf16 %v512_v43, %v509_v35  ;;  %v760_v50 = vadd.f32 %v759_v37, %v512_v43  ;;  %v798_v51 = vmul.f32 %v512_v43, %v512_v43 }
 0x117   : > { %1182 = vst [vmem:[%s1448_s11 + $0x38] sm:$0xff] %v1134_v42   ;;  %1190 = vst [vmem:[%s1448_s11 + $0x78] sm:$0xff] %v1174_v44   ;;  %v1169_v52 = vpack.c.bf16 %v576_v45, %v573_v36  ;;  %v814_v39 = vmul.f32 %v576_v45, %v576_v45  ;;  %v816_v42 = vmul.f32 %v1496_v41, %v1496_v41 }
 0x118   : > { %1181 = vst [vmem:[%s1448_s11 + $0x30] sm:$0xff] %v1129_v49   ;;  %v761_v55 = vadd.f32 %v1245_v31, %v760_v50  ;;  %v829_v56 = vadd.f32 %v828_v47, %v798_v51 }
 0x119   : > { %1189 = vst [vmem:[%s1448_s11 + $0x70] sm:$0xff] %v1169_v52  }
 0x11a   : > { %v830_v59 = vadd.f32 %v829_v56, %v799_v54  ;;  %v762_v60 = vadd.f32 %v1246_v40, %v761_v55 }
 0x11c   : > { %v763_v62 = vadd.f32 %v762_v60, %v1441_v27  ;;  %v831_v63 = vadd.f32 %v830_v59, %v800_v58  ;;  %v805_v27 = vmul.f32 %v1464_v48, %v1464_v48 }
 0x11e   : > { %v832_v0 = vadd.f32 %v831_v63, %v801_v61  ;;  %v764_v1 = vadd.f32 %v763_v62, %v1454_v34 }
 0x120   : > { %v765_v4 = vadd.f32 %v1439_v25, %v764_v1  ;;  %v833_v5 = vadd.f32 %v832_v0, %v802_v2  ;;  %v807_v25 = vmul.f32 %v1462_v46, %v1462_v46 }
 0x122   : > { %v834_v9 = vadd.f32 %v833_v5, %v803_v3  ;;  %v766_v10 = vadd.f32 %v1450_v29, %v765_v4  ;;  %v808_v29 = vmul.f32 %v1466_v53, %v1466_v53 }
 0x124   : > { %v767_v11 = vadd.f32 %v766_v10, %v1464_v48  ;;  %v835_v12 = vadd.f32 %v834_v9, %v804_v7  ;;  %v809_v48 = vmul.f32 %v1480_v8, %v1480_v8 }
 0x126   : > { %v836_v14 = vadd.f32 %v835_v12, %v805_v27  ;;  %v768_v34 = vadd.f32 %v767_v11, %v1470_v57 }
 0x128   : > { %v769_v16 = vadd.f32 %v1462_v46, %v768_v34  ;;  %v837_v18 = vadd.f32 %v836_v14, %v806_v15  ;;  %v811_v46 = vmul.f32 %v1478_v6, %v1478_v6 }
 0x12a   : > { %v838_v19 = vadd.f32 %v837_v18, %v807_v25  ;;  %v770_v20 = vadd.f32 %v1466_v53, %v769_v16  ;;  %v812_v53 = vmul.f32 %v1482_v13, %v1482_v13 }
 0x12c   : > { %v771_v21 = vadd.f32 %v770_v20, %v1480_v8  ;;  %v839_v22 = vadd.f32 %v838_v19, %v808_v29  ;;  %v813_v8 = vmul.f32 %v573_v36, %v573_v36 }
 0x12e   : > { %v840_v23 = vadd.f32 %v839_v22, %v809_v48  ;;  %v772_v57 = vadd.f32 %v771_v21, %v1486_v17  ;;  %v815_v17 = vmul.f32 %v1494_v33, %v1494_v33 }
 0x130   : > { %v773_v26 = vadd.f32 %v1478_v6, %v772_v57  ;;  %v841_v28 = vadd.f32 %v840_v23, %v810_v24 }
 0x132   : > { %v842_v30 = vadd.f32 %v841_v28, %v811_v46  ;;  %v774_v31 = vadd.f32 %v1482_v13, %v773_v26 }
 0x134   : > { %v775_v32 = vadd.f32 %v774_v31, %v573_v36  ;;  %v843_v35 = vadd.f32 %v842_v30, %v812_v53 }
 0x136   : > { %v844_v37 = vadd.f32 %v843_v35, %v813_v8  ;;  %v776_v38 = vadd.f32 %v775_v32, %v576_v45 }
 0x138   : > { %v777_v40 = vadd.f32 %v1494_v33, %v776_v38  ;;  %v845_v6 = vadd.f32 %v844_v37, %v814_v39 }
 0x13a   : > { %v778_v43 = vadd.f32 %v1496_v41, %v777_v40  ;;  %v846_v44 = vadd.f32 %v845_v6, %v815_v17 }
 0x13c   : > { %v779_v13 = vrot.slane %v778_v43, 4  ;;  %v847_v47 = vadd.f32 %v846_v44, %v816_v42 }
 0x13e   : > { %v780_v36 = vadd.f32 %v779_v13, %v778_v43  ;;  %v848_v49 = vrot.slane %v847_v47, 4 }
 0x140   : > { %v781_v50 = vrot.slane %v780_v36, 2  ;;  %v849_v51 = vadd.f32 %v848_v49, %v847_v47 }
 0x142   : > { %v782_v45 = vadd.f32 %v781_v50, %v780_v36  ;;  %v850_v52 = vrot.slane %v849_v51, 2 }
 0x144   : > { %v783_v54 = vrot.slane %v782_v45, 1  ;;  %v851_v55 = vadd.f32 %v850_v52, %v849_v51 }
 0x146   : > { %v852_v56 = vrot.slane %v851_v55, 1  ;;  %v784_v33 = vadd.f32 %v783_v54, %v782_v45 }
 0x148   : > { %v853_v41 = vadd.f32 %v852_v56, %v851_v55 }
 0x14a   : > { %v855_v58 = vsel %vm854_vm0, %v784_v33, %v853_v41 }
 0x14b   : > { %856 = vst [vmem:[%s233_s19] sm:$0x3] %v855_v58 }
 0x14c PF: > { %s14_s14 = sadd.s32 1, %s1349_s14   ;;  %s1563_s12 = smov %s1345_s13 }
 0x14d   : > { %p11_p5 = scmp.ge.s32.totalorder %s14_s14, 4   ;;  %s1564_s13 = smov %s1566_s15 }
 0x14f   :  { %13 = sbr.rel (!%p11_p5) target bundleno = 2 (0x2), region = 70 }

// kernel: inconv_forward.3
= control target key start
LH: loop header
LB: loop body
LE: loop exit
PB: predicated region body
PF: predicated region fallthrough
CT: control target
= control target key end

     0   :  { %s7598_s24 = smov 0   ;;  %s7600_s1 = smov 0   ;;  %s9618_s0 = inlined_call_operand.vmem [shape: bf16[2,16,16,128], index: 0, kind: input, shape index: {}, may-alias: {0,1,2}]   ;;  %s9619_s1 = inlined_call_operand.vmem [shape: bf16[2,16,16,128], index: 1, kind: input, shape index: {}, may-alias: {0,1,2}]   ;;  %s9620_s2 = inlined_call_operand.vmem [shape: bf16[2,16,16,128], index: 2, kind: input, shape index: {}, may-alias: {0,1,2}]   ;;  %s9621_s3 = inlined_call_operand.vmem [shape: f32[1,128], index: 3, kind: input, shape index: {}]   ;;  %s9622_s4 = inlined_call_operand.vmem [shape: f32[1,128], index: 4, kind: input, shape index: {}]   ;;  %s9623_s5 = inlined_call_operand.vmem [shape: bf16[1152,128], index: 5, kind: input, shape index: {}]   ;;  %s9624_s6 = inlined_call_operand.vmem [shape: bf16[2,16,16,128], index: 6, kind: output, shape index: {0}]   ;;  %s9625_s7 = inlined_call_operand.vmem [shape: f32[2,1,2,128], index: 7, kind: output, shape index: {1}]  }
   0x1   :  { %s7602_s2 = smov 0  }
   0x2 LB: > { %s30_s25 = sadd.s32 1, %s7551_s1  ;;  %p6251_p0 = scmp.ge.s32.totalorder %s7555_s2, 1  ;;  %s7555_s2 = sphi %s7602_s2, %s18_s2   ;;  %s7551_s1 = sphi %s7600_s1, %s9667_s1   ;;  %s7547_s24 = sphi %s7598_s24, %s9666_s24  }
   0x3   : > { %p32_p1 = scmp.ge.s32.totalorder %s30_s25, 2  ;;  %p328_p2 = scmp.lt.s32.totalorder %s7555_s2, 3 }
   0x5   : > { %s9669_s25 = smov (%p32_p1, %s30_s25), 0  ;;  %p329_p3 = pnand %p6251_p0, %p328_p2 }
   0x7   : > { %332 = sbr.rel (%p329_p3) target bundleno = 687 (0x2af), region = 44 }
   0xe   : > { %v7409_v0 = vld [vmem:[%s9623_s5 + $0x40] sm:$0xff]   ;;  %v7411_v2 = vld [vmem:[%s9623_s5 + $0x48] sm:$0xff]   ;;  %v7557_v4 = vmov 0   ;;  %v7413_v5 = vld [vmem:[%s9623_s5 + $0x50] sm:$0xff]   ;;  %p404_p4 = scmp.lt.s32.totalorder %s7547_s24, 1  ;;  %vm1068_vm0 = vcmask 1040384  }
   0xf   : > { %v7410_v1 = vld [vmem:[%s9623_s5] sm:$0xff]   ;;  %6848 = vmatprep.subr.bf16.mxu0 %v7409_v0  ;;  %7368 = vmatprep.subr.bf16.mxu1 %v7409_v0  ;;  %v7412_v3 = vld [vmem:[%s9623_s5 + $0x8] sm:$0xff]   ;;  %1355 = vst [vmem:[#allocation2 + $0x4] sm:$0xf] %v7557_v4  ;;  %1431 = vst [vmem:[#allocation2 + $0xd0] sm:$0xf] %v7557_v4 }
  0x10   : > { %6849 = vmatpush3.bf16.msra.mxu0 %v7410_v1  ;;  %7376 = vmatpush3.bf16.msra.mxu1 %v7410_v1  ;;  %v7414_v6 = vld [vmem:[%s9623_s5 + $0x10] sm:$0xff]   ;;  %v7415_v7 = vld [vmem:[%s9623_s5 + $0x58] sm:$0xff]   ;;  %s9671_s24 = smov (!%p404_p4, %s7547_s24), 1  ;;  %v7417_v9 = vld [vmem:[%s9623_s5 + $0x60] sm:$0xff]   ;;  %vm737_vm1 = vsmask.f32 256 }
  0x11   : > { %6850 = vmatprep.subr.bf16.mxu0 %v7411_v2  ;;  %7369 = vmatprep.subr.bf16.mxu1 %v7411_v2  ;;  %v7416_v8 = vld [vmem:[%s9623_s5 + $0x18] sm:$0xff]   ;;  %s6601_s21 = sshll.u32 %s9671_s24, 7  ;;  %v7418_v10 = vld [vmem:[%s9623_s5 + $0x20] sm:$0xff]   ;;  %v7419_v11 = vld [vmem:[%s9623_s5 + $0x68] sm:$0xff]   ;;  %vm1062_vm2 = vsmask.f32 7938 }
  0x12   : > { %v1178_v12 = vld [vmem:[#allocation2] sm:$0x1]  ;;  %s7661_s30 = scalar_lea.vmem %s9618_s0, %s6601_s21  ;;  %v1233_v13 = vld [vmem:[#allocation2 + $0x8] sm:$0x1]  ;;  %vm7668_vm3 = vmand %vm1068_vm0, %vm737_vm1  ;;  %vm1061_vm5 = vcmask 1043456   ;;  %v9631_v42 = vmov 0 }
  0x13   : > { %v7420_v15 = vld [vmem:[%s9623_s5 + $0x28] sm:$0xff]   ;;  %v1179_v19 = vsel %vm7668_vm3, 0, %v1178_v12  ;;  %vm7676_vm4 = vmand %vm1068_vm0, %vm1062_vm2  ;;  %v6675_v21 = vld [vmem:[%s7661_s30] sm:$0xff]   ;;  %vm738_vm7 = vsmask.f32 4368  ;;  %vm2190_vm12 = vcmask 1042432  }
  0x14   : > { %6851 = vmatpush3.bf16.msra.mxu0 %v7412_v3  ;;  %7377 = vmatpush3.bf16.msra.mxu1 %v7412_v3  ;;  %v7684_v22 = vld [vmem:[%s9621_s3] ss:$0 sm:$0xff]  ;;  %v7421_v23 = vld [vmem:[%s9623_s5 + $0x70] sm:$0xff]   ;;  %1180 = vst [vmem:[#allocation2] sm:$0x1] %v1179_v19  ;;  %v1234_v24 = vsel %vm7676_vm4, 0, %v1233_v13  ;;  %v6676_v27 = vunpack.c.l.bf16 %v6675_v21  ;;  %v6677_v29 = vunpack.c.h.bf16 %v6675_v21  ;;  %vm7715_vm6 = vmand %vm1061_vm5, %vm1062_vm2 }
  0x15   : > { %6852 = vmatprep.subr.bf16.mxu0 %v7413_v5  ;;  %7370 = vmatprep.subr.bf16.mxu1 %v7413_v5  ;;  %v6828_v28 = vld [vmem:[%s7661_s30 + $0x58] sm:$0xff]   ;;  %1235 = vst [vmem:[#allocation2 + $0x8] sm:$0x1] %v1234_v24  ;;  %v7697_v30 = vld [vmem:[%s9622_s4] ss:$0 sm:$0xff]  ;;  %v7422_v35 = vld [vmem:[%s9623_s5 + $0x30] sm:$0xff]  }
  0x16   : > { %v1580_v14 = vld [vmem:[#allocation2 + $0x4] sm:$0xf]  ;;  %v6720_v31 = vunpack.c.l.bf16 %v6828_v28  ;;  %v6721_v32 = vunpack.c.h.bf16 %v6828_v28  ;;  %v538_v34 = vmul.f32 %v6676_v27, %v7684_v22  ;;  %v539_v36 = vmul.f32 %v6677_v29, %v7684_v22  ;;  %v7423_v39 = vld [vmem:[%s9623_s5 + $0x78] sm:$0xff]   ;;  %v6818_v61 = vld [vmem:[%s7661_s30 + $0x8] sm:$0xff]  }
  0x17   : > { %v1640_v17 = vshll.u32 %v1580_v14, 16  ;;  %v1644_v18 = vshrl.u32 %v1580_v14, 16  ;;  %v7424_v41 = vld [vmem:[%s9623_s5 + $0x38] sm:$0xff]   ;;  %v9632_v42 = vsel %vm7715_vm6, 4294967295, %v9631_v42  ;;  %v7426_v47 = vld [vmem:[%s9623_s5 + $0xc0] sm:$0xff]   ;;  %v6680_v0 = vunpack.c.l.bf16 %v6818_v61  ;;  %vm7740_vm10 = vmor %vm737_vm1, %vm738_vm7 }
  0x18   : > { %6853 = vmatpush3.bf16.msra.mxu0 %v7414_v6  ;;  %7378 = vmatpush3.bf16.msra.mxu1 %v7414_v6  ;;  %v560_v37 = vmul.f32 %v6720_v31, %v7684_v22  ;;  %v561_v38 = vmul.f32 %v6721_v32, %v7684_v22  ;;  %v577_v40 = vadd.f32 %v7697_v30, %v538_v34  ;;  %vm1627_vm8 = vsmask.f32 3328  ;;  %v7427_v56 = vld [vmem:[%s9623_s5 + $0x140] sm:$0xff]   ;;  %v1064_v4 = vld [vmem:[#allocation2 + $0xc] sm:$0xf] }
  0x19   : > { %6854 = vmatprep.subr.bf16.mxu0 %v7415_v7  ;;  %7371 = vmatprep.subr.bf16.mxu1 %v7415_v7  ;;  %v7691_v25 = vrot.slane %v1640_v17, 5  ;;  %v1646_v26 = vrot.slane %v1644_v18, 4  ;;  %9633 = vst [vmem:[#allocation4_spill] sm:$0xff] %v9632_v42  ;;  %v578_v43 = vadd.f32 %v7697_v30, %v539_v36  ;;  %vm1628_vm9 = vsmask.f32 7440  ;;  %v6829_v7 = vld [vmem:[%s7661_s30 + $0x60] sm:$0xff]  }
  0x1a   : > { %v599_v44 = vadd.f32 %v7697_v30, %v560_v37  ;;  %v600_v45 = vadd.f32 %v7697_v30, %v561_v38  ;;  %v609_v46 = vmax.f32 %v577_v40, 0.0  ;;  %v6681_v1 = vunpack.c.h.bf16 %v6818_v61  ;;  %v1147_v17 = vld [vmem:[#allocation2 + $0x98] sm:$0x1]  ;;  %vm7760_vm11 = vmor %vm1627_vm8, %vm1628_vm9 }
  0x1b   : > { %v1647_v33 = vor.u32 %v1646_v26, %v7691_v25  ;;  %v1352_v48 = vld [vmem:[#allocation2] sm:$0xf]  ;;  %v610_v50 = vmax.f32 %v578_v43, 0.0  ;;  %v540_v12 = vmul.f32 %v6680_v0, %v7684_v22  ;;  %v6724_v19 = vunpack.c.l.bf16 %v6829_v7 }
  0x1c   : > { %6855 = vmatpush3.bf16.msra.mxu0 %v7416_v8  ;;  %7379 = vmatpush3.bf16.msra.mxu1 %v7416_v8  ;;  %v631_v51 = vmax.f32 %v599_v44, 0.0  ;;  %v632_v52 = vmax.f32 %v600_v45, 0.0  ;;  %v1353_v53 = vsel %vm7715_vm6, 0, %v1352_v48  ;;  %v1356_v54 = vld [vmem:[#allocation2 + $0x8] sm:$0x1]  ;;  %v6606_v55 = vpack.c.bf16 %v609_v46, %v609_v46 }
  0x1d   : > { %6856 = vmatprep.subr.bf16.mxu0 %v7417_v9  ;;  %7372 = vmatprep.subr.bf16.mxu1 %v7417_v9  ;;  %v7725_v49 = vrot.slane %v1647_v33, 4  ;;  %1354 = vst [vmem:[#allocation2] sm:$0xf] %v1353_v53  ;;  %v1357_v57 = vsel %vm7668_vm3, 0, %v1356_v54  ;;  %v6607_v58 = vpack.c.bf16 %v610_v50, %v610_v50  ;;  %v1070_v9 = vld [vmem:[#allocation2 + $0x14] sm:$0x1]  ;;  %v541_v18 = vmul.f32 %v6681_v1, %v7684_v22 }
  0x1e   : > { %v6628_v59 = vpack.c.bf16 %v631_v51, %v631_v51  ;;  %v6629_v60 = vpack.c.bf16 %v632_v52, %v632_v52  ;;  %1358 = vst [vmem:[#allocation2 + $0x8] sm:$0x1] %v1357_v57  ;;  %v741_v62 = vshrl.u32 %v6606_v55, 16  ;;  %v744_v63 = vshll.u32 %v6606_v55, 16 }
  0x1f   : > { %v749_v2 = vshrl.u32 %v6607_v58, 16  ;;  %v752_v3 = vshll.u32 %v6607_v58, 16  ;;  %v579_v27 = vadd.f32 %v7697_v30, %v540_v12  ;;  %v580_v37 = vadd.f32 %v7697_v30, %v541_v18 }
  0x20   : > { %6857 = vmatpush3.bf16.msra.mxu0 %v7418_v10  ;;  %7380 = vmatpush3.bf16.msra.mxu1 %v7418_v10  ;;  %v928_v5 = vshrl.u32 %v6628_v59, 16  ;;  %v931_v6 = vshll.u32 %v6628_v59, 16  ;;  %v743_v8 = vrot.slane %v741_v62, 7  ;;  %v936_v10 = vshrl.u32 %v6629_v60, 16 }
  0x21   : > { %6858 = vmatprep.subr.bf16.mxu0 %v7419_v11  ;;  %7373 = vmatprep.subr.bf16.mxu1 %v7419_v11  ;;  %v939_v11 = vshll.u32 %v6629_v60, 16  ;;  %v751_v13 = vrot.slane %v749_v2, 7  ;;  %v611_v52 = vmax.f32 %v579_v27, 0.0  ;;  %v612_v53 = vmax.f32 %v580_v37, 0.0  ;;  %v7766_v60 = vld [vmem:[%s7661_s30 + $0x10] sm:$0xff]  }
  0x22   : > { %v930_v14 = vrot.slane %v928_v5, 7  ;;  %v747_v24 = vrot.slane %v743_v8, 4  ;;  %v938_v26 = vrot.slane %v936_v10, 7  ;;  %v6725_v55 = vunpack.c.h.bf16 %v6829_v7  ;;  %v7431_v7 = vld [vmem:[%s9623_s5 + $0x100] sm:$0xff]  }
  0x23   : > { %v754_v28 = vor.u32 %v752_v3, %v751_v13  ;;  %v756_v29 = vrot.slane %v751_v13, 4  ;;  %v6608_v58 = vpack.c.bf16 %v611_v52, %v611_v52  ;;  %v6609_v59 = vpack.c.bf16 %v612_v53, %v612_v53  ;;  %v7805_v52 = vld [vmem:[%s7661_s30 + $0x68] sm:$0xff]  }
  0x24   : > { %6859 = vmatpush3.bf16.msra.mxu0 %v7420_v15  ;;  %7381 = vmatpush3.bf16.msra.mxu1 %v7420_v15  ;;  %v1143_v15 = vld [vmem:[#allocation2 + $0x90] sm:$0xf]  ;;  %v933_v31 = vor.u32 %v931_v6, %v930_v14  ;;  %v934_v32 = vrot.slane %v930_v14, 4  ;;  %v1579_v33 = vld [vmem:[#allocation2] sm:$0xf]  ;;  %v943_v36 = vrot.slane %v938_v26, 4  ;;  %v563_v62 = vmul.f32 %v6725_v55, %v7684_v22 }
  0x25   : > { %6860 = vmatprep.subr.bf16.mxu0 %v7421_v23  ;;  %7374 = vmatprep.subr.bf16.mxu1 %v7421_v23  ;;  %v746_v23 = vor.u32 %v744_v63, %v743_v8  ;;  %v1581_v38 = vld [vmem:[#allocation2 + $0x8] sm:$0x1]  ;;  %v1634_v40 = vshll.u32 %v1579_v33, 16  ;;  %v1071_v43 = vsel %vm7668_vm3, %v756_v29, %v1070_v9  ;;  %v6684_v0 = vunpack.c.l.bf16 %v7766_v60  ;;  %v7425_v5 = vld [vmem:[#allocation2] sm:$0xff]   ;;  %v1073_v9 = vld [vmem:[#allocation2 + $0x18] sm:$0xf] }
  0x26   : > { %v1650_v44 = vshll.u32 %v1581_v38, 16  ;;  %1072 = vst [vmem:[#allocation2 + $0x14] sm:$0x1] %v1071_v43  ;;  %v1144_v46 = vsel %vm7715_vm6, %v933_v31, %v1143_v15  ;;  %v758_v2 = vshrl.u32 %v6608_v58, 16  ;;  %v761_v3 = vshll.u32 %v6608_v58, 16 }
  0x27   : > { %v1065_v34 = vsel %vm7715_vm6, %v746_v23, %v1064_v4  ;;  %v1636_v51 = vrot.slane %v1634_v40, 5  ;;  %1145 = vst [vmem:[#allocation2 + $0x90] sm:$0xf] %v1144_v46  ;;  %v766_v4 = vshrl.u32 %v6609_v59, 16  ;;  %v769_v8 = vshll.u32 %v6609_v59, 16 }
  0x28   : > { %6861 = vmatpush3.bf16.msra.mxu0 %v7422_v35  ;;  %7382 = vmatpush3.bf16.msra.mxu1 %v7422_v35  ;;  %v941_v35 = vor.u32 %v939_v11, %v938_v26  ;;  %1066 = vst [vmem:[#allocation2 + $0xc] sm:$0xf] %v1065_v34  ;;  %v1652_v54 = vrot.slane %v1650_v44, 5  ;;  %v6685_v11 = vunpack.c.h.bf16 %v7766_v60  ;;  %v542_v18 = vmul.f32 %v6684_v0, %v7684_v22  ;;  %v1150_v59 = vld [vmem:[#allocation2 + $0x9c] sm:$0xf] }
  0x29   : > { %6862 = vmatprep.subr.bf16.mxu0 %v7423_v39  ;;  %7375 = vmatprep.subr.bf16.mxu1 %v7423_v39  ;;  %v1631_v39 = vshrl.u32 %v1579_v33, 16  ;;  %vm2191_vm13 = vcmask 1046532  }
  0x2a   : > { %v942_v45 = vsel %vm7740_vm10, %v934_v32, %v941_v35  ;;  %v1653_v61 = vsel %vm7760_vm11, %v7725_v49, %v1652_v54  ;;  %v602_v49 = vadd.f32 %v7697_v30, %v563_v62  ;;  %v543_v60 = vmul.f32 %v6685_v11, %v7684_v22  ;;  %vm8015_vm14 = vmor %vm2190_vm12, %vm2191_vm13 }
  0x2b   : > { %v1633_v50 = vrot.slane %v1631_v39, 4  ;;  %1146 = vst [vmem:[#allocation2 + $0x94] sm:$0xf] %v942_v45  ;;  %v1077_v39 = vld [vmem:[#allocation2 + $0x20] sm:$0x1]  ;;  %v7441_v45 = vld [vmem:[%s9623_s5 + $0x108] sm:$0xff]   ;;  %v6728_v11 = vunpack.c.l.bf16 %v7805_v52 }
  0x2c   : > { %6863 = vmatpush3.bf16.msra.mxu0 %v7424_v41  ;;  %7383 = vmatpush3.bf16.msra.mxu1 %v7424_v41  ;;  %v755_v41 = vsel %vm7740_vm10, %v747_v24, %v754_v28  ;;  %v634_v44 = vmax.f32 %v602_v49, 0.0 }
  0x2d   : > { %6960 = vmatprep.subr.bf16.mxu1 %v7426_v47  ;;  %7072 = vmatprep.subr.bf16.mxu0 %v7427_v56  ;;  %1067 = vst [vmem:[#allocation2 + $0x10] sm:$0xf] %v755_v41  ;;  %v1148_v47 = vsel %vm7668_vm3, %v943_v36, %v1147_v17  ;;  %v562_v56 = vmul.f32 %v6724_v19, %v7684_v22  ;;  %v1236_v14 = vld [vmem:[#allocation2 + $0x14] sm:$0x1]  ;;  %v760_v17 = vrot.slane %v758_v2, 7  ;;  %v768_v41 = vrot.slane %v766_v4, 7 }
  0x2e   : > { %1149 = vst [vmem:[#allocation2 + $0x98] sm:$0x1] %v1148_v47  ;;  %v1637_v57 = vor.u32 %v1636_v51, %v1633_v50  ;;  %v1237_v23 = vsel %vm7676_vm4, 0, %v1236_v14  ;;  %v1214_v27 = vld [vmem:[#allocation2 + $0x90] sm:$0x1] }
  0x2f   : > { %v601_v63 = vadd.f32 %v7697_v30, %v562_v56  ;;  %v1181_v6 = vld [vmem:[#allocation2 + $0xc] sm:$0x1]  ;;  %1238 = vst [vmem:[#allocation2 + $0x14] sm:$0x1] %v1237_v23  ;;  %v1215_v28 = vsel %vm7668_vm3, 0, %v1214_v27  ;;  %v763_v32 = vor.u32 %v761_v3, %v760_v17  ;;  %v764_v33 = vrot.slane %v760_v17, 4 }
  0x30   : > { %v1638_v1 = vrot.slane %v1637_v57, 4  ;;  %v1182_v13 = vsel %vm7668_vm3, 0, %v1181_v6  ;;  %1216 = vst [vmem:[#allocation2 + $0x90] sm:$0x1] %v1215_v28  ;;  %v771_v54 = vor.u32 %v769_v8, %v768_v41  ;;  %v773_v55 = vrot.slane %v768_v41, 4 }
  0x31   : > { %v633_v10 = vmax.f32 %v601_v63, 0.0  ;;  %1183 = vst [vmem:[#allocation2 + $0xc] sm:$0x1] %v1182_v13  ;;  %v1074_v43 = vsel %vm7715_vm6, %v763_v32, %v1073_v9  ;;  %v6631_v56 = vpack.c.bf16 %v634_v44, %v634_v44 }
  0x32   : > { %v1643_v12 = vsel %vm7760_vm11, %v1638_v1, %v7691_v25  ;;  %v7439_v25 = vld [vmem:[%s9623_s5 + $0x148] sm:$0xff]   ;;  %v1616_v31 = vld [vmem:[#allocation2 + $0x94] sm:$0xf]  ;;  %1075 = vst [vmem:[#allocation2 + $0x18] sm:$0xf] %v1074_v43  ;;  %v772_v0 = vsel %vm7740_vm10, %v764_v33, %v771_v54  ;;  %v1078_v1 = vsel %vm7668_vm3, %v773_v55, %v1077_v39 }
  0x33   : > { %v6319_v19 = vcombine.low %v1643_v12, %v1653_v61  ;;  %v6630_v34 = vpack.c.bf16 %v633_v10, %v633_v10  ;;  %v1928_v38 = vshll.u32 %v1616_v31, 16  ;;  %v1932_v40 = vshrl.u32 %v1616_v31, 16  ;;  %1076 = vst [vmem:[#allocation2 + $0x1c] sm:$0xf] %v772_v0  ;;  %1079 = vst [vmem:[#allocation2 + $0x20] sm:$0x1] %v1078_v1 }
  0x34   : > { %v1583_v15 = vld [vmem:[#allocation2 + $0x10] sm:$0xf]  ;;  %v581_v61 = vadd.f32 %v7697_v30, %v542_v18  ;;  %v953_v2 = vshrl.u32 %v6631_v56, 16  ;;  %v582_v10 = vadd.f32 %v7697_v30, %v543_v60  ;;  %v1154_v18 = vld [vmem:[#allocation2 + $0xa4] sm:$0x1]  ;;  %v564_v1 = vmul.f32 %v6728_v11, %v7684_v22 }
  0x35   : > { %v1664_v24 = vshll.u32 %v1583_v15, 16  ;;  %v1668_v26 = vshrl.u32 %v1583_v15, 16  ;;  %v1269_v29 = vld [vmem:[#allocation2 + $0x98] sm:$0x1]  ;;  %5026 = vmatprep.mubr.bf16.mxu0 %v6319_v19  ;;  %v7802_v47 = vrot.slane %v1928_v38, 5  ;;  %v945_v50 = vshrl.u32 %v6630_v34, 16 }
  0x36   : > { %v1270_v37 = vsel %vm7676_vm4, 0, %v1269_v29  ;;  %5027 = vmatmul.mubr.bf16.vlgmr.msra.gmra.mrb[0].mxu0 %v7425_v5  ;;  %v948_v51 = vshll.u32 %v6630_v34, 16  ;;  %v1934_v53 = vrot.slane %v1932_v40, 4  ;;  %v1584_v3 = vld [vmem:[#allocation2 + $0x14] sm:$0x1]  ;;  %v956_v34 = vshll.u32 %v6631_v56, 16 }
  0x37   : > { %v7792_v35 = vrot.slane %v1664_v24, 5  ;;  %v1670_v36 = vrot.slane %v1668_v26, 4  ;;  %1271 = vst [vmem:[#allocation2 + $0x98] sm:$0x1] %v1270_v37  ;;  %7073 = vmatpush3.bf16.msra.mxu0 %v7431_v7  ;;  %v7807_v58 = vrot.slane %v945_v50, 7  ;;  %v1674_v8 = vshll.u32 %v1584_v3, 16 }
  0x38   : > { %7074 = vmatprep.subr.bf16.mxu0 %v7439_v25  ;;  %v1582_v62 = vld [vmem:[#allocation2 + $0xc] sm:$0xf]  ;;  %v1935_v63 = vor.u32 %v1934_v53, %v7802_v47  ;;  %v1615_v9 = vld [vmem:[#allocation2 + $0x90] sm:$0xf]  ;;  %v955_v26 = vrot.slane %v953_v2, 7  ;;  %v613_v39 = vmax.f32 %v581_v61, 0.0  ;;  %v6729_v50 = vunpack.c.h.bf16 %v7805_v52 }
  0x39   : > { %v1671_v46 = vor.u32 %v1670_v36, %v7792_v35  ;;  %v1655_v4 = vshrl.u32 %v1582_v62, 16  ;;  %v1658_v5 = vshll.u32 %v1582_v62, 16  ;;  %v950_v6 = vor.u32 %v948_v51, %v7807_v58  ;;  %v1184_v24 = vld [vmem:[#allocation2 + $0x18] sm:$0x1]  ;;  %v7428_v54 = vld [vmem:[#allocation2 + $0xc] sm:$0xff]  }
  0x3a   : > { %v951_v7 = vrot.slane %v7807_v58, 4  ;;  %v1936_v49 = vrot.slane %v1935_v63, 4  ;;  %v1919_v15 = vshrl.u32 %v1615_v9, 16  ;;  %v1922_v17 = vshll.u32 %v1615_v9, 16  ;;  %v1239_v43 = vld [vmem:[#allocation2 + $0x20] sm:$0x1] }
  0x3b   : > { %v1672_v57 = vrot.slane %v1671_v46, 4  ;;  %7075 = vmatpush3.bf16.msra.mxu0 %v7441_v45  ;;  %v1657_v12 = vrot.slane %v1655_v4, 4  ;;  %v1660_v13 = vrot.slane %v1658_v5, 5  ;;  %v1676_v19 = vrot.slane %v1674_v8, 5  ;;  %v1586_v44 = vld [vmem:[#allocation2 + $0x1c] sm:$0xf] }
  0x3c   : > { %v1151_v27 = vsel %vm7715_vm6, %v950_v6, %v1150_v59  ;;  %v1921_v28 = vrot.slane %v1919_v15, 4  ;;  %v1924_v29 = vrot.slane %v1922_v17, 5  ;;  %v1185_v31 = vsel %vm7668_vm3, 0, %v1184_v24  ;;  %v7842_v61 = vld [vmem:[%s7661_s30 + $0x18] sm:$0xff]   ;;  %v7429_v62 = vld [vmem:[#allocation2 + $0x90] sm:$0xff]   ;;  %v7430_v4 = vld [vmem:[%s9623_s5 + $0x80] sm:$0xff]  }
  0x3d   : > { %v1661_v25 = vor.u32 %v1660_v13, %v1657_v12  ;;  %1152 = vst [vmem:[#allocation2 + $0x9c] sm:$0xf] %v1151_v27  ;;  %v1677_v32 = vsel %vm7760_vm11, %v1672_v57, %v1676_v19  ;;  %1186 = vst [vmem:[#allocation2 + $0x18] sm:$0x1] %v1185_v31  ;;  %v960_v36 = vrot.slane %v955_v26, 4  ;;  %v614_v40 = vmax.f32 %v582_v10, 0.0 }
  0x3e   : > { %v1617_v14 = vld [vmem:[#allocation2 + $0x98] sm:$0x1]  ;;  %v1925_v38 = vor.u32 %v1924_v29, %v1921_v28  ;;  %v958_v45 = vor.u32 %v956_v34, %v955_v26  ;;  %v1240_v55 = vsel %vm7676_vm4, 0, %v1239_v43  ;;  %v1688_v56 = vshll.u32 %v1586_v44, 16  ;;  %v7449_v57 = vld [vmem:[%s9623_s5 + $0x150] sm:$0xff]   ;;  %v7432_v8 = vld [vmem:[%s9623_s5 + $0xc8] sm:$0xff]  }
  0x3f   : > { %v1938_v23 = vshll.u32 %v1617_v14, 16  ;;  %v1662_v37 = vrot.slane %v1661_v25, 4  ;;  %v1155_v46 = vsel %vm7668_vm3, %v960_v36, %v1154_v18  ;;  %1241 = vst [vmem:[#allocation2 + $0x20] sm:$0x1] %v1240_v55  ;;  %v1692_v59 = vshrl.u32 %v1586_v44, 16  ;;  %7076 = vmatprep.subr.bf16.mxu0 %v7449_v57  ;;  %v7453_v2 = vld [vmem:[%s9623_s5 + $0x110] sm:$0xff]  }
  0x40   : > { %v1926_v53 = vrot.slane %v1925_v38, 4  ;;  %1156 = vst [vmem:[#allocation2 + $0xa4] sm:$0x1] %v1155_v46  ;;  %v959_v52 = vsel %vm7740_vm10, %v951_v7, %v958_v45  ;;  %v6610_v60 = vpack.c.bf16 %v613_v39, %v613_v39  ;;  %v7847_v63 = vrot.slane %v1688_v56, 5  ;;  %v1080_v10 = vld [vmem:[#allocation2 + $0x24] sm:$0xf]  ;;  %7077 = vmatpush3.bf16.msra.mxu0 %v7453_v2 }
  0x41   : > { %v1940_v33 = vrot.slane %v1938_v23, 5  ;;  %v1667_v51 = vsel %vm7760_vm11, %v1662_v37, %v7792_v35  ;;  %1153 = vst [vmem:[#allocation2 + $0xa0] sm:$0xf] %v959_v52  ;;  %v6611_v0 = vpack.c.bf16 %v614_v40, %v614_v40  ;;  %v1694_v5 = vrot.slane %v1692_v59, 4  ;;  %v7433_v19 = vld [vmem:[%s9623_s5 + $0x88] sm:$0xff]   ;;  %v7437_v45 = vld [vmem:[%s9623_s5 + $0x90] sm:$0xff]  }
  0x42   : > { %v6320_v58 = vcombine.low %v1667_v51, %v1677_v32  ;;  %v1931_v35 = vsel %vm7760_vm11, %v1926_v53, %v7802_v47  ;;  %v775_v6 = vshrl.u32 %v6610_v60, 16  ;;  %v778_v7 = vshll.u32 %v6610_v60, 16  ;;  %v7434_v32 = vld [vmem:[%s9623_s5 + $0xd0] sm:$0xff]   ;;  %v1084_v34 = vld [vmem:[#allocation2 + $0x2c] sm:$0x1]  ;;  %v7460_v60 = vld [vmem:[%s9623_s5 + $0x158] sm:$0xff]  }
  0x43   : > { %v1941_v41 = vsel %vm7760_vm11, %v1936_v49, %v1940_v33  ;;  %v565_v11 = vmul.f32 %v6729_v50, %v7684_v22  ;;  %v603_v12 = vadd.f32 %v7697_v30, %v564_v1  ;;  %v6688_v13 = vunpack.c.l.bf16 %v7842_v61  ;;  %7078 = vmatprep.subr.bf16.mxu0 %v7460_v60  ;;  %v7447_v60 = vld [vmem:[%s9623_s5 + $0xa8] sm:$0xff]  }
  0x44   : > { %5034 = vmatprep.mubr.bf16.mxu0 %v6320_v58  ;;  %v6331_v3 = vcombine.low %v1931_v35, %v1941_v41  ;;  %v1217_v47 = vld [vmem:[#allocation2 + $0x9c] sm:$0x1]  ;;  %v1585_v9 = vld [vmem:[#allocation2 + $0x18] sm:$0xf]  ;;  %v1695_v17 = vor.u32 %v1694_v5, %v7847_v63  ;;  %v777_v18 = vrot.slane %v775_v6, 7  ;;  %v783_v23 = vshrl.u32 %v6611_v0, 16 }
  0x45   : > { %5035 = vmatmul.mubr.bf16.gmra.mrb[4].mxu0 %v7428_v54  ;;  %v1218_v49 = vsel %vm7668_vm3, 0, %v1217_v47  ;;  %v1679_v14 = vshrl.u32 %v1585_v9, 16  ;;  %v1682_v15 = vshll.u32 %v1585_v9, 16  ;;  %v786_v24 = vshll.u32 %v6611_v0, 16  ;;  %v7438_v54 = vld [vmem:[%s9623_s5 + $0xd8] sm:$0xff]   ;;  %v7900_v9 = vld [vmem:[%s7661_s30 + $0x70] sm:$0xff]  }
  0x46   : > { %5122 = vmatprep.mubr.bf16.mxu1 %v6331_v3  ;;  %1219 = vst [vmem:[#allocation2 + $0x9c] sm:$0x1] %v1218_v49  ;;  %v604_v26 = vadd.f32 %v7697_v30, %v565_v11  ;;  %v635_v27 = vmax.f32 %v603_v12, 0.0  ;;  %v1696_v29 = vrot.slane %v1695_v17, 4  ;;  %v780_v33 = vor.u32 %v778_v7, %v777_v18  ;;  %v1587_v36 = vld [vmem:[#allocation2 + $0x20] sm:$0x1] }
  0x47   : > { %5123 = vmatmul.mubr.bf16.vlgmr.msra.gmra.mrb[0].mxu1 %v7429_v62  ;;  %v1681_v25 = vrot.slane %v1679_v14, 4  ;;  %v1684_v28 = vrot.slane %v1682_v15, 5  ;;  %v1272_v31 = vld [vmem:[#allocation2 + $0xa4] sm:$0x1]  ;;  %v781_v38 = vrot.slane %v777_v18, 4  ;;  %v785_v39 = vrot.slane %v783_v23, 7 }
  0x48   : > { %6961 = vmatpush3.bf16.msra.mxu1 %v7430_v4  ;;  %v1273_v37 = vsel %vm7676_vm4, 0, %v1272_v31  ;;  %v636_v40 = vmax.f32 %v604_v26, 0.0  ;;  %v1698_v43 = vshll.u32 %v1587_v36, 16  ;;  %v1619_v44 = vld [vmem:[#allocation2 + $0xa0] sm:$0xf]  ;;  %v1081_v46 = vsel %vm7715_vm6, %v780_v33, %v1080_v10  ;;  %v7435_v6 = vld [vmem:[#allocation2 + $0x18] sm:$0xff]  }
  0x49   : > { %6962 = vmatprep.subr.bf16.mxu1 %v7432_v8  ;;  %v1685_v41 = vor.u32 %v1684_v28, %v1681_v25  ;;  %1274 = vst [vmem:[#allocation2 + $0xa4] sm:$0x1] %v1273_v37  ;;  %v6632_v50 = vpack.c.bf16 %v635_v27, %v635_v27  ;;  %v1952_v51 = vshll.u32 %v1619_v44, 16  ;;  %v1956_v53 = vshrl.u32 %v1619_v44, 16  ;;  %1082 = vst [vmem:[#allocation2 + $0x24] sm:$0xf] %v1081_v46 }
  0x4a   : > { %v788_v55 = vor.u32 %v786_v24, %v785_v39  ;;  %v790_v56 = vrot.slane %v785_v39, 4  ;;  %v1700_v58 = vrot.slane %v1698_v43, 5  ;;  %v6633_v59 = vpack.c.bf16 %v636_v40, %v636_v40  ;;  %v7440_v7 = vld [vmem:[%s9623_s5 + $0x98] sm:$0xff]   ;;  %v1157_v8 = vld [vmem:[#allocation2 + $0xa8] sm:$0xf]  ;;  %v7442_v14 = vld [vmem:[%s9623_s5 + $0xe0] sm:$0xff]  }
  0x4b   : > { %v1686_v57 = vrot.slane %v1685_v41, 4  ;;  %v962_v52 = vshrl.u32 %v6632_v50, 16  ;;  %v7885_v62 = vrot.slane %v1952_v51, 5  ;;  %v1958_v0 = vrot.slane %v1956_v53, 4  ;;  %v1161_v37 = vld [vmem:[#allocation2 + $0xb0] sm:$0x1] }
  0x4c   : > { %6963 = vmatpush3.bf16.msra.mxu1 %v7433_v19  ;;  %v789_v1 = vsel %vm7740_vm10, %v781_v38, %v788_v55  ;;  %v1085_v2 = vsel %vm7668_vm3, %v790_v56, %v1084_v34  ;;  %v1701_v4 = vsel %vm7760_vm11, %v1696_v29, %v1700_v58  ;;  %v965_v12 = vshll.u32 %v6632_v50, 16  ;;  %v7445_v38 = vld [vmem:[%s9623_s5 + $0xa0] sm:$0xff]  }
  0x4d   : > { %v1618_v35 = vld [vmem:[#allocation2 + $0x9c] sm:$0xf]  ;;  %6964 = vmatprep.subr.bf16.mxu1 %v7434_v32  ;;  %v1691_v3 = vsel %vm7760_vm11, %v1686_v57, %v7847_v63  ;;  %1083 = vst [vmem:[#allocation2 + $0x28] sm:$0xf] %v789_v1  ;;  %1086 = vst [vmem:[#allocation2 + $0x2c] sm:$0x1] %v1085_v2  ;;  %v1959_v10 = vor.u32 %v1958_v0, %v7885_v62  ;;  %v6689_v25 = vunpack.c.h.bf16 %v7842_v61  ;;  %v6732_v40 = vunpack.c.l.bf16 %v7900_v9 }
  0x4e   : > { %v1943_v5 = vshrl.u32 %v1618_v35, 16  ;;  %v1946_v47 = vshll.u32 %v1618_v35, 16  ;;  %v7461_v63 = vld [vmem:[%s9623_s5 + $0x118] sm:$0xff]   ;;  %v6321_v49 = vcombine.low %v1691_v3, %v1701_v4  ;;  %v964_v11 = vrot.slane %v962_v52, 7  ;;  %v6821_v46 = vld [vmem:[%s7661_s30 + $0x20] sm:$0xff]   ;;  %v7945_v2 = vld [vmem:[%s7661_s30 + $0x28] sm:$0xff]  }
  0x4f   : > { %v970_v18 = vshrl.u32 %v6633_v59, 16  ;;  %v973_v19 = vshll.u32 %v6633_v59, 16  ;;  %7079 = vmatpush3.bf16.msra.mxu0 %v7461_v63  ;;  %v1960_v24 = vrot.slane %v1959_v10, 4  ;;  %v544_v33 = vmul.f32 %v6688_v13, %v7684_v22  ;;  %v7436_v61 = vld [vmem:[#allocation2 + $0x9c] sm:$0xff]   ;;  %v7448_v63 = vld [vmem:[%s9623_s5 + $0xf0] sm:$0xff]  }
  0x50   : > { %v1945_v15 = vrot.slane %v1943_v5, 4  ;;  %v1948_v17 = vrot.slane %v1946_v47, 5  ;;  %6965 = vmatpush3.bf16.msra.mxu1 %v7437_v45  ;;  %5042 = vmatprep.mubr.bf16.mxu0 %v6321_v49  ;;  %v1620_v23 = vld [vmem:[#allocation2 + $0xa4] sm:$0x1]  ;;  %v967_v26 = vor.u32 %v965_v12, %v964_v11  ;;  %v968_v27 = vrot.slane %v964_v11, 4  ;;  %v7446_v45 = vld [vmem:[%s9623_s5 + $0xe8] sm:$0xff]  }
  0x51   : > { %6966 = vmatprep.subr.bf16.mxu1 %v7438_v54  ;;  %v1962_v29 = vshll.u32 %v1620_v23, 16  ;;  %5043 = vmatmul.mubr.bf16.gmra.mrb[8].mxu0 %v7435_v6  ;;  %v1187_v31 = vld [vmem:[#allocation2 + $0x24] sm:$0x1]  ;;  %v972_v32 = vrot.slane %v970_v18, 7  ;;  %v545_v39 = vmul.f32 %v6689_v25, %v7684_v22  ;;  %v583_v53 = vadd.f32 %v7697_v30, %v544_v33  ;;  %v7950_v6 = vld [vmem:[#allocation2] sm:$0xe] }
  0x52   : > { %v1949_v28 = vor.u32 %v1948_v17, %v1945_v15  ;;  %v1188_v34 = vsel %vm7668_vm3, 0, %v1187_v31  ;;  %v1158_v36 = vsel %vm7715_vm6, %v967_v26, %v1157_v8  ;;  %v6733_v55 = vunpack.c.h.bf16 %v7900_v9  ;;  %v7468_v17 = vld [vmem:[%s9623_s5 + $0x120] sm:$0xff]   ;;  %v7454_v33 = vld [vmem:[%s9623_s5 + $0xf8] sm:$0xff]  }
  0x53   : > { %v1964_v43 = vrot.slane %v1962_v29, 5  ;;  %1189 = vst [vmem:[#allocation2 + $0x24] sm:$0x1] %v1188_v34  ;;  %v975_v13 = vor.u32 %v973_v19, %v972_v32  ;;  %v977_v44 = vrot.slane %v972_v32, 4  ;;  %1159 = vst [vmem:[#allocation2 + $0xa8] sm:$0xf] %v1158_v36  ;;  %v584_v54 = vadd.f32 %v7697_v30, %v545_v39 }
  0x54   : > { %v1950_v41 = vrot.slane %v1949_v28, 4  ;;  %6967 = vmatpush3.bf16.msra.mxu1 %v7440_v7  ;;  %v1242_v50 = vld [vmem:[#allocation2 + $0x2c] sm:$0x1]  ;;  %v1589_v51 = vld [vmem:[#allocation2 + $0x28] sm:$0xf]  ;;  %v566_v56 = vmul.f32 %v6732_v40, %v7684_v22  ;;  %v615_v4 = vmax.f32 %v583_v53, 0.0  ;;  %v567_v47 = vmul.f32 %v6733_v55, %v7684_v22 }
  0x55   : > { %6968 = vmatprep.subr.bf16.mxu1 %v7442_v14  ;;  %v1965_v58 = vsel %vm7760_vm11, %v1960_v24, %v1964_v43  ;;  %v1243_v59 = vsel %vm7676_vm4, 0, %v1242_v50  ;;  %v1712_v52 = vshll.u32 %v1589_v51, 16  ;;  %v1716_v0 = vshrl.u32 %v1589_v51, 16  ;;  %v7465_v7 = vld [vmem:[%s9623_s5 + $0x160] sm:$0xff]   ;;  %v7452_v32 = vld [vmem:[%s9623_s5 + $0xb0] sm:$0xff]  }
  0x56   : > { %v1955_v57 = vsel %vm7760_vm11, %v1950_v41, %v7885_v62  ;;  %1244 = vst [vmem:[#allocation2 + $0x2c] sm:$0x1] %v1243_v59  ;;  %v976_v1 = vsel %vm7740_vm10, %v968_v27, %v975_v13  ;;  %v1162_v62 = vsel %vm7668_vm3, %v977_v44, %v1161_v37  ;;  %v616_v5 = vmax.f32 %v584_v54, 0.0  ;;  %7080 = vmatprep.subr.bf16.mxu0 %v7465_v7  ;;  %v1087_v43 = vld [vmem:[#allocation2 + $0x30] sm:$0xf]  ;;  %v7455_v13 = vld [vmem:[%s9623_s5 + $0xb8] sm:$0xff]  }
  0x57   : > { %v6332_v35 = vcombine.low %v1955_v57, %v1965_v58  ;;  %v7947_v3 = vrot.slane %v1712_v52, 5  ;;  %1160 = vst [vmem:[#allocation2 + $0xac] sm:$0xf] %v976_v1  ;;  %1163 = vst [vmem:[#allocation2 + $0xb0] sm:$0x1] %v1162_v62  ;;  %v1718_v8 = vrot.slane %v1716_v0, 4  ;;  %v7956_v9 = vadd.f32 %v7697_v30, %v566_v56  ;;  %7081 = vmatpush3.bf16.msra.mxu0 %v7468_v17 }
  0x58   : > { %6969 = vmatpush3.bf16.msra.mxu1 %v7445_v38  ;;  %v6692_v49 = vunpack.c.l.bf16 %v6821_v46  ;;  %v6693_v10 = vunpack.c.h.bf16 %v6821_v46  ;;  %v6612_v11 = vpack.c.bf16 %v615_v4, %v615_v4  ;;  %v6613_v12 = vpack.c.bf16 %v616_v5, %v616_v5  ;;  %v1091_v51 = vld [vmem:[#allocation2 + $0x38] sm:$0x1]  ;;  %v7457_v59 = vld [vmem:[%s9623_s5 + $0x1c0] sm:$0xff]  }
  0x59   : > { %5130 = vmatprep.mubr.bf16.mxu1 %v6332_v35  ;;  %6970 = vmatprep.subr.bf16.mxu1 %v7446_v45  ;;  %v7962_v14 = vadd.f32 %v7697_v30, %v567_v47  ;;  %v6335_v15 = vrot.slane %v7950_v6, 9  ;;  %v1719_v19 = vor.u32 %v1718_v8, %v7947_v3  ;;  %v6696_v27 = vunpack.c.l.bf16 %v7945_v2 }
  0x5a   : > { %5131 = vmatmul.mubr.bf16.gmra.mrb[4].mxu1 %v7436_v61  ;;  %v1588_v18 = vld [vmem:[#allocation2 + $0x24] sm:$0xf]  ;;  %v1220_v23 = vld [vmem:[#allocation2 + $0xa8] sm:$0x1]  ;;  %v546_v24 = vmul.f32 %v6692_v49, %v7684_v22  ;;  %v547_v26 = vmul.f32 %v6693_v10, %v7684_v22  ;;  %v792_v31 = vshrl.u32 %v6612_v11, 16  ;;  %v795_v22 = vshll.u32 %v6612_v11, 16 }
  0x5b   : > { %v1703_v25 = vshrl.u32 %v1588_v18, 16  ;;  %v1706_v28 = vshll.u32 %v1588_v18, 16  ;;  %v1221_v29 = vsel %vm7668_vm3, 0, %v1220_v23  ;;  %v1720_v34 = vrot.slane %v1719_v19, 4  ;;  %v7443_v11 = vld [vmem:[#allocation2 + $0x24] sm:$0xff]  }
  0x5c   : > { %6971 = vmatpush3.bf16.msra.mxu1 %v7447_v60  ;;  %1222 = vst [vmem:[#allocation2 + $0xa8] sm:$0x1] %v1221_v29  ;;  %v800_v36 = vshrl.u32 %v6613_v12, 16  ;;  %v803_v37 = vshll.u32 %v6613_v12, 16  ;;  %v794_v41 = vrot.slane %v792_v31, 7  ;;  %v637_v61 = vmax.f32 %v7956_v9, 0.0 }
  0x5d   : > { %6972 = vmatprep.subr.bf16.mxu1 %v7448_v63  ;;  %v1590_v38 = vld [vmem:[#allocation2 + $0x2c] sm:$0x1]  ;;  %v1705_v39 = vrot.slane %v1703_v25, 4  ;;  %v1708_v40 = vrot.slane %v1706_v28, 5  ;;  %v585_v53 = vadd.f32 %v7697_v30, %v546_v24  ;;  %v7986_v54 = vadd.f32 %v7697_v30, %v547_v26  ;;  %v8002_v9 = vld [vmem:[#allocation2 + $0x4] sm:$0xf] }
  0x5e   : > { %v1722_v44 = vshll.u32 %v1590_v38, 16  ;;  %v1275_v45 = vld [vmem:[#allocation2 + $0xb0] sm:$0x1]  ;;  %v1622_v46 = vld [vmem:[#allocation2 + $0xac] sm:$0xf]  ;;  %v802_v50 = vrot.slane %v800_v36, 7  ;;  %v797_v60 = vor.u32 %v795_v22, %v794_v41  ;;  %v6634_v17 = vpack.c.bf16 %v637_v61, %v637_v61 }
  0x5f   : > { %v1709_v55 = vor.u32 %v1708_v40, %v1705_v39  ;;  %v1276_v56 = vsel %vm7676_vm4, 0, %v1275_v45  ;;  %v1976_v57 = vshll.u32 %v1622_v46, 16  ;;  %v1980_v58 = vshrl.u32 %v1622_v46, 16  ;;  %v8010_v28 = vld [vmem:[#allocation2 + $0x8] sm:$0x1] }
  0x60   : > { %6973 = vmatpush3.bf16.msra.mxu1 %v7452_v32  ;;  %v1724_v52 = vrot.slane %v1722_v44, 5  ;;  %1277 = vst [vmem:[#allocation2 + $0xb0] sm:$0x1] %v1276_v56  ;;  %v798_v35 = vrot.slane %v794_v41, 4  ;;  %v805_v0 = vor.u32 %v803_v37, %v802_v50  ;;  %v807_v4 = vrot.slane %v802_v50, 4  ;;  %v7472_v40 = vld [vmem:[%s9623_s5 + $0x168] sm:$0xff]  }
  0x61   : > { %6974 = vmatprep.subr.bf16.mxu1 %v7454_v33  ;;  %v1710_v1 = vrot.slane %v1709_v55, 4  ;;  %v7993_v30 = vrot.slane %v1976_v57, 5  ;;  %v1982_v62 = vrot.slane %v1980_v58, 4  ;;  %v1088_v7 = vsel %vm7715_vm6, %v797_v60, %v1087_v43  ;;  %v7473_v44 = vld [vmem:[%s9623_s5 + $0x128] sm:$0xff]   ;;  %v1164_v50 = vld [vmem:[#allocation2 + $0xb4] sm:$0xf]  ;;  %7082 = vmatprep.subr.bf16.mxu0 %v7472_v40 }
  0x62   : > { %v1725_v5 = vsel %vm7760_vm11, %v1720_v34, %v1724_v52  ;;  %v806_v47 = vsel %vm7740_vm10, %v798_v35, %v805_v0  ;;  %v638_v8 = vmax.f32 %v7962_v14, 0.0  ;;  %1089 = vst [vmem:[#allocation2 + $0x30] sm:$0xf] %v1088_v7  ;;  %v1092_v12 = vsel %vm7668_vm3, %v807_v4, %v1091_v51  ;;  %v1168_v51 = vld [vmem:[#allocation2 + $0xbc] sm:$0x1]  ;;  %7083 = vmatpush3.bf16.msra.mxu0 %v7473_v44 }
  0x63   : > { %v1715_v63 = vsel %vm7760_vm11, %v1710_v1, %v7947_v3  ;;  %v1621_v49 = vld [vmem:[#allocation2 + $0xa8] sm:$0xf]  ;;  %v1983_v10 = vor.u32 %v1982_v62, %v7993_v30  ;;  %1090 = vst [vmem:[#allocation2 + $0x34] sm:$0xf] %v806_v47  ;;  %1093 = vst [vmem:[#allocation2 + $0x38] sm:$0x1] %v1092_v12 }
  0x64   : > { %6975 = vmatpush3.bf16.msra.mxu1 %v7455_v13  ;;  %v6322_v18 = vcombine.low %v1715_v63, %v1725_v5  ;;  %v1967_v19 = vshrl.u32 %v1621_v49, 16  ;;  %v1970_v14 = vshll.u32 %v1621_v49, 16  ;;  %v6635_v23 = vpack.c.bf16 %v638_v8, %v638_v8  ;;  %v7444_v6 = vld [vmem:[#allocation2 + $0xa8] sm:$0xff]   ;;  %v1094_v49 = vld [vmem:[#allocation2 + $0x3c] sm:$0xf] }
  0x65   : > { %7184 = vmatprep.subr.bf16.mxu1 %v7457_v59  ;;  %v1984_v24 = vrot.slane %v1983_v10, 4  ;;  %v979_v26 = vshrl.u32 %v6634_v17, 16  ;;  %v982_v3 = vshll.u32 %v6634_v17, 16  ;;  %v617_v25 = vmax.f32 %v585_v53, 0.0  ;;  %v8044_v7 = vld [vmem:[#allocation2 + $0xc] sm:$0xe] }
  0x66   : > { %5050 = vmatprep.mubr.bf16.mxu0 %v6322_v18  ;;  %v1969_v29 = vrot.slane %v1967_v19, 4  ;;  %v1972_v31 = vrot.slane %v1970_v14, 5  ;;  %v987_v32 = vshrl.u32 %v6635_v23, 16  ;;  %v990_v33 = vshll.u32 %v6635_v23, 16 }
  0x67   : > { %v1623_v34 = vld [vmem:[#allocation2 + $0xb0] sm:$0x1]  ;;  %5051 = vmatmul.mubr.bf16.gmra.mrb[12].mxu0 %v7443_v11  ;;  %v981_v22 = vrot.slane %v979_v26, 7  ;;  %v618_v36 = vmax.f32 %v7986_v54, 0.0  ;;  %v6614_v37 = vpack.c.bf16 %v617_v25, %v617_v25  ;;  %v2195_v39 = vrot.slane %v8002_v9, 5 }
  0x68   : > { %v1973_v41 = vor.u32 %v1972_v31, %v1969_v29  ;;  %v1986_v43 = vshll.u32 %v1623_v34, 16  ;;  %v989_v61 = vrot.slane %v987_v32, 7  ;;  %v2198_v13 = vrot.slane %v8010_v28, 5  ;;  %v8057_v25 = vld [vmem:[%s9621_s3] ss:$0 sm:$0xff]  ;;  %v8063_v31 = vld [vmem:[%s7661_s30 + $0x30] sm:$0xff]  }
  0x69   : > { %v984_v45 = vor.u32 %v982_v3, %v981_v22  ;;  %v985_v46 = vrot.slane %v981_v22, 4  ;;  %v6615_v53 = vpack.c.bf16 %v618_v36, %v618_v36  ;;  %v809_v54 = vshrl.u32 %v6614_v37, 16  ;;  %v1190_v57 = vld [vmem:[#allocation2 + $0x30] sm:$0x1] }
  0x6a   : > { %v1974_v55 = vrot.slane %v1973_v41, 4  ;;  %v1988_v56 = vrot.slane %v1986_v43, 5  ;;  %v1592_v58 = vld [vmem:[#allocation2 + $0x34] sm:$0xf]  ;;  %v992_v59 = vor.u32 %v990_v33, %v989_v61  ;;  %v8031_v52 = vsel %vm8015_vm14, %v6335_v15, %v2195_v39  ;;  %v1245_v35 = vld [vmem:[#allocation2 + $0x38] sm:$0x1] }
  0x6b   : > { %v1191_v60 = vsel %vm7668_vm3, 0, %v1190_v57  ;;  %v1736_v0 = vshll.u32 %v1592_v58, 16  ;;  %v1740_v1 = vshrl.u32 %v1592_v58, 16  ;;  %v994_v62 = vrot.slane %v989_v61, 4  ;;  %v2098_v29 = vld [vmem:[#allocation2 + $0x10] sm:$0xf] }
  0x6c   : > { %v1979_v4 = vsel %vm7760_vm11, %v1974_v55, %v7993_v30  ;;  %v1989_v5 = vsel %vm7760_vm11, %v1984_v24, %v1988_v56  ;;  %1192 = vst [vmem:[#allocation2 + $0x30] sm:$0x1] %v1191_v60  ;;  %v1246_v15 = vsel %vm7676_vm4, 0, %v1245_v35  ;;  %v993_v47 = vsel %vm7740_vm10, %v985_v46, %v992_v59  ;;  %v1098_v33 = vld [vmem:[#allocation2 + $0x44] sm:$0x1] }
  0x6d   : > { %v6333_v8 = vcombine.low %v1979_v4, %v1989_v5  ;;  %1247 = vst [vmem:[#allocation2 + $0x38] sm:$0x1] %v1246_v15  ;;  %v8046_v9 = vrot.slane %v1736_v0, 5  ;;  %v1742_v63 = vrot.slane %v1740_v1, 4  ;;  %v1165_v30 = vsel %vm7715_vm6, %v984_v45, %v1164_v50  ;;  %1167 = vst [vmem:[#allocation2 + $0xb8] sm:$0xf] %v993_v47 }
  0x6e   : > { %1166 = vst [vmem:[#allocation2 + $0xb4] sm:$0xf] %v1165_v30  ;;  %v1169_v10 = vsel %vm7668_vm3, %v994_v62, %v1168_v51  ;;  %v811_v11 = vrot.slane %v809_v54, 7  ;;  %v812_v12 = vshll.u32 %v6614_v37, 16  ;;  %v817_v17 = vshrl.u32 %v6615_v53, 16 }
  0x6f   : > { %5138 = vmatprep.mubr.bf16.mxu1 %v6333_v8  ;;  %v1743_v18 = vor.u32 %v1742_v63, %v8046_v9  ;;  %1170 = vst [vmem:[#allocation2 + $0xbc] sm:$0x1] %v1169_v10  ;;  %v820_v19 = vshll.u32 %v6615_v53, 16  ;;  %v2197_v14 = vrot.slane %v2195_v39, 4  ;;  %v6697_v23 = vunpack.c.h.bf16 %v7945_v2  ;;  %v8080_v41 = vld [vmem:[%s9622_s4] ss:$0 sm:$0xff] }
  0x70   : > { %5139 = vmatmul.mubr.bf16.gmra.mrb[8].mxu1 %v7444_v6  ;;  %v814_v24 = vor.u32 %v812_v12, %v811_v11  ;;  %v815_v26 = vrot.slane %v811_v11, 4  ;;  %v819_v3 = vrot.slane %v817_v17, 7  ;;  %v548_v28 = vmul.f32 %v8057_v25, %v6696_v27  ;;  %v2099_v55 = vld [vmem:[#allocation2 + $0x14] sm:$0x1] }
  0x71   : > { %v8065_v32 = vrot.slane %v1743_v18, 4  ;;  %v8069_v34 = vsel %vm8015_vm14, %v2197_v14, %v2198_v13  ;;  %v549_v22 = vmul.f32 %v8057_v25, %v6697_v23  ;;  %v6336_v36 = vrot.slane %v8044_v7, 9 }
  0x72   : > { %v822_v37 = vor.u32 %v820_v19, %v819_v3  ;;  %v824_v39 = vrot.slane %v819_v3, 4  ;;  %v1095_v2 = vsel %vm7715_vm6, %v814_v24, %v1094_v49  ;;  %v6351_v27 = vcombine.low %v8031_v52, %v8069_v34 }
  0x73   : > { %v1591_v40 = vld [vmem:[#allocation2 + $0x30] sm:$0xf]  ;;  %1096 = vst [vmem:[#allocation2 + $0x3c] sm:$0xf] %v1095_v2  ;;  %v587_v43 = vadd.f32 %v8080_v41, %v548_v28  ;;  %v588_v61 = vadd.f32 %v8080_v41, %v549_v22  ;;  %v2202_v13 = vrot.slane %v2098_v29, 5  ;;  %v6700_v44 = vunpack.c.l.bf16 %v8063_v31 }
  0x74   : > { %v1593_v45 = vld [vmem:[#allocation2 + $0x38] sm:$0x1]  ;;  %v1727_v46 = vshrl.u32 %v1591_v40, 16  ;;  %v1730_v50 = vshll.u32 %v1591_v40, 16  ;;  %v823_v53 = vsel %vm7740_vm10, %v815_v26, %v822_v37  ;;  %v1099_v54 = vsel %vm7668_vm3, %v824_v39, %v1098_v33  ;;  %v7450_v26 = vld [vmem:[#allocation2 + $0x30] sm:$0xff]  }
  0x75   : > { %v1625_v51 = vld [vmem:[#allocation2 + $0xb8] sm:$0xf]  ;;  %v1746_v56 = vshll.u32 %v1593_v45, 16  ;;  %v1223_v57 = vld [vmem:[#allocation2 + $0xb4] sm:$0x1]  ;;  %v619_v60 = vmax.f32 %v587_v43, 0.0  ;;  %v8097_v30 = vsel %vm8015_vm14, %v6336_v36, %v2202_v13  ;;  %v6701_v39 = vunpack.c.h.bf16 %v8063_v31 }
  0x76   : > { %v2000_v58 = vshll.u32 %v1625_v51, 16  ;;  %v2004_v59 = vshrl.u32 %v1625_v51, 16  ;;  %1097 = vst [vmem:[#allocation2 + $0x40] sm:$0xf] %v823_v53  ;;  %1100 = vst [vmem:[#allocation2 + $0x44] sm:$0x1] %v1099_v54  ;;  %v550_v2 = vmul.f32 %v8057_v25, %v6700_v44 }
  0x77   : > { %v1729_v35 = vrot.slane %v1727_v46, 4  ;;  %v1732_v0 = vrot.slane %v1730_v50, 5  ;;  %v1224_v1 = vsel %vm7668_vm3, 0, %v1223_v57  ;;  %v1278_v62 = vld [vmem:[#allocation2 + $0xbc] sm:$0x1]  ;;  %v620_v4 = vmax.f32 %v588_v61, 0.0 }
  0x78   : > { %v1748_v5 = vrot.slane %v1746_v56, 5  ;;  %1225 = vst [vmem:[#allocation2 + $0xb4] sm:$0x1] %v1224_v1  ;;  %v1279_v6 = vsel %vm7676_vm4, 0, %v1278_v62  ;;  %v8093_v15 = vrot.slane %v2000_v58, 5  ;;  %v2006_v47 = vrot.slane %v2004_v59, 4 }
  0x79   : > { %v1733_v7 = vor.u32 %v1732_v0, %v1729_v35  ;;  %1280 = vst [vmem:[#allocation2 + $0xbc] sm:$0x1] %v1279_v6  ;;  %v6616_v8 = vpack.c.bf16 %v619_v60, %v619_v60  ;;  %v6617_v63 = vpack.c.bf16 %v620_v4, %v620_v4  ;;  %v2204_v11 = vrot.slane %v2202_v13, 4  ;;  %v1101_v45 = vld [vmem:[#allocation2 + $0x48] sm:$0xf]  ;;  %v7479_v0 = vld [vmem:[%s9623_s5 + $0x170] sm:$0xff]  }
  0x7a   : > { %v1749_v49 = vsel %vm7760_vm11, %v8065_v32, %v1748_v5  ;;  %v2007_v10 = vor.u32 %v2006_v47, %v8093_v15  ;;  %v2205_v12 = vrot.slane %v2099_v55, 5  ;;  %v1193_v18 = vld [vmem:[#allocation2 + $0x3c] sm:$0x1]  ;;  %v551_v50 = vmul.f32 %v8057_v25, %v6701_v39  ;;  %v1105_v35 = vld [vmem:[#allocation2 + $0x50] sm:$0x1]  ;;  %7084 = vmatprep.subr.bf16.mxu0 %v7479_v0 }
  0x7b   : > { %v1734_v17 = vrot.slane %v1733_v7, 4  ;;  %v826_v19 = vshrl.u32 %v6616_v8, 16  ;;  %v829_v14 = vshll.u32 %v6616_v8, 16  ;;  %v834_v23 = vshrl.u32 %v6617_v63, 16  ;;  %v8112_v32 = vld [vmem:[%s7661_s30 + $0x38] sm:$0xff]  }
  0x7c   : > { %v8103_v24 = vrot.slane %v2007_v10, 4  ;;  %v1194_v3 = vsel %vm7668_vm3, 0, %v1193_v18  ;;  %v837_v28 = vshll.u32 %v6617_v63, 16  ;;  %v8109_v29 = vsel %vm8015_vm14, %v2204_v11, %v2205_v12  ;;  %v2100_v6 = vld [vmem:[#allocation2 + $0x18] sm:$0xe] }
  0x7d   : > { %v1739_v33 = vsel %vm7760_vm11, %v1734_v17, %v8046_v9  ;;  %1195 = vst [vmem:[#allocation2 + $0x3c] sm:$0x1] %v1194_v3  ;;  %v1248_v22 = vld [vmem:[#allocation2 + $0x44] sm:$0x1]  ;;  %v1595_v36 = vld [vmem:[#allocation2 + $0x40] sm:$0xf]  ;;  %v6352_v37 = vcombine.low %v8097_v30, %v8109_v29  ;;  %v589_v51 = vadd.f32 %v8080_v41, %v550_v2  ;;  %v6704_v53 = vunpack.c.l.bf16 %v8112_v32 }
  0x7e   : > { %v6323_v40 = vcombine.low %v1739_v33, %v1749_v49  ;;  %v1249_v43 = vsel %vm7676_vm4, 0, %v1248_v22  ;;  %v1760_v61 = vshll.u32 %v1595_v36, 16  ;;  %v1764_v13 = vshrl.u32 %v1595_v36, 16  ;;  %v2102_v3 = vld [vmem:[#allocation2 + $0x20] sm:$0x1]  ;;  %v7485_v29 = vld [vmem:[%s9623_s5 + $0x198] sm:$0xff]  }
  0x7f   : > { %v1624_v46 = vld [vmem:[#allocation2 + $0xb4] sm:$0xf]  ;;  %1250 = vst [vmem:[#allocation2 + $0x44] sm:$0x1] %v1249_v43  ;;  %v828_v9 = vrot.slane %v826_v19, 7  ;;  %v836_v60 = vrot.slane %v834_v23, 7  ;;  %v590_v5 = vadd.f32 %v8080_v41, %v551_v50  ;;  %v6705_v12 = vunpack.c.h.bf16 %v8112_v32 }
  0x80   : > { %5058 = vmatprep.mubr.bf16.mxu0 %v6323_v40  ;;  %v1626_v31 = vld [vmem:[#allocation2 + $0xbc] sm:$0x1]  ;;  %v1991_v54 = vshrl.u32 %v1624_v46, 16  ;;  %v1994_v44 = vshll.u32 %v1624_v46, 16  ;;  %v8126_v55 = vrot.slane %v1760_v61, 5  ;;  %v1766_v56 = vrot.slane %v1764_v13, 4 }
  0x81   : > { %v2010_v57 = vshll.u32 %v1626_v31, 16  ;;  %5059 = vmatmul.mubr.bf16.gmra.mrb[16].mxu0 %v7450_v26  ;;  %v831_v58 = vor.u32 %v829_v14, %v828_v9  ;;  %v832_v59 = vrot.slane %v828_v9, 4  ;;  %v839_v7 = vor.u32 %v837_v28, %v836_v60  ;;  %v2101_v26 = vld [vmem:[#allocation2 + $0x1c] sm:$0xf]  ;;  %v7451_v33 = vld [vmem:[#allocation2 + $0xb4] sm:$0xff]   ;;  %v7456_v31 = vld [vmem:[#allocation2 + $0xc] sm:$0xff]  }
  0x82   : > { %v1993_v1 = vrot.slane %v1991_v54, 4  ;;  %v1996_v62 = vrot.slane %v1994_v44, 5  ;;  %v1767_v4 = vor.u32 %v1766_v56, %v8126_v55  ;;  %v841_v8 = vrot.slane %v836_v60, 4  ;;  %v7481_v9 = vld [vmem:[%s9623_s5 + $0x130] sm:$0xff]   ;;  %v8252_v30 = vld [vmem:[#allocation2 + $0x38] sm:$0x1] }
  0x83   : > { %v2012_v47 = vrot.slane %v2010_v57, 5  ;;  %v1102_v63 = vsel %vm7715_vm6, %v831_v58, %v1101_v45  ;;  %v552_v17 = vmul.f32 %v8057_v25, %v6704_v53  ;;  %v840_v23 = vsel %vm7740_vm10, %v832_v59, %v839_v7  ;;  %v8150_v59 = vld [vmem:[#allocation2 + $0x24] sm:$0xe]  ;;  %7085 = vmatpush3.bf16.msra.mxu0 %v7481_v9  ;;  %v1108_v0 = vld [vmem:[#allocation2 + $0x54] sm:$0xf] }
  0x84   : > { %v1997_v49 = vor.u32 %v1996_v62, %v1993_v1  ;;  %v1594_v10 = vld [vmem:[#allocation2 + $0x3c] sm:$0xf]  ;;  %v1768_v11 = vrot.slane %v1767_v4, 4  ;;  %1103 = vst [vmem:[#allocation2 + $0x48] sm:$0xf] %v1102_v63  ;;  %v1106_v32 = vsel %vm7668_vm3, %v841_v8, %v1105_v35  ;;  %v621_v36 = vmax.f32 %v589_v51, 0.0 }
  0x85   : > { %v2013_v18 = vsel %vm7760_vm11, %v8103_v24, %v2012_v47  ;;  %v1751_v19 = vshrl.u32 %v1594_v10, 16  ;;  %v1754_v14 = vshll.u32 %v1594_v10, 16  ;;  %1104 = vst [vmem:[#allocation2 + $0x4c] sm:$0xf] %v840_v23  ;;  %v622_v39 = vmax.f32 %v590_v5, 0.0  ;;  %v7458_v63 = vld [vmem:[#allocation2 + $0x3c] sm:$0xff]  }
  0x86   : > { %v1998_v28 = vrot.slane %v1997_v49, 4  ;;  %v1596_v22 = vld [vmem:[#allocation2 + $0x44] sm:$0x1]  ;;  %1107 = vst [vmem:[#allocation2 + $0x50] sm:$0x1] %v1106_v32  ;;  %v6337_v24 = vrot.slane %v2100_v6, 9  ;;  %v6618_v13 = vpack.c.bf16 %v621_v36, %v621_v36  ;;  %v553_v7 = vmul.f32 %v8057_v25, %v6705_v12 }
  0x87   : > { %v1753_v2 = vrot.slane %v1751_v19, 4  ;;  %v1756_v40 = vrot.slane %v1754_v14, 5  ;;  %v1770_v43 = vshll.u32 %v1596_v22, 16  ;;  %v6619_v45 = vpack.c.bf16 %v622_v39, %v622_v39  ;;  %v1112_v47 = vld [vmem:[#allocation2 + $0x5c] sm:$0x1]  ;;  %v6825_v14 = vld [vmem:[%s7661_s30 + $0x40] sm:$0xff]  }
  0x88   : > { %v2003_v61 = vsel %vm7760_vm11, %v1998_v28, %v8093_v15  ;;  %v2209_v46 = vrot.slane %v2101_v26, 5  ;;  %v2212_v54 = vrot.slane %v2102_v3, 5  ;;  %v843_v44 = vshrl.u32 %v6618_v13, 16  ;;  %v7459_v28 = vld [vmem:[%s9623_s5 + $0x180] sm:$0xff]   ;;  %v7462_v22 = vld [vmem:[#allocation2 + $0x18] sm:$0xff]  }
  0x89   : > { %v6334_v50 = vcombine.low %v2003_v61, %v2013_v18  ;;  %v1757_v53 = vor.u32 %v1756_v40, %v1753_v2  ;;  %v1772_v51 = vrot.slane %v1770_v43, 5  ;;  %v846_v56 = vshll.u32 %v6618_v13, 16  ;;  %v2104_v18 = vld [vmem:[#allocation2 + $0x28] sm:$0xf]  ;;  %v2105_v39 = vld [vmem:[#allocation2 + $0x2c] sm:$0x1] }
  0x8a   : > { %v851_v57 = vshrl.u32 %v6619_v45, 16  ;;  %v854_v58 = vshll.u32 %v6619_v45, 16  ;;  %v8156_v1 = vsel %vm8015_vm14, %v6337_v24, %v2209_v46  ;;  %v2211_v62 = vrot.slane %v2209_v46, 4  ;;  %v8177_v2 = vld [vmem:[%s7661_s30 + $0x48] sm:$0xff]   ;;  %v8185_v13 = vld [vmem:[#allocation2 + $0x30] sm:$0xe] }
  0x8b   : > { %5146 = vmatprep.mubr.bf16.mxu1 %v6334_v50  ;;  %v1758_v15 = vrot.slane %v1757_v53, 4  ;;  %v1773_v60 = vsel %vm7760_vm11, %v1768_v11, %v1772_v51  ;;  %v1196_v35 = vld [vmem:[#allocation2 + $0x48] sm:$0x1]  ;;  %v845_v5 = vrot.slane %v843_v44, 7  ;;  %v591_v11 = vadd.f32 %v8080_v41, %v552_v17  ;;  %v7486_v53 = vld [vmem:[%s9623_s5 + $0x178] sm:$0xff]  }
  0x8c   : > { %5147 = vmatmul.mubr.bf16.gmra.mrb[12].mxu1 %v7451_v33  ;;  %v1197_v4 = vsel %vm7668_vm3, 0, %v1196_v35  ;;  %v853_v6 = vrot.slane %v851_v57, 7  ;;  %v1598_v49 = vld [vmem:[#allocation2 + $0x4c] sm:$0xf]  ;;  %v8166_v10 = vsel %vm8015_vm14, %v2211_v62, %v2212_v54  ;;  %v6338_v19 = vrot.slane %v8150_v59, 9  ;;  %7086 = vmatprep.subr.bf16.mxu0 %v7486_v53 }
  0x8d   : > { %v1763_v8 = vsel %vm7760_vm11, %v1758_v15, %v8126_v55  ;;  %5187 = vmatprep.mubr.bf16.mxu1 %v7456_v31  ;;  %1198 = vst [vmem:[#allocation2 + $0x48] sm:$0x1] %v1197_v4  ;;  %v1251_v23 = vld [vmem:[#allocation2 + $0x50] sm:$0x1]  ;;  %v1784_v26 = vshll.u32 %v1598_v49, 16  ;;  %v1788_v3 = vshrl.u32 %v1598_v49, 16  ;;  %v848_v55 = vor.u32 %v846_v56, %v845_v5 }
  0x8e   : > { %v6324_v12 = vcombine.low %v1763_v8, %v1773_v60  ;;  %v1252_v33 = vsel %vm7676_vm4, 0, %v1251_v23  ;;  %v849_v32 = vrot.slane %v845_v5, 4  ;;  %v856_v17 = vor.u32 %v854_v58, %v853_v6  ;;  %v7466_v31 = vld [vmem:[%s9623_s5 + $0x1c8] sm:$0xff]   ;;  %v1115_v8 = vld [vmem:[#allocation2 + $0x60] sm:$0xf] }
  0x8f   : > { %v858_v36 = vrot.slane %v853_v6, 4  ;;  %1253 = vst [vmem:[#allocation2 + $0x50] sm:$0x1] %v1252_v33  ;;  %v8179_v40 = vrot.slane %v1784_v26, 5  ;;  %v1790_v43 = vrot.slane %v1788_v3, 4  ;;  %v1109_v24 = vsel %vm7715_vm6, %v848_v55, %v1108_v0  ;;  %v7469_v0 = vld [vmem:[%s9623_s5 + $0x188] sm:$0xff]  }
  0x90   : > { %5066 = vmatprep.mubr.bf16.mxu0 %v6324_v12  ;;  %v6353_v61 = vcombine.low %v8156_v1, %v8166_v10  ;;  %v857_v45 = vsel %vm7740_vm10, %v849_v32, %v856_v17  ;;  %1110 = vst [vmem:[#allocation2 + $0x54] sm:$0xf] %v1109_v24  ;;  %v592_v9 = vadd.f32 %v8080_v41, %v553_v7  ;;  %v623_v50 = vmax.f32 %v591_v11, 0.0  ;;  %v7464_v12 = vld [vmem:[#allocation2 + $0x24] sm:$0xff]   ;;  %v7477_v32 = vld [vmem:[%s9623_s5 + $0x190] sm:$0xff]   ;;  %v7483_v17 = vld [vmem:[%s9623_s5 + $0x1d8] sm:$0xff]  }
  0x91   : > { %5067 = vmatmul.mubr.bf16.gmra.mrb[20].mxu0 %v7458_v63  ;;  %v1113_v46 = vsel %vm7668_vm3, %v858_v36, %v1112_v47  ;;  %v1791_v51 = vor.u32 %v1790_v43, %v8179_v40  ;;  %1111 = vst [vmem:[#allocation2 + $0x58] sm:$0xf] %v857_v45  ;;  %v2216_v54 = vrot.slane %v2104_v18, 5  ;;  %v2219_v44 = vrot.slane %v2105_v39, 5 }
  0x92   : > { %1114 = vst [vmem:[#allocation2 + $0x5c] sm:$0x1] %v1113_v46  ;;  %v6708_v56 = vunpack.c.l.bf16 %v6825_v14  ;;  %v624_v57 = vmax.f32 %v592_v9, 0.0  ;;  %v6620_v58 = vpack.c.bf16 %v623_v50, %v623_v50  ;;  %v6709_v59 = vunpack.c.h.bf16 %v6825_v14 }
  0x93   : > { %v6339_v15 = vrot.slane %v8185_v13, 9  ;;  %v8203_v35 = vrot.slane %v1791_v51, 4  ;;  %v8210_v62 = vsel %vm8015_vm14, %v6338_v19, %v2216_v54  ;;  %v6712_v5 = vunpack.c.l.bf16 %v8177_v2 }
  0x94   : > { %5188 = vmatmul.mubr.bf16.vlgmr.msra.gmra.mrb[16].mxu1 %v6351_v27  ;;  %v1597_v60 = vld [vmem:[#allocation2 + $0x48] sm:$0xf]  ;;  %v554_v4 = vmul.f32 %v8057_v25, %v6708_v56  ;;  %v6621_v52 = vpack.c.bf16 %v624_v57, %v624_v57  ;;  %v860_v34 = vshrl.u32 %v6620_v58, 16  ;;  %v7475_v27 = vld [vmem:[%s9623_s5 + $0x1d0] sm:$0xff]   ;;  %v863_v7 = vshll.u32 %v6620_v58, 16 }
  0x95   : > { %7185 = vmatpush3.bf16.msra.mxu1 %v7459_v28  ;;  %v1775_v6 = vshrl.u32 %v1597_v60, 16  ;;  %v1778_v47 = vshll.u32 %v1597_v60, 16  ;;  %5195 = vmatprep.mubr.bf16.mxu1 %v7462_v22  ;;  %v2218_v63 = vrot.slane %v2216_v54, 4  ;;  %v555_v49 = vmul.f32 %v8057_v25, %v6709_v59  ;;  %v2107_v54 = vld [vmem:[#allocation2 + $0x34] sm:$0xf] }
  0x96   : > { %7186 = vmatprep.subr.bf16.mxu1 %v7466_v31  ;;  %v593_v11 = vadd.f32 %v8080_v41, %v554_v4  ;;  %v1599_v18 = vld [vmem:[#allocation2 + $0x50] sm:$0x1]  ;;  %v862_v23 = vrot.slane %v860_v34, 7  ;;  %v868_v26 = vshrl.u32 %v6621_v52, 16  ;;  %v871_v28 = vshll.u32 %v6621_v52, 16  ;;  %v7463_v52 = vld [vmem:[#allocation2 + $0x48] sm:$0xff]  }
  0x97   : > { %v1777_v19 = vrot.slane %v1775_v6, 4  ;;  %v1780_v14 = vrot.slane %v1778_v47, 5  ;;  %v1794_v3 = vshll.u32 %v1599_v18, 16  ;;  %v1199_v55 = vld [vmem:[#allocation2 + $0x54] sm:$0x1]  ;;  %v8221_v33 = vsel %vm8015_vm14, %v2218_v63, %v2219_v44  ;;  %v7487_v6 = vld [vmem:[%s9623_s5 + $0x138] sm:$0xff]  }
  0x98   : > { %v594_v22 = vadd.f32 %v8080_v41, %v555_v49  ;;  %v1200_v39 = vsel %vm7668_vm3, 0, %v1199_v55  ;;  %v1601_v24 = vld [vmem:[#allocation2 + $0x58] sm:$0xf]  ;;  %v865_v45 = vor.u32 %v863_v7, %v862_v23  ;;  %v866_v46 = vrot.slane %v862_v23, 4  ;;  %v1119_v31 = vld [vmem:[#allocation2 + $0x68] sm:$0x1]  ;;  %7087 = vmatpush3.bf16.msra.mxu0 %v7487_v6 }
  0x99   : > { %v1781_v36 = vor.u32 %v1780_v14, %v1777_v19  ;;  %v1254_v43 = vld [vmem:[#allocation2 + $0x5c] sm:$0x1]  ;;  %7187 = vmatpush3.bf16.msra.mxu1 %v7469_v0  ;;  %v1796_v9 = vrot.slane %v1794_v3, 5  ;;  %1201 = vst [vmem:[#allocation2 + $0x54] sm:$0x1] %v1200_v39  ;;  %v1808_v53 = vshll.u32 %v1601_v24, 16  ;;  %v6354_v58 = vcombine.low %v8210_v62, %v8221_v33 }
  0x9a   : > { %v1255_v50 = vsel %vm7676_vm4, 0, %v1254_v43  ;;  %v1812_v51 = vshrl.u32 %v1601_v24, 16  ;;  %7188 = vmatprep.subr.bf16.mxu1 %v7475_v27  ;;  %v870_v56 = vrot.slane %v868_v26, 7  ;;  %v1116_v57 = vsel %vm7715_vm6, %v865_v45, %v1115_v8  ;;  %v8268_v14 = vld [vmem:[%s9623_s5 + $0x200] sm:$0xff]  }
  0x9b   : > { %v1782_v44 = vrot.slane %v1781_v36, 4  ;;  %1256 = vst [vmem:[#allocation2 + $0x5c] sm:$0x1] %v1255_v50  ;;  %v1797_v59 = vsel %vm7760_vm11, %v8203_v35, %v1796_v9  ;;  %v8244_v60 = vrot.slane %v1808_v53, 5  ;;  %1117 = vst [vmem:[#allocation2 + $0x60] sm:$0xf] %v1116_v57  ;;  %v556_v36 = vmul.f32 %v8057_v25, %v6712_v5  ;;  %7320 = vmatprep.subr.bf16.mxu0 %v8268_v14 }
  0x9c   : > { %5196 = vmatmul.mubr.bf16.gmra.mrb[20].mxu1 %v6352_v37  ;;  %v1814_v0 = vrot.slane %v1812_v51, 4  ;;  %v625_v4 = vmax.f32 %v593_v11, 0.0  ;;  %v873_v35 = vor.u32 %v871_v28, %v870_v56  ;;  %v875_v34 = vrot.slane %v870_v56, 4  ;;  %v7470_v11 = vld [vmem:[#allocation2 + $0x30] sm:$0xff]   ;;  %v7492_v39 = vld [vmem:[%s9623_s5 + $0x1a0] sm:$0xff]  }
  0x9d   : > { %v1787_v47 = vsel %vm7760_vm11, %v1782_v44, %v8179_v40  ;;  %5203 = vmatprep.mubr.bf16.mxu1 %v7464_v12  ;;  %v626_v27 = vmax.f32 %v594_v22, 0.0  ;;  %7189 = vmatpush3.bf16.msra.mxu1 %v7477_v32  ;;  %v7490_v40 = vld [vmem:[%s9623_s5 + $0x1e0] sm:$0xff]   ;;  %v2223_v19 = vrot.slane %v2107_v54, 5  ;;  %v2226_v3 = vrot.slane %v8252_v30, 5  ;;  %v1122_v22 = vld [vmem:[#allocation2 + $0x6c] sm:$0xf] }
  0x9e   : > { %v6325_v37 = vcombine.low %v1787_v47, %v1797_v59  ;;  %v1815_v7 = vor.u32 %v1814_v0, %v8244_v60  ;;  %v6622_v8 = vpack.c.bf16 %v625_v4, %v625_v4  ;;  %7190 = vmatprep.subr.bf16.mxu1 %v7483_v17  ;;  %v874_v63 = vsel %vm7740_vm10, %v866_v46, %v873_v35  ;;  %v1126_v9 = vld [vmem:[#allocation2 + $0x74] sm:$0x1]  ;;  %v8296_v57 = vld [vmem:[#allocation2 + $0x3c] sm:$0xe]  ;;  %v7495_v59 = vld [vmem:[%s9623_s5 + $0x1e8] sm:$0xff]  }
  0x9f   : > { %v1120_v49 = vsel %vm7668_vm3, %v875_v34, %v1119_v31  ;;  %v6623_v18 = vpack.c.bf16 %v626_v27, %v626_v27  ;;  %1118 = vst [vmem:[#allocation2 + $0x64] sm:$0xf] %v874_v63  ;;  %v8277_v32 = vsel %vm8015_vm14, %v6339_v15, %v2223_v19  ;;  %v6713_v17 = vunpack.c.h.bf16 %v8177_v2  ;;  %v8289_v51 = vld [vmem:[%s7661_s30 + $0x50] sm:$0xff]   ;;  %v2111_v35 = vld [vmem:[#allocation2 + $0x44] sm:$0x1] }
  0xa0   : > { %5074 = vmatprep.mubr.bf16.mxu0 %v6325_v37  ;;  %v8270_v12 = vrot.slane %v1815_v7, 4  ;;  %1121 = vst [vmem:[#allocation2 + $0x68] sm:$0x1] %v1120_v49  ;;  %v877_v23 = vshrl.u32 %v6622_v8, 16  ;;  %v880_v26 = vshll.u32 %v6622_v8, 16  ;;  %v2225_v53 = vrot.slane %v2223_v19, 4 }
  0xa1   : > { %5075 = vmatmul.mubr.bf16.gmra.mrb[24].mxu0 %v7463_v52  ;;  %v1600_v55 = vld [vmem:[#allocation2 + $0x54] sm:$0xf]  ;;  %v885_v28 = vshrl.u32 %v6623_v18, 16  ;;  %7191 = vmatpush3.bf16.msra.mxu1 %v7485_v29  ;;  %v888_v46 = vshll.u32 %v6623_v18, 16  ;;  %v557_v5 = vmul.f32 %v8057_v25, %v6713_v17  ;;  %v595_v10 = vadd.f32 %v8080_v41, %v556_v36  ;;  %v7474_v18 = vld [vmem:[#allocation2 + $0x3c] sm:$0xff]  }
  0xa2   : > { %v1602_v43 = vld [vmem:[#allocation2 + $0x5c] sm:$0x1]  ;;  %v1799_v24 = vshrl.u32 %v1600_v55, 16  ;;  %v1802_v45 = vshll.u32 %v1600_v55, 16  ;;  %v879_v13 = vrot.slane %v877_v23, 7  ;;  %7192 = vmatprep.subr.bf16.mxu1 %v7490_v40  ;;  %v6716_v34 = vunpack.c.l.bf16 %v8289_v51 }
  0xa3   : > { %v1818_v15 = vshll.u32 %v1602_v43, 16  ;;  %v1202_v50 = vld [vmem:[#allocation2 + $0x60] sm:$0x1]  ;;  %v887_v2 = vrot.slane %v885_v28, 7  ;;  %v8314_v8 = vsel %vm8015_vm14, %v2225_v53, %v2226_v3  ;;  %v596_v19 = vadd.f32 %v8080_v41, %v557_v5  ;;  %v7497_v3 = vld [vmem:[%s9623_s5 + $0x1a8] sm:$0xff]   ;;  %v7467_v28 = vld [vmem:[#allocation2 + $0x54] sm:$0xff]  }
  0xa4   : > { %v1801_v31 = vrot.slane %v1799_v24, 4  ;;  %v1804_v54 = vrot.slane %v1802_v45, 5  ;;  %5204 = vmatmul.mubr.bf16.gmra.mrb[24].mxu1 %v6353_v61  ;;  %v1203_v44 = vsel %vm7668_vm3, 0, %v1202_v50  ;;  %v882_v56 = vor.u32 %v880_v26, %v879_v13  ;;  %v2110_v61 = vld [vmem:[#allocation2 + $0x40] sm:$0xf] }
  0xa5   : > { %v1820_v0 = vrot.slane %v1818_v15, 5  ;;  %1204 = vst [vmem:[#allocation2 + $0x60] sm:$0x1] %v1203_v44  ;;  %5211 = vmatprep.mubr.bf16.mxu1 %v7470_v11  ;;  %v883_v4 = vrot.slane %v879_v13, 4  ;;  %v890_v6 = vor.u32 %v888_v46, %v887_v2  ;;  %v892_v47 = vrot.slane %v887_v2, 4  ;;  %7193 = vmatpush3.bf16.msra.mxu1 %v7492_v39 }
  0xa6   : > { %v1805_v52 = vor.u32 %v1804_v54, %v1801_v31  ;;  %v1123_v1 = vsel %vm7715_vm6, %v882_v56, %v1122_v22  ;;  %7194 = vmatprep.subr.bf16.mxu1 %v7495_v59  ;;  %v1604_v29 = vld [vmem:[#allocation2 + $0x64] sm:$0xf]  ;;  %v6340_v23 = vrot.slane %v8296_v57, 9  ;;  %v2230_v26 = vrot.slane %v2110_v61, 5  ;;  %v1129_v59 = vld [vmem:[#allocation2 + $0x78] sm:$0xf] }
  0xa7   : > { %v1821_v27 = vsel %vm7760_vm11, %v8270_v12, %v1820_v0  ;;  %v1257_v30 = vld [vmem:[#allocation2 + $0x68] sm:$0x1]  ;;  %v891_v37 = vsel %vm7740_vm10, %v883_v4, %v890_v6  ;;  %1124 = vst [vmem:[#allocation2 + $0x6c] sm:$0xf] %v1123_v1  ;;  %v1127_v7 = vsel %vm7668_vm3, %v892_v47, %v1126_v9  ;;  %v1832_v49 = vshll.u32 %v1604_v29, 16 }
  0xa8   : > { %v1806_v40 = vrot.slane %v1805_v52, 4  ;;  %v1258_v63 = vsel %vm7676_vm4, 0, %v1257_v30  ;;  %v1836_v11 = vshrl.u32 %v1604_v29, 16  ;;  %1125 = vst [vmem:[#allocation2 + $0x70] sm:$0xf] %v891_v37  ;;  %v627_v12 = vmax.f32 %v595_v10, 0.0 }
  0xa9   : > { %1128 = vst [vmem:[#allocation2 + $0x74] sm:$0x1] %v1127_v7  ;;  %1259 = vst [vmem:[#allocation2 + $0x68] sm:$0x1] %v1258_v63  ;;  %v8326_v22 = vrot.slane %v1832_v49, 5  ;;  %v2233_v36 = vrot.slane %v2111_v35, 5  ;;  %v6355_v43 = vcombine.low %v8277_v32, %v8314_v8  ;;  %7195 = vmatpush3.bf16.msra.mxu1 %v7497_v3  ;;  %v6717_v9 = vunpack.c.h.bf16 %v8289_v51 }
  0xaa   : > { %v1811_v55 = vsel %vm7760_vm11, %v1806_v40, %v8244_v60  ;;  %v1838_v17 = vrot.slane %v1836_v11, 4  ;;  %v628_v24 = vmax.f32 %v596_v19, 0.0  ;;  %v6624_v45 = vpack.c.bf16 %v627_v12, %v627_v12  ;;  %v7478_v0 = vld [vmem:[#allocation2 + $0x48] sm:$0xff]   ;;  %v7500_v30 = vld [vmem:[%s9623_s5 + $0x1f0] sm:$0xff]   ;;  %v1133_v11 = vld [vmem:[#allocation2 + $0x80] sm:$0x1] }
  0xab   : > { %v6326_v39 = vcombine.low %v1811_v55, %v1821_v27  ;;  %v2232_v60 = vrot.slane %v2230_v26, 4  ;;  %v558_v15 = vmul.f32 %v8057_v25, %v6716_v34  ;;  %v8338_v44 = vsel %vm8015_vm14, %v6340_v23, %v2230_v26  ;;  %7196 = vmatprep.subr.bf16.mxu1 %v7500_v30  ;;  %v7502_v26 = vld [vmem:[%s9623_s5 + $0x1b0] sm:$0xff]  }
  0xac   : > { %v1603_v13 = vld [vmem:[#allocation2 + $0x60] sm:$0xf]  ;;  %v1839_v46 = vor.u32 %v1838_v17, %v8326_v22  ;;  %5212 = vmatmul.mubr.bf16.gmra.mrb[28].mxu1 %v6354_v58  ;;  %v6625_v32 = vpack.c.bf16 %v628_v24, %v628_v24  ;;  %v894_v53 = vshrl.u32 %v6624_v45, 16  ;;  %v897_v54 = vshll.u32 %v6624_v45, 16  ;;  %v3042_v30 = vld [vmem:[#allocation2 + $0x10] sm:$0xf] }
  0xad   : > { %5082 = vmatprep.mubr.bf16.mxu0 %v6326_v39  ;;  %v1823_v50 = vshrl.u32 %v1603_v13, 16  ;;  %v1826_v2 = vshll.u32 %v1603_v13, 16  ;;  %5219 = vmatprep.mubr.bf16.mxu1 %v7474_v18  ;;  %v8342_v62 = vsel %vm8015_vm14, %v2232_v60, %v2233_v36  ;;  %v559_v1 = vmul.f32 %v8057_v25, %v6717_v9  ;;  %v2112_v39 = vld [vmem:[#allocation2 + $0x48] sm:$0xe] }
  0xae   : > { %5083 = vmatmul.mubr.bf16.gmra.mrb[28].mxu0 %v7467_v28  ;;  %v1840_v5 = vrot.slane %v1839_v46, 4  ;;  %v1205_v31 = vld [vmem:[#allocation2 + $0x6c] sm:$0x1]  ;;  %v896_v57 = vrot.slane %v894_v53, 7  ;;  %v902_v52 = vshrl.u32 %v6625_v32, 16  ;;  %v597_v10 = vadd.f32 %v8080_v41, %v558_v15  ;;  %v7471_v28 = vld [vmem:[#allocation2 + $0x60] sm:$0xff]   ;;  %7197 = vmatpush3.bf16.msra.mxu1 %v7502_v26 }
  0xaf   : > { %v1825_v33 = vrot.slane %v1823_v50, 4  ;;  %v1828_v58 = vrot.slane %v1826_v2, 5  ;;  %v1206_v51 = vsel %vm7668_vm3, 0, %v1205_v31  ;;  %v1607_v47 = vld [vmem:[#allocation2 + $0x70] sm:$0xf]  ;;  %v905_v8 = vshll.u32 %v6625_v32, 16 }
  0xb0   : > { %v1260_v56 = vld [vmem:[#allocation2 + $0x74] sm:$0x1]  ;;  %v1605_v4 = vld [vmem:[#allocation2 + $0x68] sm:$0x1]  ;;  %1207 = vst [vmem:[#allocation2 + $0x6c] sm:$0x1] %v1206_v51  ;;  %v899_v29 = vor.u32 %v897_v54, %v896_v57  ;;  %v598_v23 = vadd.f32 %v8080_v41, %v559_v1  ;;  %v6356_v60 = vcombine.low %v8338_v44, %v8342_v62 }
  0xb1   : > { %v1261_v6 = vsel %vm7676_vm4, 0, %v1260_v56  ;;  %v1829_v61 = vor.u32 %v1828_v58, %v1825_v33  ;;  %v1842_v35 = vshll.u32 %v1605_v4, 16  ;;  %v1856_v34 = vshll.u32 %v1607_v47, 16  ;;  %v2114_v15 = vld [vmem:[#allocation2 + $0x50] sm:$0x1]  ;;  %v7482_v31 = vld [vmem:[#allocation2 + $0x54] sm:$0xff]  }
  0xb2   : > { %1262 = vst [vmem:[#allocation2 + $0x74] sm:$0x1] %v1261_v6  ;;  %v1860_v27 = vshrl.u32 %v1607_v47, 16  ;;  %v900_v37 = vrot.slane %v896_v57, 4  ;;  %v904_v7 = vrot.slane %v902_v52, 7  ;;  %v1130_v12 = vsel %vm7715_vm6, %v899_v29, %v1129_v59 }
  0xb3   : > { %v1830_v40 = vrot.slane %v1829_v61, 4  ;;  %v1844_v63 = vrot.slane %v1842_v35, 5  ;;  %v8353_v49 = vrot.slane %v1856_v34, 5  ;;  %1131 = vst [vmem:[#allocation2 + $0x78] sm:$0xf] %v1130_v12  ;;  %v629_v36 = vmax.f32 %v597_v10, 0.0 }
  0xb4   : > { %v1862_v25 = vrot.slane %v1860_v27, 4  ;;  %5220 = vmatmul.mubr.bf16.gmra.mrb[32].mxu1 %v6355_v43  ;;  %v907_v18 = vor.u32 %v905_v8, %v904_v7  ;;  %v909_v19 = vrot.slane %v904_v7, 4  ;;  %v2113_v43 = vld [vmem:[#allocation2 + $0x4c] sm:$0xf]  ;;  %v630_v13 = vmax.f32 %v598_v23, 0.0  ;;  %v7505_v10 = vld [vmem:[%s9623_s5 + $0x1f8] sm:$0xff]  }
  0xb5   : > { %v1835_v3 = vsel %vm7760_vm11, %v1830_v40, %v8326_v22  ;;  %v1845_v55 = vsel %vm7760_vm11, %v1840_v5, %v1844_v63  ;;  %5227 = vmatprep.mubr.bf16.mxu1 %v7478_v0  ;;  %v6626_v9 = vpack.c.bf16 %v629_v36, %v629_v36  ;;  %v8375_v50 = vld [vmem:[#allocation2 + $0xc] sm:$0xe]  ;;  %v6341_v54 = vrot.slane %v2112_v39, 9  ;;  %v1136_v62 = vld [vmem:[#allocation2 + $0x84] sm:$0xf]  ;;  %7198 = vmatprep.subr.bf16.mxu1 %v7505_v10 }
  0xb6   : > { %v1863_v17 = vor.u32 %v1862_v25, %v8353_v49  ;;  %v6327_v41 = vcombine.low %v1835_v3, %v1845_v55  ;;  %v908_v24 = vsel %vm7740_vm10, %v900_v37, %v907_v18  ;;  %v1134_v45 = vsel %vm7668_vm3, %v909_v19, %v1133_v11  ;;  %v1140_v47 = vld [vmem:[#allocation2 + $0x8c] sm:$0x1]  ;;  %v3043_v63 = vld [vmem:[#allocation2 + $0x14] sm:$0x1]  ;;  %v2115_v25 = vld [vmem:[#allocation2 + $0x54] sm:$0xe] }
  0xb7   : > { %v1606_v22 = vld [vmem:[#allocation2 + $0x6c] sm:$0xf]  ;;  %1132 = vst [vmem:[#allocation2 + $0x7c] sm:$0xf] %v908_v24  ;;  %1135 = vst [vmem:[#allocation2 + $0x80] sm:$0x1] %v1134_v45  ;;  %v6627_v5 = vpack.c.bf16 %v630_v13, %v630_v13 }
  0xb8   : > { %v8371_v46 = vrot.slane %v1863_v17, 4  ;;  %5090 = vmatprep.mubr.bf16.mxu0 %v6327_v41  ;;  %v1847_v32 = vshrl.u32 %v1606_v22, 16  ;;  %v1850_v53 = vshll.u32 %v1606_v22, 16  ;;  %v911_v58 = vshrl.u32 %v6626_v9, 16  ;;  %v2116_v11 = vld [vmem:[#allocation2 + $0x58] sm:$0xf] }
  0xb9   : > { %v1608_v2 = vld [vmem:[#allocation2 + $0x74] sm:$0x1]  ;;  %5091 = vmatmul.mubr.bf16.gmra.mrb[32].mxu0 %v7471_v28  ;;  %v914_v51 = vshll.u32 %v6626_v9, 16  ;;  %v2237_v56 = vrot.slane %v2113_v43, 5  ;;  %v919_v0 = vshrl.u32 %v6627_v5, 16  ;;  %v922_v44 = vshll.u32 %v6627_v5, 16 }
  0xba   : > { %v1866_v33 = vshll.u32 %v1608_v2, 16  ;;  %v1849_v57 = vrot.slane %v1847_v32, 4  ;;  %v1852_v59 = vrot.slane %v1850_v53, 5  ;;  %v913_v6 = vrot.slane %v911_v58, 7  ;;  %v1208_v35 = vld [vmem:[#allocation2 + $0x78] sm:$0x1] }
  0xbb   : > { %v2238_v52 = vsel %vm8015_vm14, %v6341_v54, %v2237_v56  ;;  %v2239_v1 = vrot.slane %v2237_v56, 4  ;;  %v921_v34 = vrot.slane %v919_v0, 7  ;;  %v2240_v27 = vrot.slane %v2114_v15, 5  ;;  %v2117_v18 = vld [vmem:[#allocation2 + $0x5c] sm:$0x1]  ;;  %v7476_v24 = vld [vmem:[#allocation2 + $0x6c] sm:$0xff]  }
  0xbc   : > { %v1868_v4 = vrot.slane %v1866_v33, 5  ;;  %v1853_v61 = vor.u32 %v1852_v59, %v1849_v57  ;;  %5228 = vmatmul.mubr.bf16.gmra.mrb[36].mxu1 %v6356_v60  ;;  %v6399_v29 = vrot.slane %v8375_v50, 9  ;;  %v1209_v7 = vsel %vm7668_vm3, 0, %v1208_v35  ;;  %v7507_v43 = vld [vmem:[%s9623_s5 + $0x1b8] sm:$0xff]   ;;  %v7488_v50 = vld [vmem:[#allocation2 + $0x60] sm:$0xff]  }
  0xbd   : > { %v916_v8 = vor.u32 %v914_v51, %v913_v6  ;;  %v917_v40 = vrot.slane %v913_v6, 4  ;;  %5235 = vmatprep.mubr.bf16.mxu1 %v7482_v31  ;;  %1210 = vst [vmem:[#allocation2 + $0x78] sm:$0x1] %v1209_v7  ;;  %v924_v26 = vor.u32 %v922_v44, %v921_v34  ;;  %v926_v3 = vrot.slane %v921_v34, 4  ;;  %7199 = vmatpush3.bf16.msra.mxu1 %v7507_v43  ;;  %v6832_v59 = vld [vmem:[%s7661_s30 + $0x78] sm:$0xff]   ;;  %v7489_v7 = vld [vmem:[#allocation2 + $0x6c] sm:$0xff]   ;;  %s9545_s30 = scalar_lea.vmem %s9624_s6, %s6601_s21 }
  0xbe   : > { %v1869_v37 = vsel %vm7760_vm11, %v8371_v46, %v1868_v4  ;;  %v1854_v19 = vrot.slane %v1853_v61, 4  ;;  %v1263_v12 = vld [vmem:[#allocation2 + $0x80] sm:$0x1]  ;;  %v1610_v23 = vld [vmem:[#allocation2 + $0x7c] sm:$0xf]  ;;  %v2241_v55 = vsel %vm8015_vm14, %v2239_v1, %v2240_v27  ;;  %v3139_v2 = vrot.slane %v3042_v30, 5 }
  0xbf   : > { %v1264_v28 = vsel %vm7676_vm4, 0, %v1263_v12  ;;  %v1880_v17 = vshll.u32 %v1610_v23, 16  ;;  %v1884_v36 = vshrl.u32 %v1610_v23, 16  ;;  %v1137_v39 = vsel %vm7715_vm6, %v916_v8, %v1136_v62  ;;  %v2529_v46 = vld [vmem:[#allocation2 + $0xc] sm:$0xf]  ;;  %s6260_s21 = sshll.u32 %s9671_s24, 1 }
  0xc0   : > { %v1859_v41 = vsel %vm7760_vm11, %v1854_v19, %v8353_v49  ;;  %1265 = vst [vmem:[#allocation2 + $0x80] sm:$0x1] %v1264_v28  ;;  %v925_v45 = vsel %vm7740_vm10, %v917_v40, %v924_v26  ;;  %1138 = vst [vmem:[#allocation2 + $0x84] sm:$0xf] %v1137_v39  ;;  %v1141_v13 = vsel %vm7668_vm3, %v926_v3, %v1140_v47  ;;  %v2530_v49 = vld [vmem:[#allocation2 + $0x10] sm:$0xf]  ;;  %v6737_v26 = vunpack.c.h.bf16 %v6832_v59  ;;  %s465_s12 = scalar_lea.vmem %s9625_s7, %s6260_s21 }
  0xc1   : > { %v6357_v22 = vcombine.low %v2238_v52, %v2241_v55  ;;  %v6328_v60 = vcombine.low %v1859_v41, %v1869_v37  ;;  %v8404_v9 = vrot.slane %v1880_v17, 5  ;;  %v1886_v15 = vrot.slane %v1884_v36, 4  ;;  %1139 = vst [vmem:[#allocation2 + $0x88] sm:$0xf] %v925_v45  ;;  %1142 = vst [vmem:[#allocation2 + $0x8c] sm:$0x1] %v1141_v13 }
  0xc2   : > { %v3142_v32 = vrot.slane %v3043_v63, 5  ;;  %v6342_v53 = vrot.slane %v2115_v25, 9  ;;  %v2244_v5 = vrot.slane %v2116_v11, 5  ;;  %v2247_v31 = vrot.slane %v2117_v18, 5  ;;  %v2531_v10 = vld [vmem:[#allocation2 + $0x14] sm:$0x1] }
  0xc3   : > { %5098 = vmatprep.mubr.bf16.mxu0 %v6328_v60  ;;  %v1887_v54 = vor.u32 %v1886_v15, %v8404_v9  ;;  %v3141_v33 = vrot.slane %v3139_v2, 4  ;;  %v2578_v58 = vshrl.u32 %v2529_v46, 16  ;;  %v2581_v57 = vshll.u32 %v2529_v46, 16  ;;  %v3044_v61 = vld [vmem:[#allocation2 + $0x18] sm:$0xe] }
  0xc4   : > { %5099 = vmatmul.mubr.bf16.gmra.mrb[36].mxu0 %v7476_v24  ;;  %5236 = vmatmul.mubr.bf16.gmra.mrb[40].mxu1 %v6357_v22  ;;  %v2245_v51 = vsel %vm8015_vm14, %v6342_v53, %v2244_v5  ;;  %v2246_v56 = vrot.slane %v2244_v5, 4  ;;  %v1609_v0 = vld [vmem:[#allocation2 + $0x78] sm:$0xf]  ;;  %v8412_v62 = vsel %vm8015_vm14, %v6399_v29, %v3139_v2  ;;  %v2587_v4 = vshll.u32 %v2530_v49, 16  ;;  %v3045_v36 = vld [vmem:[#allocation2 + $0x1c] sm:$0xf] }
  0xc5   : > { %v1888_v44 = vrot.slane %v1887_v54, 4  ;;  %5243 = vmatprep.mubr.bf16.mxu1 %v7488_v50  ;;  %v1871_v6 = vshrl.u32 %v1609_v0, 16  ;;  %v1874_v47 = vshll.u32 %v1609_v0, 16  ;;  %v8416_v52 = vsel %vm8015_vm14, %v3141_v33, %v3142_v32  ;;  %v3046_v24 = vld [vmem:[#allocation2 + $0x20] sm:$0x1] }
  0xc6   : > { %v2248_v1 = vsel %vm8015_vm14, %v2246_v56, %v2247_v31  ;;  %v2580_v30 = vrot.slane %v2578_v58, 4  ;;  %v2583_v37 = vrot.slane %v2581_v57, 5  ;;  %v6736_v29 = vunpack.c.l.bf16 %v6832_v59  ;;  %v2118_v32 = vld [vmem:[#allocation2 + $0x60] sm:$0xe]  ;;  %v7480_v31 = vld [vmem:[#allocation2 + $0x78] sm:$0xff]  }
  0xc7   : > { %v1611_v35 = vld [vmem:[#allocation2 + $0x80] sm:$0x1]  ;;  %v1211_v34 = vld [vmem:[#allocation2 + $0x84] sm:$0x1]  ;;  %v6358_v27 = vcombine.low %v2245_v51, %v2248_v1  ;;  %v1873_v8 = vrot.slane %v1871_v6, 4  ;;  %v1876_v40 = vrot.slane %v1874_v47, 5  ;;  %v6415_v15 = vcombine.low %v8412_v62, %v8416_v52 }
  0xc8   : > { %v1890_v63 = vshll.u32 %v1611_v35, 16  ;;  %v1212_v25 = vsel %vm7668_vm3, 0, %v1211_v34  ;;  %v1266_v11 = vld [vmem:[#allocation2 + $0x8c] sm:$0x1]  ;;  %v1613_v19 = vld [vmem:[#allocation2 + $0x88] sm:$0xf]  ;;  %v2584_v12 = vor.u32 %v2583_v37, %v2580_v30 }
  0xc9   : > { %1213 = vst [vmem:[#allocation2 + $0x84] sm:$0x1] %v1212_v25  ;;  %v1267_v18 = vsel %vm7676_vm4, 0, %v1266_v11  ;;  %v8424_v23 = vrot.slane %v2587_v4, 5  ;;  %v1877_v3 = vor.u32 %v1876_v40, %v1873_v8  ;;  %v1904_v28 = vshll.u32 %v1613_v19, 16 }
  0xca   : > { %v1892_v55 = vrot.slane %v1890_v63, 5  ;;  %1268 = vst [vmem:[#allocation2 + $0x8c] sm:$0x1] %v1267_v18  ;;  %v1908_v17 = vshrl.u32 %v1613_v19, 16  ;;  %v8426_v39 = vrot.slane %v2584_v12, 4  ;;  %v2591_v43 = vshrl.u32 %v2530_v49, 16 }
  0xcb   : > { %v2597_v41 = vshll.u32 %v2531_v10, 16  ;;  %v6400_v45 = vrot.slane %v3044_v61, 9  ;;  %v1878_v13 = vrot.slane %v1877_v3, 4  ;;  %v8430_v46 = vrot.slane %v1904_v28, 5  ;;  %v7531_v49 = vld [vmem:[%s9621_s3] ss:$0 sm:$0xff] }
  0xcc   : > { %v1893_v22 = vsel %vm7760_vm11, %v1888_v44, %v1892_v55  ;;  %v1910_v60 = vrot.slane %v1908_v17, 4  ;;  %5244 = vmatmul.mubr.bf16.gmra.mrb[44].mxu1 %v6358_v27  ;;  %v2593_v50 = vrot.slane %v2591_v43, 4  ;;  %v3146_v2 = vrot.slane %v3045_v36, 5  ;;  %v2119_v58 = vld [vmem:[#allocation2 + $0x64] sm:$0xf] }
  0xcd   : > { %5251 = vmatprep.mubr.bf16.mxu1 %v7489_v7  ;;  %v568_v53 = vmul.f32 %v7531_v49, %v6736_v29  ;;  %v1883_v5 = vsel %vm7760_vm11, %v1878_v13, %v8404_v9  ;;  %v3149_v33 = vrot.slane %v3046_v24, 5  ;;  %v569_v51 = vmul.f32 %v7531_v49, %v6737_v26  ;;  %v2120_v44 = vld [vmem:[#allocation2 + $0x68] sm:$0x1]  ;;  %v2532_v4 = vld [vmem:[#allocation2 + $0x18] sm:$0xf] }
  0xce   : > { %v1911_v54 = vor.u32 %v1910_v60, %v8430_v46  ;;  %v6329_v56 = vcombine.low %v1883_v5, %v1893_v22  ;;  %v2594_v57 = vor.u32 %v2593_v50, %v8424_v23  ;;  %v8442_v59 = vrot.slane %v2597_v41, 5  ;;  %v2533_v30 = vld [vmem:[#allocation2 + $0x1c] sm:$0xf]  ;;  %v7532_v37 = vld [vmem:[%s9622_s4] ss:$0 sm:$0xff] }
  0xcf   : > { %v3148_v0 = vrot.slane %v3146_v2, 4  ;;  %v2590_v9 = vsel %vm7760_vm11, %v8426_v39, %v8424_v23  ;;  %v8450_v1 = vsel %vm8015_vm14, %v6400_v45, %v3146_v2  ;;  %v6343_v10 = vrot.slane %v2118_v32, 9  ;;  %v2534_v18 = vld [vmem:[#allocation2 + $0x20] sm:$0x1]  ;;  %v3047_v12 = vld [vmem:[#allocation2 + $0x24] sm:$0xe] }
  0xd0   : > { %v1612_v6 = vld [vmem:[#allocation2 + $0x84] sm:$0xf]  ;;  %v1912_v47 = vrot.slane %v1911_v54, 4  ;;  %5106 = vmatprep.mubr.bf16.mxu0 %v6329_v56  ;;  %v8459_v7 = vadd.f32 %v7532_v37, %v568_v53  ;;  %v8461_v8 = vrot.slane %v2594_v57, 4  ;;  %v2251_v40 = vrot.slane %v2119_v58, 5  ;;  %v7493_v49 = vld [vmem:[#allocation2 + $0x78] sm:$0xff]  }
  0xd1   : > { %v1614_v61 = vld [vmem:[#allocation2 + $0x8c] sm:$0x1]  ;;  %v1895_v35 = vshrl.u32 %v1612_v6, 16  ;;  %v1898_v34 = vshll.u32 %v1612_v6, 16  ;;  %v8454_v27 = vsel %vm8015_vm14, %v3148_v0, %v3149_v33  ;;  %5107 = vmatmul.mubr.bf16.gmra.mrb[40].mxu0 %v7480_v31  ;;  %v2254_v63 = vrot.slane %v2120_v44, 5 }
  0xd2   : > { %v1914_v29 = vshll.u32 %v1614_v61, 16  ;;  %v2602_v19 = vshrl.u32 %v2532_v4, 16  ;;  %v8463_v26 = vadd.f32 %v7532_v37, %v569_v51  ;;  %v6416_v55 = vcombine.low %v8450_v1, %v8454_v27  ;;  %v3048_v36 = vld [vmem:[#allocation2 + $0x28] sm:$0xf]  ;;  %v3049_v43 = vld [vmem:[#allocation2 + $0x2c] sm:$0x1] }
  0xd3   : > { %v1897_v25 = vrot.slane %v1895_v35, 4  ;;  %v1900_v11 = vrot.slane %v1898_v34, 5  ;;  %v2252_v28 = vsel %vm8015_vm14, %v6343_v10, %v2251_v40  ;;  %v2253_v17 = vrot.slane %v2251_v40, 4  ;;  %v2121_v22 = vld [vmem:[#allocation2 + $0x6c] sm:$0xe] }
  0xd4   : > { %v1916_v3 = vrot.slane %v1914_v29, 5  ;;  %v2604_v24 = vrot.slane %v2602_v19, 4  ;;  %v2605_v45 = vshll.u32 %v2532_v4, 16  ;;  %v2611_v13 = vshll.u32 %v2533_v30, 16  ;;  %v2122_v53 = vld [vmem:[#allocation2 + $0x70] sm:$0xf] }
  0xd5   : > { %v1901_v41 = vor.u32 %v1900_v11, %v1897_v25  ;;  %v2600_v50 = vsel %vm7760_vm11, %v8461_v8, %v8442_v59  ;;  %v2255_v2 = vsel %vm8015_vm14, %v2253_v17, %v2254_v63  ;;  %v2615_v32 = vshrl.u32 %v2533_v30, 16  ;;  %v2123_v5 = vld [vmem:[#allocation2 + $0x74] sm:$0x1]  ;;  %v2535_v31 = vld [vmem:[#allocation2 + $0x24] sm:$0xf] }
  0xd6   : > { %v1917_v60 = vsel %vm7760_vm11, %v1912_v47, %v1916_v3  ;;  %v6359_v33 = vcombine.low %v2252_v28, %v2255_v2  ;;  %v2607_v58 = vrot.slane %v2605_v45, 5  ;;  %v8477_v51 = vrot.slane %v2611_v13, 5  ;;  %v7484_v4 = vld [vmem:[#allocation2 + $0x84] sm:$0xff]   ;;  %v2537_v29 = vld [vmem:[#allocation2 + $0x2c] sm:$0x1] }
  0xd7   : > { %v1902_v54 = vrot.slane %v1901_v41, 4  ;;  %v2617_v56 = vrot.slane %v2615_v32, 4  ;;  %v2621_v57 = vshll.u32 %v2534_v18, 16  ;;  %v6401_v0 = vrot.slane %v3047_v12, 9  ;;  %v2536_v61 = vld [vmem:[#allocation2 + $0x28] sm:$0xf] }
  0xd8   : > { %v3153_v44 = vrot.slane %v3048_v36, 5  ;;  %5252 = vmatmul.mubr.bf16.gmra.mrb[48].mxu1 %v6359_v33  ;;  %v2608_v6 = vor.u32 %v2607_v58, %v2604_v24  ;;  %v3156_v47 = vrot.slane %v3049_v43, 5  ;;  %v6344_v10 = vrot.slane %v2121_v22, 9  ;;  %v3050_v25 = vld [vmem:[#allocation2 + $0x30] sm:$0xe]  ;;  %v7494_v32 = vld [vmem:[#allocation2 + $0x84] sm:$0xff]  }
  0xd9   : > { %v1907_v59 = vsel %vm7760_vm11, %v1902_v54, %v8430_v46  ;;  %v2618_v34 = vor.u32 %v2617_v56, %v8477_v51  ;;  %5259 = vmatprep.mubr.bf16.mxu1 %v7493_v49  ;;  %v2258_v40 = vrot.slane %v2122_v53, 5  ;;  %v2261_v63 = vrot.slane %v2123_v5, 5  ;;  %v3051_v11 = vld [vmem:[#allocation2 + $0x34] sm:$0xf]  ;;  %v2124_v28 = vld [vmem:[#allocation2 + $0x78] sm:$0xe] }
  0xda   : > { %v6330_v35 = vcombine.low %v1907_v59, %v1917_v60  ;;  %v8485_v30 = vsel %vm8015_vm14, %v6401_v0, %v3153_v44  ;;  %v3155_v37 = vrot.slane %v3153_v44, 4  ;;  %v2609_v8 = vrot.slane %v2608_v6, 4  ;;  %v3052_v24 = vld [vmem:[#allocation2 + $0x38] sm:$0x1]  ;;  %v2125_v39 = vld [vmem:[#allocation2 + $0x7c] sm:$0xf] }
  0xdb   : > { %v2626_v46 = vshrl.u32 %v2535_v31, 16  ;;  %v2623_v18 = vrot.slane %v2621_v57, 5  ;;  %v2629_v12 = vshll.u32 %v2535_v31, 16  ;;  %v2635_v3 = vshll.u32 %v2536_v61, 16  ;;  %v2126_v53 = vld [vmem:[#allocation2 + $0x80] sm:$0x1] }
  0xdc   : > { %5114 = vmatprep.mubr.bf16.mxu0 %v6330_v35  ;;  %v8489_v19 = vsel %vm8015_vm14, %v3155_v37, %v3156_v47  ;;  %v6383_v17 = vcombine.low %v2590_v9, %v2600_v50  ;;  %v2619_v36 = vrot.slane %v2618_v34, 4  ;;  %v2259_v43 = vsel %vm8015_vm14, %v6344_v10, %v2258_v40  ;;  %v2538_v5 = vld [vmem:[#allocation2 + $0x30] sm:$0xf]  ;;  %v2540_v59 = vld [vmem:[#allocation2 + $0x38] sm:$0x1]  ;;  %v7496_v6 = vld [vmem:[%s9623_s5 + $0x208] sm:$0xff]  }
  0xdd   : > { %5115 = vmatmul.mubr.bf16.gmra.mrb[44].mxu0 %v7484_v4  ;;  %v2260_v41 = vrot.slane %v2258_v40, 4  ;;  %v2614_v45 = vsel %vm7760_vm11, %v2609_v8, %v8477_v51  ;;  %v6417_v13 = vcombine.low %v8485_v30, %v8489_v19  ;;  %v2628_v22 = vrot.slane %v2626_v46, 4  ;;  %v2539_v51 = vld [vmem:[#allocation2 + $0x34] sm:$0xf]  ;;  %v8516_v35 = vld [vmem:[#allocation2 + $0x3c] sm:$0xe] }
  0xde   : > { %5348 = vmatprep.mubr.bf16.mxu0 %v6415_v15  ;;  %v2631_v23 = vrot.slane %v2629_v12, 5  ;;  %v8508_v60 = vrot.slane %v2635_v3, 5  ;;  %v2639_v50 = vshrl.u32 %v2536_v61, 16  ;;  %v2645_v2 = vshll.u32 %v2537_v29, 16  ;;  %v3054_v40 = vld [vmem:[#allocation2 + $0x40] sm:$0xf] }
  0xdf   : > { %v2262_v9 = vsel %vm8015_vm14, %v2260_v41, %v2261_v63  ;;  %v6402_v15 = vrot.slane %v3050_v25, 9  ;;  %v3160_v49 = vrot.slane %v3051_v11, 5  ;;  %v2624_v31 = vsel %vm7760_vm11, %v2619_v36, %v2623_v18  ;;  %v3055_v63 = vld [vmem:[#allocation2 + $0x44] sm:$0x1]  ;;  %v2127_v46 = vld [vmem:[#allocation2 + $0x84] sm:$0xe] }
  0xe0   : > { %v6360_v62 = vcombine.low %v2259_v43, %v2262_v9  ;;  %v2632_v52 = vor.u32 %v2631_v23, %v2628_v22  ;;  %v2641_v54 = vrot.slane %v2639_v50, 4  ;;  %v2647_v33 = vrot.slane %v2645_v2, 5  ;;  %v7498_v3 = vld [vmem:[#allocation2 + $0x90] sm:$0xff]   ;;  %v2129_v27 = vld [vmem:[#allocation2 + $0x8c] sm:$0x1] }
  0xe1   : > { %v6345_v58 = vrot.slane %v2124_v28, 9  ;;  %v3162_v57 = vrot.slane %v3160_v49, 4  ;;  %v3163_v0 = vrot.slane %v3052_v24, 5  ;;  %v2265_v44 = vrot.slane %v2125_v39, 5  ;;  %v2128_v28 = vld [vmem:[#allocation2 + $0x88] sm:$0xf] }
  0xe2   : > { %5260 = vmatmul.mubr.bf16.gmra.mrb[52].mxu1 %v6360_v62  ;;  %v2633_v56 = vrot.slane %v2632_v52, 4  ;;  %v2642_v4 = vor.u32 %v2641_v54, %v8508_v60  ;;  %v2268_v47 = vrot.slane %v2126_v53, 5  ;;  %v2650_v10 = vshrl.u32 %v2538_v5, 16  ;;  %v7501_v24 = vld [vmem:[%s9623_s5 + $0x210] sm:$0xff]   ;;  %v2542_v50 = vld [vmem:[#allocation2 + $0x40] sm:$0xf] }
  0xe3   : > { %5267 = vmatprep.mubr.bf16.mxu1 %v7494_v32  ;;  %v2653_v61 = vshll.u32 %v2538_v5, 16  ;;  %v6384_v34 = vcombine.low %v2614_v45, %v2624_v31  ;;  %v8520_v37 = vsel %vm8015_vm14, %v6402_v15, %v3160_v49  ;;  %v2266_v29 = vsel %vm8015_vm14, %v6345_v58, %v2265_v44  ;;  %v2543_v15 = vld [vmem:[#allocation2 + $0x44] sm:$0x1]  ;;  %v7506_v54 = vld [vmem:[%s9623_s5 + $0x218] sm:$0xff]  }
  0xe4   : > { %v2267_v8 = vrot.slane %v2265_v44, 4  ;;  %v2638_v25 = vsel %vm7760_vm11, %v2633_v56, %v8508_v60  ;;  %v2643_v11 = vrot.slane %v2642_v4, 4  ;;  %v2652_v18 = vrot.slane %v2650_v10, 4 }
  0xe5   : > { %5349 = vmatmul.mubr.bf16.vlgmr.msra.gmra.mrb[48].mxu0 %v6383_v17  ;;  %v2655_v12 = vrot.slane %v2653_v61, 5  ;;  %v2659_v43 = vshll.u32 %v2539_v51, 16  ;;  %v2663_v17 = vshrl.u32 %v2539_v51, 16  ;;  %v2669_v41 = vshll.u32 %v2540_v59, 16 }
  0xe6   : > { %5356 = vmatprep.mubr.bf16.mxu0 %v6416_v55  ;;  %7321 = vmatpush3.bf16.msra.mxu0 %v8268_v14  ;;  %v2269_v36 = vsel %vm8015_vm14, %v2267_v8, %v2268_v47  ;;  %v2648_v45 = vsel %vm7760_vm11, %v2643_v11, %v2647_v33  ;;  %v8540_v22 = vsel %vm8015_vm14, %v3162_v57, %v3163_v0  ;;  %v2541_v55 = vld [vmem:[#allocation2 + $0x3c] sm:$0xf]  ;;  %v6403_v60 = vrot.slane %v8516_v35, 9  ;;  %v3056_v57 = vld [vmem:[#allocation2 + $0x48] sm:$0xe] }
  0xe7   : > { %7322 = vmatprep.subr.bf16.mxu0 %v7496_v6  ;;  %v6361_v1 = vcombine.low %v2266_v29, %v2269_v36  ;;  %v2656_v14 = vor.u32 %v2655_v12, %v2652_v18  ;;  %v8542_v23 = vrot.slane %v2659_v43, 5  ;;  %v2665_v39 = vrot.slane %v2663_v17, 4  ;;  %v3057_v0 = vld [vmem:[#allocation2 + $0x4c] sm:$0xf]  ;;  %v3058_v29 = vld [vmem:[#allocation2 + $0x50] sm:$0x1] }
  0xe8   : > { %v8544_v9 = vrot.slane %v2669_v41, 5  ;;  %v3167_v32 = vrot.slane %v3054_v40, 5  ;;  %v3170_v62 = vrot.slane %v3055_v63, 5  ;;  %v6346_v52 = vrot.slane %v2127_v46, 9  ;;  %v7499_v46 = vld [vmem:[#allocation2 + $0x9c] sm:$0xff]  }
  0xe9   : > { %v8547_v2 = vrot.slane %v2656_v14, 4  ;;  %v2666_v49 = vor.u32 %v2665_v39, %v8542_v23  ;;  %v2272_v53 = vrot.slane %v2128_v28, 5  ;;  %v2275_v5 = vrot.slane %v2129_v27, 5  ;;  %v2131_v11 = vld [vmem:[#allocation2 + $0x94] sm:$0xf]  ;;  %v7509_v28 = vld [vmem:[%s9623_s5 + $0x220] sm:$0xff]  }
  0xea   : > { %5268 = vmatmul.mubr.bf16.gmra.mrb[56].mxu1 %v6361_v1  ;;  %7323 = vmatpush3.bf16.msra.mxu0 %v7496_v6  ;;  %v2674_v31 = vshrl.u32 %v2541_v55, 16  ;;  %v8553_v33 = vcombine.low %v2638_v25, %v2648_v45  ;;  %v6418_v58 = vcombine.low %v8520_v37, %v8540_v22  ;;  %v3169_v51 = vrot.slane %v3167_v32, 4  ;;  %v2130_v25 = vld [vmem:[#allocation2 + $0x90] sm:$0xe]  ;;  %v2132_v12 = vld [vmem:[#allocation2 + $0x98] sm:$0x1] }
  0xeb   : > { %5275 = vmatprep.mubr.bf16.mxu1 %v7498_v3  ;;  %v2677_v56 = vshll.u32 %v2541_v55, 16  ;;  %7324 = vmatprep.subr.bf16.mxu0 %v7501_v24  ;;  %v2667_v44 = vrot.slane %v2666_v49, 4  ;;  %v2273_v59 = vsel %vm8015_vm14, %v6346_v52, %v2272_v53  ;;  %v2274_v4 = vrot.slane %v2272_v53, 4  ;;  %v2544_v3 = vld [vmem:[#allocation2 + $0x48] sm:$0xf]  ;;  %v7515_v37 = vld [vmem:[%s9623_s5 + $0x230] sm:$0xff]  }
  0xec   : > { %v2676_v6 = vrot.slane %v2674_v31, 4  ;;  %v2662_v47 = vsel %vm7760_vm11, %v8547_v2, %v8542_v23  ;;  %v2683_v61 = vshll.u32 %v2542_v50, 16  ;;  %v2687_v35 = vshrl.u32 %v2542_v50, 16  ;;  %v7512_v55 = vld [vmem:[%s9623_s5 + $0x228] sm:$0xff]   ;;  %v2546_v50 = vld [vmem:[#allocation2 + $0x50] sm:$0x1] }
  0xed   : > { %5357 = vmatmul.mubr.bf16.gmra.mrb[52].mxu0 %v6384_v34  ;;  %v2679_v10 = vrot.slane %v2677_v56, 5  ;;  %v8568_v8 = vsel %vm8015_vm14, %v6403_v60, %v3167_v32  ;;  %v8572_v34 = vsel %vm8015_vm14, %v3169_v51, %v3170_v62  ;;  %v2276_v40 = vsel %vm8015_vm14, %v2274_v4, %v2275_v5  ;;  %v2133_v4 = vld [vmem:[#allocation2 + $0x9c] sm:$0xe] }
  0xee   : > { %5364 = vmatprep.mubr.bf16.mxu0 %v6417_v13  ;;  %v2693_v63 = vshll.u32 %v2543_v15, 16  ;;  %7325 = vmatpush3.bf16.msra.mxu0 %v7501_v24  ;;  %v2672_v30 = vsel %vm7760_vm11, %v2667_v44, %v8544_v9  ;;  %v6362_v19 = vcombine.low %v2273_v59, %v2276_v40  ;;  %v8579_v18 = vrot.slane %v2683_v61, 5  ;;  %v2545_v24 = vld [vmem:[#allocation2 + $0x4c] sm:$0xf]  ;;  %v3059_v15 = vld [vmem:[#allocation2 + $0x54] sm:$0xe] }
  0xef   : > { %v2680_v13 = vor.u32 %v2679_v10, %v2676_v6  ;;  %7326 = vmatprep.subr.bf16.mxu0 %v7506_v54  ;;  %v2689_v36 = vrot.slane %v2687_v35, 4  ;;  %v6404_v17 = vrot.slane %v3056_v57, 9  ;;  %v3174_v41 = vrot.slane %v3057_v0, 5  ;;  %v7503_v44 = vld [vmem:[#allocation2 + $0xa8] sm:$0xff]   ;;  %v3061_v59 = vld [vmem:[#allocation2 + $0x5c] sm:$0x1] }
  0xf0   : > { %v8584_v43 = vrot.slane %v2693_v63, 5  ;;  %v3177_v1 = vrot.slane %v3058_v29, 5  ;;  %v6347_v14 = vrot.slane %v2130_v25, 9  ;;  %v2279_v27 = vrot.slane %v2131_v11, 5  ;;  %v2134_v61 = vld [vmem:[#allocation2 + $0xa0] sm:$0xf] }
  0xf1   : > { %v8586_v45 = vrot.slane %v2680_v13, 4  ;;  %v6419_v23 = vcombine.low %v8568_v8, %v8572_v34  ;;  %v2690_v39 = vor.u32 %v2689_v36, %v8579_v18  ;;  %v3176_v9 = vrot.slane %v3174_v41, 4  ;;  %v2135_v35 = vld [vmem:[#allocation2 + $0xa4] sm:$0x1]  ;;  %v2547_v25 = vld [vmem:[#allocation2 + $0x54] sm:$0xf] }
  0xf2   : > { %5276 = vmatmul.mubr.bf16.gmra.mrb[60].mxu1 %v6362_v19  ;;  %v2282_v60 = vrot.slane %v2132_v12, 5  ;;  %7327 = vmatpush3.bf16.msra.mxu0 %v7506_v54  ;;  %v8596_v2 = vsel %vm8015_vm14, %v6404_v17, %v3174_v41  ;;  %v2280_v32 = vsel %vm8015_vm14, %v6347_v14, %v2279_v27  ;;  %v2281_v62 = vrot.slane %v2279_v27, 4  ;;  %v3060_v54 = vld [vmem:[#allocation2 + $0x58] sm:$0xf]  ;;  %v2549_v41 = vld [vmem:[#allocation2 + $0x5c] sm:$0x1] }
  0xf3   : > { %5283 = vmatprep.mubr.bf16.mxu1 %v7499_v46  ;;  %v2698_v52 = vshrl.u32 %v2544_v3, 16  ;;  %7328 = vmatprep.subr.bf16.mxu0 %v7509_v28  ;;  %v8600_v49 = vrot.slane %v2690_v39, 4  ;;  %v8604_v53 = vsel %vm8015_vm14, %v3176_v9, %v3177_v1  ;;  %v2701_v5 = vshll.u32 %v2544_v3, 16  ;;  %v2548_v3 = vld [vmem:[#allocation2 + $0x58] sm:$0xf] }
  0xf4   : > { %v2707_v31 = vshll.u32 %v2545_v24, 16  ;;  %v6386_v51 = vcombine.low %v2662_v47, %v2672_v30  ;;  %v2283_v56 = vsel %vm8015_vm14, %v2281_v62, %v2282_v60  ;;  %v2711_v0 = vshrl.u32 %v2545_v24, 16  ;;  %v7518_v39 = vld [vmem:[%s9623_s5 + $0x238] sm:$0xff]   ;;  %v2136_v8 = vld [vmem:[#allocation2 + $0xa8] sm:$0xe] }
  0xf5   : > { %5365 = vmatmul.mubr.bf16.gmra.mrb[56].mxu0 %v8553_v33  ;;  %v2700_v57 = vrot.slane %v2698_v52, 4  ;;  %v2686_v6 = vsel %vm7760_vm11, %v8586_v45, %v8579_v18  ;;  %v6363_v10 = vcombine.low %v2280_v32, %v2283_v56  ;;  %v2703_v33 = vrot.slane %v2701_v5, 5  ;;  %v3063_v32 = vld [vmem:[#allocation2 + $0x64] sm:$0xf]  ;;  %v3064_v5 = vld [vmem:[#allocation2 + $0x68] sm:$0x1] }
  0xf6   : > { %5372 = vmatprep.mubr.bf16.mxu0 %v6418_v58  ;;  %v2709_v47 = vrot.slane %v2707_v31, 5  ;;  %7329 = vmatpush3.bf16.msra.mxu0 %v7509_v28  ;;  %v6420_v29 = vcombine.low %v8596_v2, %v8604_v53  ;;  %v2713_v40 = vrot.slane %v2711_v0, 4  ;;  %v2717_v63 = vshll.u32 %v2546_v50, 16  ;;  %v3062_v50 = vld [vmem:[#allocation2 + $0x60] sm:$0xe] }
  0xf7   : > { %v6405_v46 = vrot.slane %v3059_v15, 9  ;;  %7330 = vmatprep.subr.bf16.mxu0 %v7512_v55  ;;  %v2704_v22 = vor.u32 %v2703_v33, %v2700_v57  ;;  %v3181_v58 = vrot.slane %v3060_v54, 5  ;;  %v3184_v11 = vrot.slane %v3061_v59, 5  ;;  %v2137_v34 = vld [vmem:[#allocation2 + $0xac] sm:$0xf] }
  0xf8   : > { %v6348_v30 = vrot.slane %v2133_v4, 9  ;;  %v2714_v19 = vor.u32 %v2713_v40, %v2709_v47  ;;  %v2719_v13 = vrot.slane %v2717_v63, 5  ;;  %v2286_v18 = vrot.slane %v2134_v61, 5  ;;  %v2138_v63 = vld [vmem:[#allocation2 + $0xb0] sm:$0x1] }
  0xf9   : > { %v2289_v12 = vrot.slane %v2135_v35, 5  ;;  %v2696_v28 = vsel %vm7760_vm11, %v8600_v49, %v8584_v43  ;;  %v2705_v36 = vrot.slane %v2704_v22, 4  ;;  %v3183_v17 = vrot.slane %v3181_v58, 4 }
  0xfa   : > { %5284 = vmatmul.mubr.bf16.gmra.mrb[64].mxu1 %v6363_v10  ;;  %v2722_v24 = vshrl.u32 %v2547_v25, 16  ;;  %7331 = vmatpush3.bf16.msra.mxu0 %v7512_v55  ;;  %v2715_v45 = vrot.slane %v2714_v19, 4  ;;  %v2287_v1 = vsel %vm8015_vm14, %v6348_v30, %v2286_v18  ;;  %v2288_v14 = vrot.slane %v2286_v18, 4  ;;  %v2551_v19 = vld [vmem:[#allocation2 + $0x64] sm:$0xf] }
  0xfb   : > { %5291 = vmatprep.mubr.bf16.mxu1 %v7503_v44  ;;  %v2725_v27 = vshll.u32 %v2547_v25, 16  ;;  %7332 = vmatprep.subr.bf16.mxu0 %v7515_v37  ;;  %v2710_v43 = vsel %vm7760_vm11, %v2705_v36, %v2709_v47  ;;  %v8634_v9 = vsel %vm8015_vm14, %v6405_v46, %v3181_v58  ;;  %v2731_v60 = vshll.u32 %v2548_v3, 16  ;;  %v7504_v44 = vld [vmem:[#allocation2 + $0xb4] sm:$0xff]   ;;  %v2550_v58 = vld [vmem:[#allocation2 + $0x60] sm:$0xf] }
  0xfc   : > { %v2724_v55 = vrot.slane %v2722_v24, 4  ;;  %v2720_v62 = vsel %vm7760_vm11, %v2715_v45, %v2719_v13  ;;  %v8640_v52 = vsel %vm8015_vm14, %v3183_v17, %v3184_v11  ;;  %v2290_v15 = vsel %vm8015_vm14, %v2288_v14, %v2289_v12  ;;  %v2552_v13 = vld [vmem:[#allocation2 + $0x68] sm:$0x1] }
  0xfd   : > { %5373 = vmatmul.mubr.bf16.gmra.mrb[60].mxu0 %v6386_v51  ;;  %v2727_v49 = vrot.slane %v2725_v27, 5  ;;  %v6387_v31 = vcombine.low %v2686_v6, %v2696_v28  ;;  %v6364_v54 = vcombine.low %v2287_v1, %v2290_v15  ;;  %v2733_v56 = vrot.slane %v2731_v60, 5  ;;  %v3066_v60 = vld [vmem:[#allocation2 + $0x70] sm:$0xf] }
  0xfe   : > { %5380 = vmatprep.mubr.bf16.mxu0 %v6419_v23  ;;  %v2735_v51 = vshrl.u32 %v2548_v3, 16  ;;  %7333 = vmatpush3.bf16.msra.mxu0 %v7515_v37  ;;  %v2741_v0 = vshll.u32 %v2549_v41, 16  ;;  %v6406_v59 = vrot.slane %v3062_v50, 9  ;;  %v3188_v4 = vrot.slane %v3063_v32, 5 }
  0xff   : > { %v2728_v57 = vor.u32 %v2727_v49, %v2724_v55  ;;  %7334 = vmatprep.subr.bf16.mxu0 %v7518_v39  ;;  %v8647_v10 = vcombine.low %v2710_v43, %v2720_v62  ;;  %v6421_v33 = vcombine.low %v8634_v9, %v8640_v52  ;;  %v3191_v61 = vrot.slane %v3064_v5, 5  ;;  %v3065_v55 = vld [vmem:[#allocation2 + $0x6c] sm:$0xe]  ;;  %v3067_v49 = vld [vmem:[#allocation2 + $0x74] sm:$0x1] }
 0x100   : > { %v2737_v47 = vrot.slane %v2735_v51, 4  ;;  %v2743_v6 = vrot.slane %v2741_v0, 5  ;;  %v8653_v35 = vsel %vm8015_vm14, %v6406_v59, %v3188_v4  ;;  %v3190_v40 = vrot.slane %v3188_v4, 4  ;;  %v3069_v52 = vld [vmem:[#allocation2 + $0x7c] sm:$0xf] }
 0x101   : > { %v2729_v23 = vrot.slane %v2728_v57, 4  ;;  %v6349_v25 = vrot.slane %v2136_v8, 9  ;;  %v2293_v37 = vrot.slane %v2137_v34, 5  ;;  %v2296_v22 = vrot.slane %v2138_v63, 5  ;;  %v2141_v8 = vld [vmem:[#allocation2 + $0xbc] sm:$0x1] }
 0x102   : > { %5292 = vmatmul.mubr.bf16.gmra.mrb[68].mxu1 %v6364_v54  ;;  %v2738_v46 = vor.u32 %v2737_v47, %v2733_v56  ;;  %7335 = vmatpush3.bf16.msra.mxu0 %v7518_v39  ;;  %v8659_v30 = vsel %vm8015_vm14, %v3190_v40, %v3191_v61  ;;  %v2746_v18 = vshrl.u32 %v2550_v58, 16  ;;  %v2749_v12 = vshll.u32 %v2550_v58, 16  ;;  %v2139_v54 = vld [vmem:[#allocation2 + $0xb4] sm:$0xe]  ;;  %v2553_v34 = vld [vmem:[#allocation2 + $0x6c] sm:$0xf] }
 0x103   : > { %v2734_v11 = vsel %vm7760_vm11, %v2729_v23, %v2733_v56  ;;  %5299 = vmatprep.mubr.bf16.mxu1 %v7504_v44  ;;  %v6422_v28 = vcombine.low %v8653_v35, %v8659_v30  ;;  %v2294_v36 = vsel %vm8015_vm14, %v6349_v25, %v2293_v37  ;;  %v2295_v17 = vrot.slane %v2293_v37, 4  ;;  %v2140_v44 = vld [vmem:[#allocation2 + $0xb8] sm:$0xf] }
 0x104   : > { %v2739_v3 = vrot.slane %v2738_v46, 4  ;;  %v2748_v41 = vrot.slane %v2746_v18, 4  ;;  %v2751_v24 = vrot.slane %v2749_v12, 5  ;;  %v2755_v45 = vshll.u32 %v2551_v19, 16 }
 0x105   : > { %5381 = vmatmul.mubr.bf16.gmra.mrb[64].mxu0 %v6387_v31  ;;  %v2759_v1 = vshrl.u32 %v2551_v19, 16  ;;  %v2297_v27 = vsel %vm8015_vm14, %v2295_v17, %v2296_v22  ;;  %v2765_v39 = vshll.u32 %v2552_v13, 16  ;;  %v639_v43 = vmax.f32 %v8459_v7, 0.0  ;;  %v1171_v22 = vld [vmem:[#allocation2 + $0xc0] sm:$0xf] }
 0x106   : > { %5388 = vmatprep.mubr.bf16.mxu0 %v6420_v29  ;;  %v2744_v14 = vsel %vm7760_vm11, %v2739_v3, %v2743_v6  ;;  %v6365_v32 = vcombine.low %v2294_v36, %v2297_v27  ;;  %v2752_v62 = vor.u32 %v2751_v24, %v2748_v41  ;;  %v2757_v15 = vrot.slane %v2755_v45, 5  ;;  %v2554_v13 = vld [vmem:[#allocation2 + $0x70] sm:$0xf]  ;;  %v2555_v41 = vld [vmem:[#allocation2 + $0x74] sm:$0x1] }
 0x107   : > { %v8673_v50 = vcombine.low %v2734_v11, %v2744_v14  ;;  %v2761_v2 = vrot.slane %v2759_v1, 4  ;;  %v2767_v53 = vrot.slane %v2765_v39, 5  ;;  %v640_v29 = vmax.f32 %v8463_v26, 0.0  ;;  %v3068_v24 = vld [vmem:[#allocation2 + $0x78] sm:$0xe] }
 0x108   : > { %v6636_v31 = vpack.c.bf16 %v639_v43, %v639_v43  ;;  %v2753_v51 = vrot.slane %v2752_v62, 4  ;;  %v6407_v7 = vrot.slane %v3065_v55, 9  ;;  %v3195_v57 = vrot.slane %v3066_v60, 5  ;;  %v3070_v60 = vld [vmem:[#allocation2 + $0x80] sm:$0x1] }
 0x109   : > { %v8675_v5 = vpop.f32.mrb[0].mxu0  ;;  %v3198_v0 = vrot.slane %v3067_v49, 5  ;;  %v2762_v59 = vor.u32 %v2761_v2, %v2757_v15  ;;  %v6637_v4 = vpack.c.bf16 %v640_v29, %v640_v29  ;;  %v6350_v40 = vrot.slane %v2139_v54, 9  ;;  %v3474_v2 = vld [vmem:[#allocation2 + $0x18] sm:$0xf] }
 0x10a   : > { %v8678_v56 = vpop.f32.mrb[1].mxu0  ;;  %5300 = vmatmul.mubr.bf16.gmra.mrb[72].mxu1 %v6365_v32  ;;  %v996_v47 = vshrl.u32 %v6636_v31, 16  ;;  %v999_v61 = vshll.u32 %v6636_v31, 16  ;;  %v2758_v23 = vsel %vm7760_vm11, %v2753_v51, %v2757_v15  ;;  %v8684_v26 = vsel %vm8015_vm14, %v6407_v7, %v3195_v57  ;;  %v3475_v51 = vld [vmem:[#allocation2 + $0x1c] sm:$0xf] }
 0x10b   : > { %v3197_v6 = vrot.slane %v3195_v57, 4  ;;  %v2763_v63 = vrot.slane %v2762_v59, 4  ;;  %v1004_v25 = vshrl.u32 %v6637_v4, 16  ;;  %v1007_v37 = vshll.u32 %v6637_v4, 16  ;;  %v8691_v12 = vpop.f32.mrb[2].mxu0 }
 0x10c   : > { %v998_v46 = vrot.slane %v996_v47, 7  ;;  %v2300_v11 = vrot.slane %v2140_v44, 5  ;;  %v2303_v19 = vrot.slane %v2141_v8, 5  ;;  %v2770_v18 = vshrl.u32 %v2553_v34, 16  ;;  %v3476_v47 = vld [vmem:[#allocation2 + $0x20] sm:$0x1] }
 0x10d   : > { %5389 = vmatmul.mubr.bf16.gmra.mrb[68].mxu0 %v8647_v10  ;;  %v8689_v58 = vsel %vm8015_vm14, %v3197_v6, %v3198_v0  ;;  %v2768_v3 = vsel %vm7760_vm11, %v2763_v63, %v2767_v53  ;;  %v8698_v10 = vrot.slane %v1004_v25, 7  ;;  %v2773_v62 = vshll.u32 %v2553_v34, 16 }
 0x10e   : > { %5396 = vmatprep.mubr.bf16.mxu0 %v6421_v33  ;;  %v1001_v36 = vor.u32 %v999_v61, %v998_v46  ;;  %v1002_v17 = vrot.slane %v998_v46, 4  ;;  %v8700_v45 = vcombine.low %v2758_v23, %v2768_v3  ;;  %v6423_v1 = vcombine.low %v8684_v26, %v8689_v58  ;;  %v8708_v33 = vpop.f32.mrb[3].mxu0 }
 0x10f   : > { %v8706_v14 = vsel %vm8015_vm14, %v6350_v40, %v2300_v11  ;;  %v2302_v9 = vrot.slane %v2300_v11, 4  ;;  %v1009_v27 = vor.u32 %v1007_v37, %v8698_v10  ;;  %v2772_v55 = vrot.slane %v2770_v18, 4  ;;  %v2556_v40 = vld [vmem:[#allocation2 + $0x78] sm:$0xf]  ;;  %v2558_v18 = vld [vmem:[#allocation2 + $0x80] sm:$0x1] }
 0x110   : > { %v1172_v43 = vsel %vm7715_vm6, %v1001_v36, %v1171_v22  ;;  %v2779_v15 = vshll.u32 %v2554_v13, 16  ;;  %v2783_v49 = vshrl.u32 %v2554_v13, 16  ;;  %v2789_v31 = vshll.u32 %v2555_v41, 16  ;;  %v2557_v22 = vld [vmem:[#allocation2 + $0x7c] sm:$0xf] }
 0x111   : > { %1173 = vst [vmem:[#allocation2 + $0xc0] sm:$0xf] %v1172_v43  ;;  %v8716_v32 = vsel %vm8015_vm14, %v2302_v9, %v2303_v19  ;;  %v1010_v53 = vsel %vm7740_vm10, %v1002_v17, %v1009_v27  ;;  %v6408_v54 = vrot.slane %v3068_v24, 9  ;;  %v2775_v7 = vrot.slane %v2773_v62, 5  ;;  %v3072_v27 = vld [vmem:[#allocation2 + $0x88] sm:$0xf] }
 0x112   : > { %v6366_v29 = vcombine.low %v8706_v14, %v8716_v32  ;;  %1174 = vst [vmem:[#allocation2 + $0xc4] sm:$0xf] %v1010_v53  ;;  %v2781_v57 = vrot.slane %v2779_v15, 5  ;;  %v2785_v0 = vrot.slane %v2783_v49, 4  ;;  %v3202_v44 = vrot.slane %v3069_v52, 5 }
 0x113   : > { %v2791_v59 = vrot.slane %v2789_v31, 5  ;;  %v3205_v4 = vrot.slane %v3070_v60, 5  ;;  %v3523_v61 = vshrl.u32 %v3474_v2, 16  ;;  %v3526_v8 = vshll.u32 %v3474_v2, 16  ;;  %v3073_v43 = vld [vmem:[#allocation2 + $0x8c] sm:$0x1] }
 0x114   : > { %v2776_v21 = vor.u32 %v2775_v7, %v2772_v55  ;;  %v2786_v34 = vor.u32 %v2785_v0, %v2781_v57  ;;  %v8725_v23 = vsel %vm8015_vm14, %v6408_v54, %v3202_v44  ;;  %v3204_v6 = vrot.slane %v3202_v44, 4  ;;  %v3477_v49 = vld [vmem:[#allocation2 + $0x24] sm:$0xf] }
 0x115   : > { %5397 = vmatmul.mubr.bf16.gmra.mrb[72].mxu0 %v8673_v50  ;;  %v3525_v63 = vrot.slane %v3523_v61, 4  ;;  %v3528_v46 = vrot.slane %v3526_v8, 5  ;;  %v3532_v25 = vshll.u32 %v3475_v51, 16  ;;  %v3536_v37 = vshrl.u32 %v3475_v51, 16  ;;  %v3478_v8 = vld [vmem:[#allocation2 + $0x28] sm:$0xf] }
 0x116   : > { %5404 = vmatprep.mubr.bf16.mxu0 %v6422_v28  ;;  %v2777_v11 = vrot.slane %v2776_v21, 4  ;;  %v2787_v19 = vrot.slane %v2786_v34, 4  ;;  %v8732_v50 = vsel %vm8015_vm14, %v3204_v6, %v3205_v4  ;;  %v3542_v13 = vshll.u32 %v3476_v47, 16  ;;  %v3071_v28 = vld [vmem:[#allocation2 + $0x84] sm:$0xe] }
 0x117   : > { %v6424_v36 = vcombine.low %v8725_v23, %v8732_v50  ;;  %v3529_v17 = vor.u32 %v3528_v46, %v3525_v63  ;;  %v3534_v35 = vrot.slane %v3532_v25, 5  ;;  %v3538_v30 = vrot.slane %v3536_v37, 4  ;;  %v3479_v37 = vld [vmem:[#allocation2 + $0x2c] sm:$0x1] }
 0x118   : > { %v1226_v3 = vld [vmem:[#allocation2 + $0xc0] sm:$0x1]  ;;  %v2782_v24 = vsel %vm7760_vm11, %v2777_v11, %v2781_v57  ;;  %v2792_v9 = vsel %vm7760_vm11, %v2787_v19, %v2791_v59  ;;  %v3544_v52 = vrot.slane %v3542_v13, 5  ;;  %v2794_v15 = vshrl.u32 %v2556_v40, 16  ;;  %v2559_v11 = vld [vmem:[#allocation2 + $0x84] sm:$0xf] }
 0x119   : > { %v1227_v41 = vsel %vm7668_vm3, 0, %v1226_v3  ;;  %v8742_v55 = vcombine.low %v2782_v24, %v2792_v9  ;;  %v3530_v60 = vrot.slane %v3529_v17, 4  ;;  %v3539_v62 = vor.u32 %v3538_v30, %v3534_v35  ;;  %v3087_v39 = vld [vmem:[#allocation2 + $0xc4] sm:$0xf] }
 0x11a   : > { %1228 = vst [vmem:[#allocation2 + $0xc0] sm:$0x1] %v1227_v41  ;;  %v2797_v2 = vshll.u32 %v2556_v40, 16  ;;  %v2803_v53 = vshll.u32 %v2557_v22, 16  ;;  %v2807_v31 = vshrl.u32 %v2557_v22, 16  ;;  %v2813_v54 = vshll.u32 %v2558_v18, 16 }
 0x11b   : > { %v3535_v51 = vsel %vm7760_vm11, %v3530_v60, %v3534_v35  ;;  %v3540_v7 = vrot.slane %v3539_v62, 4  ;;  %v2796_v57 = vrot.slane %v2794_v15, 4  ;;  %v6409_v0 = vrot.slane %v3071_v28, 9  ;;  %v8746_v44 = vpop.f32.mrb[0].mxu1  ;;  %v2560_v18 = vld [vmem:[#allocation2 + $0x88] sm:$0xf] }
 0x11c   : > { %v2799_v59 = vrot.slane %v2797_v2, 5  ;;  %v2805_v4 = vrot.slane %v2803_v53, 5  ;;  %v2809_v47 = vrot.slane %v2807_v31, 4  ;;  %v2815_v61 = vrot.slane %v2813_v54, 5  ;;  %v8754_v63 = vpop.f32.mrb[1].mxu1  ;;  %v8772_v62 = vpop.f32.mrb[4].mxu0 }
 0x11d   : > { %5405 = vmatmul.mubr.bf16.gmra.mrb[76].mxu0 %v8700_v45  ;;  %v3545_v21 = vsel %vm7760_vm11, %v3540_v7, %v3544_v52  ;;  %v3209_v34 = vrot.slane %v3072_v27, 5  ;;  %v3212_v6 = vrot.slane %v3073_v43, 5  ;;  %v3547_v40 = vshrl.u32 %v3477_v49, 16  ;;  %v8756_v19 = vpop.f32.mrb[2].mxu1  ;;  %v2561_v41 = vld [vmem:[#allocation2 + $0x8c] sm:$0x1] }
 0x11e   : > { %5412 = vmatprep.mubr.bf16.mxu0 %v6423_v1  ;;  %v6447_v46 = vcombine.low %v3535_v51, %v3545_v21  ;;  %v2800_v25 = vor.u32 %v2799_v59, %v2796_v57  ;;  %v2810_v45 = vor.u32 %v2809_v47, %v2805_v4  ;;  %v3550_v22 = vshll.u32 %v3477_v49, 16  ;;  %v8762_v3 = vpop.f32.mrb[3].mxu1  ;;  %v3074_v60 = vld [vmem:[#allocation2 + $0x90] sm:$0xe]  ;;  %v3075_v2 = vld [vmem:[#allocation2 + $0x94] sm:$0xf] }
 0x11f   : > { %v8760_v26 = vsel %vm8015_vm14, %v6409_v0, %v3209_v34  ;;  %v3211_v58 = vrot.slane %v3209_v34, 4  ;;  %v3549_v1 = vrot.slane %v3547_v40, 4  ;;  %v3556_v13 = vshll.u32 %v3478_v8, 16  ;;  %v3076_v53 = vld [vmem:[#allocation2 + $0x98] sm:$0x1]  ;;  %v8783_v0 = vpop.f32.mrb[5].mxu0 }
 0x120   : > { %v2801_v35 = vrot.slane %v2800_v25, 4  ;;  %v2811_v30 = vrot.slane %v2810_v45, 4  ;;  %v3552_v28 = vrot.slane %v3550_v22, 5  ;;  %v8766_v24 = vadd.f32 %v8678_v56, %v8675_v5  ;;  %v3480_v57 = vld [vmem:[#allocation2 + $0x30] sm:$0xf]  ;;  %v8789_v34 = vpop.f32.mrb[6].mxu0 }
 0x121   : > { %v7508_v17 = vld [vmem:[#allocation2 + $0xc0] sm:$0xff]   ;;  %v8770_v9 = vsel %vm8015_vm14, %v3211_v58, %v3212_v6  ;;  %v3558_v52 = vrot.slane %v3556_v13, 5  ;;  %v3560_v27 = vshrl.u32 %v3478_v8, 16  ;;  %v3566_v43 = vshll.u32 %v3479_v37, 16  ;;  %v3481_v8 = vld [vmem:[#allocation2 + $0x34] sm:$0xf] }
 0x122   : > { %5307 = vmatprep.mubr.bf16.mxu1 %v7508_v17  ;;  %v2806_v15 = vsel %vm7760_vm11, %v2801_v35, %v2805_v4  ;;  %v2816_v49 = vsel %vm7760_vm11, %v2811_v30, %v2815_v61  ;;  %v6425_v5 = vcombine.low %v8760_v26, %v8770_v9  ;;  %v3553_v56 = vor.u32 %v3552_v28, %v3549_v1  ;;  %v8793_v25 = vpop.f32.mrb[7].mxu0  ;;  %v7510_v45 = vld [vmem:[#allocation2 + $0x18] sm:$0xff]   ;;  %v2562_v28 = vld [vmem:[#allocation2 + $0x90] sm:$0xf] }
 0x123   : > { %5308 = vmatmul.mubr.bf16.gmra.mrb[76].mxu1 %v6366_v29  ;;  %v6392_v31 = vcombine.low %v2806_v15, %v2816_v49  ;;  %v3562_v54 = vrot.slane %v3560_v27, 4  ;;  %v3568_v51 = vrot.slane %v3566_v43, 5  ;;  %v2818_v7 = vshrl.u32 %v2559_v11, 16  ;;  %v3482_v35 = vld [vmem:[#allocation2 + $0x38] sm:$0x1] }
 0x124   : > { %5509 = vmatprep.mubr.bf16.mxu1 %v6447_v46  ;;  %v3554_v59 = vrot.slane %v3553_v56, 4  ;;  %v2821_v4 = vshll.u32 %v2559_v11, 16  ;;  %v2827_v47 = vshll.u32 %v2560_v18, 16  ;;  %v2831_v61 = vshrl.u32 %v2560_v18, 16  ;;  %v8801_v15 = vpop.f32.mrb[8].mxu0 }
 0x125   : > { %5413 = vmatmul.mubr.bf16.gmra.mrb[80].mxu0 %v8742_v55  ;;  %v3563_v14 = vor.u32 %v3562_v54, %v3558_v52  ;;  %v2820_v32 = vrot.slane %v2818_v7, 4  ;;  %v2837_v29 = vshll.u32 %v2561_v41, 16  ;;  %v6410_v21 = vrot.slane %v3074_v60, 9  ;;  %v2563_v60 = vld [vmem:[#allocation2 + $0x94] sm:$0xf] }
 0x126   : > { %5420 = vmatprep.mubr.bf16.mxu0 %v6424_v36  ;;  %v3559_v6 = vsel %vm7760_vm11, %v3554_v59, %v3558_v52  ;;  %v2823_v55 = vrot.slane %v2821_v4, 5  ;;  %v2829_v40 = vrot.slane %v2827_v47, 5  ;;  %v2833_v46 = vrot.slane %v2831_v61, 4  ;;  %v2564_v54 = vld [vmem:[#allocation2 + $0x98] sm:$0x1] }
 0x127   : > { %v3564_v37 = vrot.slane %v3563_v14, 4  ;;  %v2839_v22 = vrot.slane %v2837_v29, 5  ;;  %v3216_v11 = vrot.slane %v3075_v2, 5  ;;  %v3219_v23 = vrot.slane %v3076_v53, 5  ;;  %v3077_v47 = vld [vmem:[#allocation2 + $0x9c] sm:$0xe] }
 0x128   : > { %v2824_v50 = vor.u32 %v2823_v55, %v2820_v32  ;;  %v2834_v36 = vor.u32 %v2833_v46, %v2829_v40  ;;  %v3571_v58 = vshrl.u32 %v3480_v57, 16  ;;  %v3574_v1 = vshll.u32 %v3480_v57, 16  ;;  %v3078_v61 = vld [vmem:[#allocation2 + $0xa0] sm:$0xf] }
 0x129   : > { %v3569_v13 = vsel %vm7760_vm11, %v3564_v37, %v3568_v51  ;;  %v8799_v18 = vsel %vm8015_vm14, %v6410_v21, %v3216_v11  ;;  %v3218_v17 = vrot.slane %v3216_v11, 4  ;;  %v3580_v30 = vshll.u32 %v3481_v8, 16  ;;  %v8805_v51 = vpop.f32.mrb[9].mxu0 }
 0x12a   : > { %v6448_v41 = vcombine.low %v3559_v6, %v3569_v13  ;;  %v2825_v52 = vrot.slane %v2824_v50, 4  ;;  %v2835_v27 = vrot.slane %v2834_v36, 4  ;;  %v3573_v43 = vrot.slane %v3571_v58, 4  ;;  %v3483_v50 = vld [vmem:[#allocation2 + $0x3c] sm:$0xf] }
 0x12b   : > { %5510 = vmatmul.mubr.bf16.vlgmr.msra.gmra.mrb[80].mxu1 %v7510_v45  ;;  %v3220_v49 = vsel %vm8015_vm14, %v3218_v17, %v3219_v23  ;;  %v3576_v56 = vrot.slane %v3574_v1, 5  ;;  %v3582_v2 = vrot.slane %v3580_v30, 5  ;;  %v3584_v53 = vshrl.u32 %v3481_v8, 16  ;;  %v3079_v45 = vld [vmem:[#allocation2 + $0xa4] sm:$0x1] }
 0x12c   : > { %5517 = vmatprep.mubr.bf16.mxu1 %v6448_v41  ;;  %v2830_v7 = vsel %vm7760_vm11, %v2825_v52, %v2829_v40  ;;  %v2840_v57 = vsel %vm7760_vm11, %v2835_v27, %v2839_v22  ;;  %v6426_v59 = vcombine.low %v8799_v18, %v3220_v49  ;;  %v3590_v4 = vshll.u32 %v3482_v35, 16  ;;  %v3484_v52 = vld [vmem:[#allocation2 + $0x40] sm:$0xf]  ;;  %v3485_v27 = vld [vmem:[#allocation2 + $0x44] sm:$0x1] }
 0x12d   : > { %5421 = vmatmul.mubr.bf16.gmra.mrb[84].mxu0 %v6392_v31  ;;  %v8812_v14 = vpop.f32.mrb[4].mxu1  ;;  %v6393_v8 = vcombine.low %v2830_v7, %v2840_v57  ;;  %v7511_v31 = vld [vmem:[#allocation2 + $0x24] sm:$0xff]   ;;  %v3577_v32 = vor.u32 %v3576_v56, %v3573_v43  ;;  %v3586_v29 = vrot.slane %v3584_v53, 4  ;;  %v2842_v21 = vshrl.u32 %v2562_v28, 16  ;;  %v2565_v53 = vld [vmem:[#allocation2 + $0x9c] sm:$0xf] }
 0x12e   : > { %5428 = vmatprep.mubr.bf16.mxu0 %v6425_v5  ;;  %v3592_v6 = vrot.slane %v3590_v4, 5  ;;  %v2845_v55 = vshll.u32 %v2562_v28, 16  ;;  %v2851_v40 = vshll.u32 %v2563_v60, 16  ;;  %v2855_v46 = vshrl.u32 %v2563_v60, 16  ;;  %v8817_v36 = vpop.f32.mrb[5].mxu1 }
 0x12f   : > { %v3578_v37 = vrot.slane %v3577_v32, 4  ;;  %v3587_v22 = vor.u32 %v3586_v29, %v3582_v2  ;;  %v2844_v11 = vrot.slane %v2842_v21, 4  ;;  %v2861_v23 = vshll.u32 %v2564_v54, 16  ;;  %v8821_v35 = vpop.f32.mrb[6].mxu1  ;;  %v7513_v32 = vld [vmem:[#allocation2 + $0x30] sm:$0xff]  }
 0x130   : > { %v2847_v58 = vrot.slane %v2845_v55, 5  ;;  %v2853_v26 = vrot.slane %v2851_v40, 5  ;;  %v2857_v9 = vrot.slane %v2855_v46, 4  ;;  %v6411_v5 = vrot.slane %v3077_v47, 9  ;;  %v2566_v47 = vld [vmem:[#allocation2 + $0xa0] sm:$0xf] }
 0x131   : > { %v3583_v1 = vsel %vm7760_vm11, %v3578_v37, %v3582_v2  ;;  %v3588_v13 = vrot.slane %v3587_v22, 4  ;;  %v2863_v18 = vrot.slane %v2861_v23, 5  ;;  %v3223_v17 = vrot.slane %v3078_v61, 5  ;;  %v8827_v61 = vpop.f32.mrb[7].mxu1  ;;  %v2567_v55 = vld [vmem:[#allocation2 + $0xa4] sm:$0x1] }
 0x132   : > { %v2848_v30 = vor.u32 %v2847_v58, %v2844_v11  ;;  %v2858_v28 = vor.u32 %v2857_v9, %v2853_v26  ;;  %v3226_v41 = vrot.slane %v3079_v45, 5  ;;  %v3595_v43 = vshrl.u32 %v3483_v50, 16  ;;  %v8831_v40 = vpop.f32.mrb[10].mxu0  ;;  %v3081_v9 = vld [vmem:[#allocation2 + $0xac] sm:$0xf] }
 0x133   : > { %5518 = vmatmul.mubr.bf16.gmra.mrb[84].mxu1 %v7511_v31  ;;  %v3593_v60 = vsel %vm7760_vm11, %v3588_v13, %v3592_v6  ;;  %v3224_v49 = vsel %vm8015_vm14, %v6411_v5, %v3223_v17  ;;  %v3225_v56 = vrot.slane %v3223_v17, 4  ;;  %v3598_v2 = vshll.u32 %v3483_v50, 16  ;;  %v8837_v22 = vpop.f32.mrb[11].mxu0 }
 0x134   : > { %v6449_v54 = vcombine.low %v3583_v1, %v3593_v60  ;;  %v2849_v7 = vrot.slane %v2848_v30, 4  ;;  %v2859_v57 = vrot.slane %v2858_v28, 4  ;;  %v3597_v4 = vrot.slane %v3595_v43, 4  ;;  %v3082_v30 = vld [vmem:[#allocation2 + $0xb0] sm:$0x1] }
 0x135   : > { %5429 = vmatmul.mubr.bf16.gmra.mrb[88].mxu0 %v6393_v8  ;;  %v3227_v31 = vsel %vm8015_vm14, %v3225_v56, %v3226_v41  ;;  %v3600_v29 = vrot.slane %v3598_v2, 5  ;;  %v3604_v21 = vshll.u32 %v3484_v52, 16  ;;  %v3608_v6 = vshrl.u32 %v3484_v52, 16  ;;  %v3487_v56 = vld [vmem:[#allocation2 + $0x4c] sm:$0xf] }
 0x136   : > { %5436 = vmatprep.mubr.bf16.mxu0 %v6426_v59  ;;  %5525 = vmatprep.mubr.bf16.mxu1 %v6449_v54  ;;  %v2854_v8 = vsel %vm7760_vm11, %v2849_v7, %v2853_v26  ;;  %v2864_v46 = vsel %vm7760_vm11, %v2859_v57, %v2863_v18  ;;  %v6427_v45 = vcombine.low %v3224_v49, %v3227_v31  ;;  %v3614_v37 = vshll.u32 %v3485_v27, 16  ;;  %v3080_v59 = vld [vmem:[#allocation2 + $0xa8] sm:$0xe] }
 0x137   : > { %v6394_v11 = vcombine.low %v2854_v8, %v2864_v46  ;;  %v3601_v23 = vor.u32 %v3600_v29, %v3597_v4  ;;  %v3606_v50 = vrot.slane %v3604_v21, 5  ;;  %v3610_v58 = vrot.slane %v3608_v6, 4  ;;  %v3486_v18 = vld [vmem:[#allocation2 + $0x48] sm:$0xf]  ;;  %v3488_v8 = vld [vmem:[#allocation2 + $0x50] sm:$0x1] }
 0x138   : > { %v3616_v5 = vrot.slane %v3614_v37, 5  ;;  %v2866_v1 = vshrl.u32 %v2565_v53, 16  ;;  %v2869_v13 = vshll.u32 %v2565_v53, 16  ;;  %v2875_v17 = vshll.u32 %v2566_v47, 16 }
 0x139   : > { %v3602_v28 = vrot.slane %v3601_v23, 4  ;;  %v3611_v26 = vor.u32 %v3610_v58, %v3606_v50  ;;  %v2879_v41 = vshrl.u32 %v2566_v47, 16  ;;  %v2885_v52 = vshll.u32 %v2567_v55, 16  ;;  %v7514_v55 = vld [vmem:[#allocation2 + $0x3c] sm:$0xff]  }
 0x13a   : > { %v2868_v43 = vrot.slane %v2866_v1, 4  ;;  %v2871_v27 = vrot.slane %v2869_v13, 5  ;;  %v2877_v60 = vrot.slane %v2875_v17, 5  ;;  %v6412_v49 = vrot.slane %v3080_v59, 9  ;;  %v8841_v53 = vpop.f32.mrb[12].mxu0 }
 0x13b   : > { %5526 = vmatmul.mubr.bf16.gmra.mrb[88].mxu1 %v7513_v32  ;;  %v3607_v2 = vsel %vm7760_vm11, %v3602_v28, %v3606_v50  ;;  %v3612_v54 = vrot.slane %v3611_v26, 4  ;;  %v2881_v7 = vrot.slane %v2879_v41, 4  ;;  %v2887_v57 = vrot.slane %v2885_v52, 5  ;;  %v8843_v21 = vpop.f32.mrb[13].mxu0  ;;  %v2568_v59 = vld [vmem:[#allocation2 + $0xa8] sm:$0xf] }
 0x13c   : > { %v2872_v4 = vor.u32 %v2871_v27, %v2868_v43  ;;  %v3230_v31 = vrot.slane %v3081_v9, 5  ;;  %v3233_v47 = vrot.slane %v3082_v30, 5  ;;  %v3619_v29 = vshrl.u32 %v3486_v18, 16  ;;  %v2569_v9 = vld [vmem:[#allocation2 + $0xac] sm:$0xf] }
 0x13d   : > { %5437 = vmatmul.mubr.bf16.gmra.mrb[92].mxu0 %v6394_v11  ;;  %v3617_v6 = vsel %vm7760_vm11, %v3612_v54, %v3616_v5  ;;  %v2882_v32 = vor.u32 %v2881_v7, %v2877_v60  ;;  %v3622_v46 = vshll.u32 %v3486_v18, 16  ;;  %v3628_v37 = vshll.u32 %v3487_v56, 16  ;;  %v2570_v41 = vld [vmem:[#allocation2 + $0xb0] sm:$0x1]  ;;  %v3083_v52 = vld [vmem:[#allocation2 + $0xb4] sm:$0xe] }
 0x13e   : > { %5444 = vmatprep.mubr.bf16.mxu0 %v6427_v45  ;;  %v6450_v23 = vcombine.low %v3607_v2, %v3617_v6  ;;  %v2873_v50 = vrot.slane %v2872_v4, 4  ;;  %v3231_v11 = vsel %vm8015_vm14, %v6412_v49, %v3230_v31  ;;  %v3232_v58 = vrot.slane %v3230_v31, 4  ;;  %v3084_v2 = vld [vmem:[#allocation2 + $0xb8] sm:$0xf]  ;;  %v3085_v54 = vld [vmem:[#allocation2 + $0xbc] sm:$0x1] }
 0x13f   : > { %v2883_v1 = vrot.slane %v2882_v32, 4  ;;  %v3621_v13 = vrot.slane %v3619_v29, 4  ;;  %v3624_v17 = vrot.slane %v3622_v46, 5  ;;  %v3630_v45 = vrot.slane %v3628_v37, 5  ;;  %v8855_v7 = vpop.f32.mrb[14].mxu0 }
 0x140   : > { %5533 = vmatprep.mubr.bf16.mxu1 %v6450_v23  ;;  %v2878_v5 = vsel %vm7760_vm11, %v2873_v50, %v2877_v60  ;;  %v3234_v30 = vsel %vm8015_vm14, %v3232_v58, %v3233_v47  ;;  %v3632_v28 = vshrl.u32 %v3487_v56, 16  ;;  %v3638_v26 = vshll.u32 %v3488_v8, 16  ;;  %v3489_v6 = vld [vmem:[#allocation2 + $0x54] sm:$0xf]  ;;  %v8857_v47 = vpop.f32.mrb[15].mxu0 }
 0x141   : > { %v2888_v18 = vsel %vm7760_vm11, %v2883_v1, %v2887_v57  ;;  %v6428_v43 = vcombine.low %v3231_v11, %v3234_v30  ;;  %v3625_v27 = vor.u32 %v3624_v17, %v3621_v13  ;;  %v2890_v49 = vshrl.u32 %v2568_v59, 16  ;;  %v3490_v57 = vld [vmem:[#allocation2 + $0x58] sm:$0xf] }
 0x142   : > { %v6395_v4 = vcombine.low %v2878_v5, %v2888_v18  ;;  %v3634_v31 = vrot.slane %v3632_v28, 4  ;;  %v3640_v60 = vrot.slane %v3638_v26, 5  ;;  %v2893_v29 = vshll.u32 %v2568_v59, 16  ;;  %v7516_v28 = vld [vmem:[#allocation2 + $0x48] sm:$0xff]   ;;  %v3491_v18 = vld [vmem:[#allocation2 + $0x5c] sm:$0x1] }
 0x143   : > { %5534 = vmatmul.mubr.bf16.gmra.mrb[92].mxu1 %v7514_v55  ;;  %v3626_v56 = vrot.slane %v3625_v27, 4  ;;  %v2892_v32 = vrot.slane %v2890_v49, 4  ;;  %v2899_v8 = vshll.u32 %v2569_v9, 16  ;;  %v2903_v46 = vshrl.u32 %v2569_v9, 16  ;;  %v8859_v58 = vpop.f32.mrb[8].mxu1 }
 0x144   : > { %v3635_v37 = vor.u32 %v3634_v31, %v3630_v45  ;;  %v2895_v23 = vrot.slane %v2893_v29, 5  ;;  %v2909_v50 = vshll.u32 %v2570_v41, 16  ;;  %v6413_v11 = vrot.slane %v3083_v52, 9  ;;  %v8863_v55 = vpop.f32.mrb[9].mxu1 }
 0x145   : > { %5445 = vmatmul.mubr.bf16.gmra.mrb[96].mxu0 %v6395_v4  ;;  %v3631_v59 = vsel %vm7760_vm11, %v3626_v56, %v3630_v45  ;;  %v2901_v1 = vrot.slane %v2899_v8, 5  ;;  %v2905_v13 = vrot.slane %v2903_v46, 4  ;;  %v3237_v17 = vrot.slane %v3084_v2, 5  ;;  %v8865_v27 = vpop.f32.mrb[10].mxu1  ;;  %v2571_v45 = vld [vmem:[#allocation2 + $0xb4] sm:$0xf] }
 0x146   : > { %5452 = vmatprep.mubr.bf16.mxu0 %v6428_v43  ;;  %v3636_v5 = vrot.slane %v3635_v37, 4  ;;  %v2896_v30 = vor.u32 %v2895_v23, %v2892_v32  ;;  %v2911_v9 = vrot.slane %v2909_v50, 5  ;;  %v3240_v26 = vrot.slane %v3085_v54, 5  ;;  %v8871_v56 = vpop.f32.mrb[11].mxu1  ;;  %v2572_v37 = vld [vmem:[#allocation2 + $0xb8] sm:$0xf] }
 0x147   : > { %v2906_v41 = vor.u32 %v2905_v13, %v2901_v1  ;;  %v3238_v52 = vsel %vm8015_vm14, %v6413_v11, %v3237_v17  ;;  %v3239_v43 = vrot.slane %v3237_v17, 4  ;;  %v3643_v49 = vshrl.u32 %v3489_v6, 16  ;;  %v2573_v17 = vld [vmem:[#allocation2 + $0xbc] sm:$0x1] }
 0x148   : > { %v3641_v2 = vsel %vm7760_vm11, %v3636_v5, %v3640_v60  ;;  %v2897_v4 = vrot.slane %v2896_v30, 4  ;;  %v3646_v31 = vshll.u32 %v3489_v6, 16  ;;  %v3652_v29 = vshll.u32 %v3490_v57, 16  ;;  %v1175_v60 = vld [vmem:[#allocation2 + $0xc8] sm:$0x1] }
 0x149   : > { %v6451_v32 = vcombine.low %v3631_v59, %v3641_v2  ;;  %v2907_v54 = vrot.slane %v2906_v41, 4  ;;  %v3241_v8 = vsel %vm8015_vm14, %v3239_v43, %v3240_v26  ;;  %v3645_v46 = vrot.slane %v3643_v49, 4  ;;  %v3086_v41 = vld [vmem:[#allocation2 + $0xc0] sm:$0xe] }
 0x14a   : > { %v2902_v23 = vsel %vm7760_vm11, %v2897_v4, %v2901_v1  ;;  %v6429_v50 = vcombine.low %v3238_v52, %v3241_v8  ;;  %v3648_v11 = vrot.slane %v3646_v31, 5  ;;  %v3654_v13 = vrot.slane %v3652_v29, 5 }
 0x14b   : > { %5541 = vmatprep.mubr.bf16.mxu1 %v6451_v32  ;;  %v2912_v6 = vsel %vm7760_vm11, %v2907_v54, %v2911_v9  ;;  %v3656_v5 = vshrl.u32 %v3490_v57, 16  ;;  %v3662_v59 = vshll.u32 %v3491_v18, 16  ;;  %v2914_v30 = vshrl.u32 %v2571_v45, 16  ;;  %v3492_v9 = vld [vmem:[#allocation2 + $0x60] sm:$0xf] }
 0x14c   : > { %v6396_v2 = vcombine.low %v2902_v23, %v2912_v6  ;;  %5542 = vmatmul.mubr.bf16.gmra.mrb[96].mxu1 %v7516_v28  ;;  %v3649_v26 = vor.u32 %v3648_v11, %v3645_v46  ;;  %v2917_v43 = vshll.u32 %v2571_v45, 16  ;;  %v2923_v49 = vshll.u32 %v2572_v37, 16  ;;  %v3493_v46 = vld [vmem:[#allocation2 + $0x64] sm:$0xf] }
 0x14d   : > { %v3658_v1 = vrot.slane %v3656_v5, 4  ;;  %v3664_v52 = vrot.slane %v3662_v59, 5  ;;  %v2916_v4 = vrot.slane %v2914_v30, 4  ;;  %v2927_v31 = vshrl.u32 %v2572_v37, 16  ;;  %v3494_v59 = vld [vmem:[#allocation2 + $0x68] sm:$0x1] }
 0x14e   : > { %5453 = vmatmul.mubr.bf16.gmra.mrb[100].mxu0 %v6396_v2  ;;  %v3650_v29 = vrot.slane %v3649_v26, 4  ;;  %v2919_v32 = vrot.slane %v2917_v43, 5  ;;  %v2925_v8 = vrot.slane %v2923_v49, 5  ;;  %v2933_v42 = vshll.u32 %v2573_v17, 16  ;;  %v7517_v26 = vld [vmem:[#allocation2 + $0x54] sm:$0xff]  }
 0x14f   : > { %5460 = vmatprep.mubr.bf16.mxu0 %v6429_v50  ;;  %v3659_v57 = vor.u32 %v3658_v1, %v3654_v13  ;;  %v2929_v18 = vrot.slane %v2927_v31, 4  ;;  %v9640_v54 = vrot.slane %v8698_v10, 4  ;;  %v6414_v45 = vrot.slane %v3086_v41, 9  ;;  %v2574_v43 = vld [vmem:[#allocation2 + $0xc0] sm:$0xf] }
 0x150   : > { %v3655_v23 = vsel %vm7760_vm11, %v3650_v29, %v3654_v13  ;;  %v2920_v37 = vor.u32 %v2919_v32, %v2916_v4  ;;  %v2935_v11 = vrot.slane %v2933_v42, 5  ;;  %v3244_v6 = vrot.slane %v3087_v39, 5  ;;  %v2575_v1 = vld [vmem:[#allocation2 + $0xc4] sm:$0xf] }
 0x151   : > { %v1176_v28 = vsel %vm7668_vm3, %v9640_v54, %v1175_v60  ;;  %v3660_v5 = vrot.slane %v3659_v57, 4  ;;  %v2930_v17 = vor.u32 %v2929_v18, %v2925_v8  ;;  %v3667_v50 = vshrl.u32 %v3492_v9, 16 }
 0x152   : > { %1177 = vst [vmem:[#allocation2 + $0xc8] sm:$0x1] %v1176_v28  ;;  %v3670_v30 = vshll.u32 %v3492_v9, 16  ;;  %v2921_v2 = vrot.slane %v2920_v37, 4  ;;  %v8887_v10 = vsel %vm8015_vm14, %v6414_v45, %v3244_v6  ;;  %v8889_v60 = vrot.slane %v3244_v6, 4 }
 0x153   : > { %v3676_v41 = vshll.u32 %v3493_v46, 16  ;;  %v3665_v42 = vsel %vm7760_vm11, %v3660_v5, %v3664_v52  ;;  %v2931_v13 = vrot.slane %v2930_v17, 4  ;;  %v3669_v39 = vrot.slane %v3667_v50, 4  ;;  %v3495_v5 = vld [vmem:[#allocation2 + $0x6c] sm:$0xf] }
 0x154   : > { %v3672_v49 = vrot.slane %v3670_v30, 5  ;;  %v8893_v4 = vpop.f32.mrb[16].mxu0  ;;  %v6452_v31 = vcombine.low %v3655_v23, %v3665_v42  ;;  %v2926_v29 = vsel %vm7760_vm11, %v2921_v2, %v2925_v8  ;;  %v3680_v9 = vshrl.u32 %v3493_v46, 16  ;;  %v3496_v42 = vld [vmem:[#allocation2 + $0x70] sm:$0xf] }
 0x155   : > { %v3678_v32 = vrot.slane %v3676_v41, 5  ;;  %v2936_v57 = vsel %vm7760_vm11, %v2931_v13, %v2935_v11  ;;  %v3686_v54 = vshll.u32 %v3494_v59, 16  ;;  %v2938_v28 = vshrl.u32 %v2574_v43, 16  ;;  %v8899_v17 = vpop.f32.mrb[17].mxu0 }
 0x156   : > { %v3673_v18 = vor.u32 %v3672_v49, %v3669_v39  ;;  %5549 = vmatprep.mubr.bf16.mxu1 %v6452_v31  ;;  %v6397_v52 = vcombine.low %v2926_v29, %v2936_v57  ;;  %v3682_v45 = vrot.slane %v3680_v9, 4  ;;  %v2941_v37 = vshll.u32 %v2574_v43, 16  ;;  %v8905_v43 = vpop.f32.mrb[18].mxu0  ;;  %v3986_v31 = vld [vmem:[#allocation2 + $0x18] sm:$0xe] }
 0x157   : > { %v2947_v6 = vshll.u32 %v2575_v1, 16  ;;  %5550 = vmatmul.mubr.bf16.gmra.mrb[100].mxu1 %v7517_v26  ;;  %v3688_v8 = vrot.slane %v3686_v54, 5  ;;  %v2940_v30 = vrot.slane %v2938_v28, 4  ;;  %v2951_v46 = vshrl.u32 %v2575_v1, 16  ;;  %v3497_v1 = vld [vmem:[#allocation2 + $0x74] sm:$0x1] }
 0x158   : > { %v3674_v50 = vrot.slane %v3673_v18, 4  ;;  %5461 = vmatmul.mubr.bf16.gmra.mrb[104].mxu0 %v6397_v52  ;;  %v3683_v59 = vor.u32 %v3682_v45, %v3678_v32  ;;  %v2943_v2 = vrot.slane %v2941_v37, 5  ;;  %v8911_v39 = vadd.f32 %v8708_v33, %v8691_v12  ;;  %v8917_v29 = vpop.f32.mrb[19].mxu0  ;;  %v3987_v54 = vld [vmem:[#allocation2 + $0x1c] sm:$0xf] }
 0x159   : > { %v1281_v23 = vld [vmem:[#allocation2 + $0xc8] sm:$0x1]  ;;  %v8903_v41 = vrot.slane %v2947_v6, 5  ;;  %v2953_v13 = vrot.slane %v2951_v46, 4  ;;  %v8915_v49 = vadd.f32 %v8754_v63, %v8746_v44  ;;  %v8921_v18 = vadd.f32 %v8762_v3, %v8756_v19  ;;  %v3988_v28 = vld [vmem:[#allocation2 + $0x20] sm:$0x1] }
 0x15a   : > { %v1282_v11 = vsel %vm7676_vm4, 0, %v1281_v23  ;;  %v3679_v26 = vsel %vm7760_vm11, %v3674_v50, %v3678_v32  ;;  %v3684_v9 = vrot.slane %v3683_v59, 4  ;;  %v2944_v57 = vor.u32 %v2943_v2, %v2940_v30  ;;  %v3989_v52 = vld [vmem:[#allocation2 + $0x24] sm:$0xe]  ;;  %v3990_v63 = vld [vmem:[#allocation2 + $0x28] sm:$0xf] }
 0x15b   : > { %1283 = vst [vmem:[#allocation2 + $0xc8] sm:$0x1] %v1282_v11  ;;  %9641 = vst [vmem:[#allocation5_spill] sm:$0xff] %v8915_v49  ;;  %v3691_v32 = vshrl.u32 %v3495_v5, 16  ;;  %v2954_v12 = vor.u32 %v2953_v13, %v8903_v41  ;;  %v3694_v33 = vshll.u32 %v3495_v5, 16  ;;  %v3700_v45 = vshll.u32 %v3496_v42, 16 }
 0x15c   : > { %9642 = vst [vmem:[#allocation6_spill] sm:$0xff] %v8921_v18  ;;  %v3704_v44 = vshrl.u32 %v3496_v42, 16  ;;  %v3689_v37 = vsel %vm7760_vm11, %v3684_v9, %v3688_v8  ;;  %v2945_v6 = vrot.slane %v2944_v57, 4  ;;  %v7519_v23 = vld [vmem:[#allocation2 + $0x60] sm:$0xff]   ;;  %v3710_v30 = vshll.u32 %v3497_v1, 16 }
 0x15d   : > { %v3693_v50 = vrot.slane %v3691_v32, 4  ;;  %v3991_v46 = vld [vmem:[#allocation2 + $0x2c] sm:$0x1]  ;;  %v6453_v19 = vcombine.low %v3679_v26, %v3689_v37  ;;  %v2955_v3 = vrot.slane %v2954_v12, 4  ;;  %v3696_v11 = vrot.slane %v3694_v33, 5 }
 0x15e   : > { %v3702_v59 = vrot.slane %v3700_v45, 5  ;;  %v2950_v2 = vsel %vm7760_vm11, %v2945_v6, %v8903_v41  ;;  %v3706_v5 = vrot.slane %v3704_v44, 4  ;;  %v3712_v13 = vrot.slane %v3710_v30, 5  ;;  %v7520_v30 = vld [vmem:[#allocation2 + $0x6c] sm:$0xff]  }
 0x15f   : > { %v6463_v42 = vrot.slane %v3986_v31, 9  ;;  %v8929_v18 = vpop.f32.mrb[12].mxu1  ;;  %5557 = vmatprep.mubr.bf16.mxu1 %v6453_v19  ;;  %v3697_v8 = vor.u32 %v3696_v11, %v3693_v50  ;;  %v4084_v9 = vrot.slane %v3987_v54, 5  ;;  %v4087_v57 = vrot.slane %v3988_v28, 5 }
 0x160   : > { %v6464_v32 = vrot.slane %v3989_v52, 9  ;;  %v8931_v1 = vpop.f32.mrb[13].mxu1  ;;  %5558 = vmatmul.mubr.bf16.gmra.mrb[104].mxu1 %v7519_v23  ;;  %v3707_v33 = vor.u32 %v3706_v5, %v3702_v59  ;;  %v4091_v45 = vrot.slane %v3990_v63, 5  ;;  %v4094_v37 = vrot.slane %v3991_v46, 5  ;;  %v3498_v5 = vld [vmem:[#allocation2 + $0x78] sm:$0xf] }
 0x161   : > { %v8935_v41 = vadd.f32 %v8783_v0, %v8772_v62  ;;  %v3698_v6 = vrot.slane %v3697_v8, 4  ;;  %v4085_v54 = vsel %vm8015_vm14, %v6463_v42, %v4084_v9  ;;  %v8939_v28 = vpop.f32.mrb[14].mxu1  ;;  %v4086_v50 = vrot.slane %v4084_v9, 4  ;;  %v3499_v42 = vld [vmem:[#allocation2 + $0x7c] sm:$0xf] }
 0x162   : > { %v3088_v26 = vld [vmem:[#allocation2 + $0xc8] sm:$0x1]  ;;  %v3708_v52 = vrot.slane %v3707_v33, 4  ;;  %v8943_v23 = vsel %vm8015_vm14, %v6464_v32, %v4091_v45  ;;  %v4093_v63 = vrot.slane %v4091_v45, 4  ;;  %v8945_v46 = vpop.f32.mrb[15].mxu1  ;;  %v8954_v11 = vadd.f32 %v8793_v25, %v8789_v34 }
 0x163   : > { %v2576_v12 = vld [vmem:[#allocation2 + $0xc8] sm:$0x1]  ;;  %v3247_v31 = vrot.slane %v3088_v26, 5  ;;  %v3703_v19 = vsel %vm7760_vm11, %v3698_v6, %v3702_v59  ;;  %v3500_v59 = vld [vmem:[#allocation2 + $0x80] sm:$0x1] }
 0x164   : > { %v2957_v44 = vshll.u32 %v2576_v12, 16  ;;  %v8956_v8 = vpop.f32.mrb[20].mxu0  ;;  %v3713_v32 = vsel %vm7760_vm11, %v3708_v52, %v3712_v13  ;;  %v8965_v26 = vsel %vm8015_vm14, %v4093_v63, %v4094_v37  ;;  %v3992_v12 = vld [vmem:[#allocation2 + $0x30] sm:$0xe]  ;;  %v3993_v34 = vld [vmem:[#allocation2 + $0x34] sm:$0xf]  ;;  %v8977_v37 = vadd.f32 %v8827_v61, %v8821_v35 }
 0x165   : > { %v3248_v62 = vsel %vm8015_vm14, %v8889_v60, %v3247_v31  ;;  %v4088_v60 = vsel %vm8015_vm14, %v4086_v50, %v4087_v57  ;;  %v6454_v33 = vcombine.low %v3703_v19, %v3713_v32  ;;  %v3994_v31 = vld [vmem:[#allocation2 + $0x38] sm:$0x1]  ;;  %v8973_v57 = vadd.f32 %v8817_v36, %v8812_v14  ;;  %v3995_v6 = vld [vmem:[#allocation2 + $0x3c] sm:$0xe]  ;;  %v3996_v52 = vld [vmem:[#allocation2 + $0x40] sm:$0xf] }
 0x166   : > { %v2959_v0 = vrot.slane %v2957_v44, 5  ;;  %v6430_v9 = vcombine.low %v8887_v10, %v3248_v62  ;;  %v6479_v45 = vcombine.low %v4085_v54, %v4088_v60  ;;  %v6480_v10 = vcombine.low %v8943_v23, %v8965_v26  ;;  %9644 = vst [vmem:[#allocation8_spill] sm:$0xff] %v8977_v37  ;;  %v8983_v35 = vpop.f32.mrb[21].mxu0 }
 0x167   : > { %9643 = vst [vmem:[#allocation7_spill] sm:$0xff] %v8973_v57  ;;  %v3715_v44 = vshrl.u32 %v3498_v5, 16  ;;  %5565 = vmatprep.mubr.bf16.mxu1 %v6454_v33  ;;  %v3718_v54 = vshll.u32 %v3498_v5, 16  ;;  %v3724_v50 = vshll.u32 %v3499_v42, 16  ;;  %v3728_v63 = vshrl.u32 %v3499_v42, 16  ;;  %v8987_v42 = vpop.f32.mrb[22].mxu0 }
 0x168   : > { %v2960_v25 = vsel %vm7760_vm11, %v2955_v3, %v2959_v0  ;;  %5468 = vmatprep.mubr.bf16.mxu0 %v6430_v9  ;;  %v8979_v3 = vpop.f32.mrb[16].mxu1  ;;  %v3734_v62 = vshll.u32 %v3500_v59, 16  ;;  %v3997_v0 = vld [vmem:[#allocation2 + $0x44] sm:$0x1]  ;;  %5566 = vmatmul.mubr.bf16.gmra.mrb[108].mxu1 %v7520_v30  ;;  %v6465_v14 = vrot.slane %v3992_v12, 9  ;;  %v4098_v36 = vrot.slane %v3993_v34, 5 }
 0x169   : > { %v6398_v13 = vcombine.low %v2950_v2, %v2960_v25  ;;  %v3717_v2 = vrot.slane %v3715_v44, 4  ;;  %v4101_v19 = vrot.slane %v3994_v31, 5  ;;  %v8981_v9 = vpop.f32.mrb[17].mxu1  ;;  %v3720_v61 = vrot.slane %v3718_v54, 5  ;;  %v3501_v54 = vld [vmem:[#allocation2 + $0x84] sm:$0xf] }
 0x16a   : > { %v3726_v32 = vrot.slane %v3724_v50, 5  ;;  %v3730_v60 = vrot.slane %v3728_v63, 4  ;;  %v3736_v25 = vrot.slane %v3734_v62, 5  ;;  %v8985_v5 = vpop.f32.mrb[18].mxu1  ;;  %v4099_v30 = vsel %vm8015_vm14, %v6465_v14, %v4098_v36  ;;  %v3502_v50 = vld [vmem:[#allocation2 + $0x88] sm:$0xf] }
 0x16b   : > { %5469 = vmatmul.mubr.bf16.gmra.mrb[108].mxu0 %v6398_v13  ;;  %v4100_v59 = vrot.slane %v4098_v36, 4  ;;  %v6466_v12 = vrot.slane %v3995_v6, 9  ;;  %v4105_v34 = vrot.slane %v3996_v52, 5  ;;  %v8991_v33 = vpop.f32.mrb[19].mxu1  ;;  %v3721_v31 = vor.u32 %v3720_v61, %v3717_v2  ;;  %v8997_v63 = vpop.f32.mrb[23].mxu0  ;;  %v7521_v61 = vld [vmem:[#allocation2 + $0x78] sm:$0xff]  }
 0x16c   : > { %7336 = vmatprep.mubr.bf16.mxu0 %v6479_v45  ;;  %v3731_v13 = vor.u32 %v3730_v60, %v3726_v32  ;;  %v4108_v44 = vrot.slane %v3997_v0, 5  ;;  %v8995_v45 = vadd.f32 %v8805_v51, %v8801_v15  ;;  %v9007_v2 = vadd.f32 %v8837_v22, %v8831_v40  ;;  %v3503_v0 = vld [vmem:[#allocation2 + $0x8c] sm:$0x1]  ;;  %v3998_v14 = vld [vmem:[#allocation2 + $0x48] sm:$0xe] }
 0x16d   : > { %v4102_v62 = vsel %vm8015_vm14, %v4100_v59, %v4101_v19  ;;  %v9003_v6 = vsel %vm8015_vm14, %v6466_v12, %v4105_v34  ;;  %v4107_v52 = vrot.slane %v4105_v34, 4  ;;  %v3722_v15 = vrot.slane %v3721_v31, 4  ;;  %v3999_v19 = vld [vmem:[#allocation2 + $0x4c] sm:$0xf]  ;;  %v4000_v34 = vld [vmem:[#allocation2 + $0x50] sm:$0x1] }
 0x16e   : > { %v3732_v51 = vrot.slane %v3731_v13, 4  ;;  %v6481_v36 = vcombine.low %v4099_v30, %v4102_v62  ;;  %v9011_v60 = vadd.f32 %v8863_v55, %v8859_v58  ;;  %v9019_v12 = vadd.f32 %v8871_v56, %v8865_v27  ;;  %v4001_v13 = vld [vmem:[#allocation2 + $0x54] sm:$0xe] }
 0x16f   : > { %v9015_v59 = vsel %vm8015_vm14, %v4107_v52, %v4108_v44  ;;  %v3739_v40 = vshrl.u32 %v3501_v54, 16  ;;  %v3742_v22 = vshll.u32 %v3501_v54, 16  ;;  %v3727_v30 = vsel %vm7760_vm11, %v3722_v15, %v3726_v32  ;;  %v4002_v44 = vld [vmem:[#allocation2 + $0x58] sm:$0xf]  ;;  %v9027_v62 = vpop.f32.mrb[20].mxu1 }
 0x170   : > { %9645 = vst [vmem:[#allocation9_spill] sm:$0xff] %v9011_v60  ;;  %9646 = vst [vmem:[#allocation10_spill] sm:$0xff] %v9019_v12  ;;  %v3737_v31 = vsel %vm7760_vm11, %v3732_v51, %v3736_v25  ;;  %v6482_v58 = vcombine.low %v9003_v6, %v9015_v59  ;;  %v3748_v55 = vshll.u32 %v3502_v50, 16  ;;  %v3752_v52 = vshrl.u32 %v3502_v50, 16  ;;  %v4003_v32 = vld [vmem:[#allocation2 + $0x5c] sm:$0x1] }
 0x171   : > { %v6455_v27 = vcombine.low %v3727_v30, %v3737_v31  ;;  %v3741_v56 = vrot.slane %v3739_v40, 4  ;;  %v3744_v54 = vrot.slane %v3742_v22, 5  ;;  %v9032_v15 = vpop.f32.mrb[21].mxu1  ;;  %v3758_v51 = vshll.u32 %v3503_v0, 16  ;;  %v3504_v22 = vld [vmem:[#allocation2 + $0x90] sm:$0xf] }
 0x172   : > { %v3750_v25 = vrot.slane %v3748_v55, 5  ;;  %v6467_v6 = vrot.slane %v3998_v14, 9  ;;  %v4112_v59 = vrot.slane %v3999_v19, 5  ;;  %v9034_v12 = vpop.f32.mrb[22].mxu1  ;;  %v3754_v37 = vrot.slane %v3752_v52, 4 }
 0x173   : > { %7337 = vmatmul.mubr.bf16.vlgmr.msra.gmra.mrb[112].mxu0 %v6480_v10  ;;  %5573 = vmatprep.mubr.bf16.mxu1 %v6455_v27  ;;  %v3745_v60 = vor.u32 %v3744_v54, %v3741_v56  ;;  %v4115_v57 = vrot.slane %v4000_v34, 5  ;;  %v6468_v23 = vrot.slane %v4001_v13, 9  ;;  %v9036_v26 = vpop.f32.mrb[23].mxu1  ;;  %v3760_v10 = vrot.slane %v3758_v51, 5  ;;  %v3505_v34 = vld [vmem:[#allocation2 + $0x94] sm:$0xf] }
 0x174   : > { %7340 = vmatprep.mubr.bf16.mxu0 %v6481_v36  ;;  %5574 = vmatmul.mubr.bf16.gmra.mrb[112].mxu1 %v7521_v61  ;;  %v4113_v50 = vsel %vm8015_vm14, %v6467_v6, %v4112_v59  ;;  %v4114_v40 = vrot.slane %v4112_v59, 4  ;;  %v4119_v36 = vrot.slane %v4002_v44, 5  ;;  %v9040_v0 = vpop.f32.mrb[24].mxu0  ;;  %v3755_v19 = vor.u32 %v3754_v37, %v3750_v25  ;;  %v3506_v55 = vld [vmem:[#allocation2 + $0x98] sm:$0x1]  ;;  %v7522_v54 = vld [vmem:[#allocation2 + $0x84] sm:$0xff]  }
 0x175   : > { %v3746_v14 = vrot.slane %v3745_v60, 4  ;;  %v4122_v30 = vrot.slane %v4003_v32, 5  ;;  %v9044_v31 = vadd.f32 %v8843_v21, %v8841_v53  ;;  %v9054_v27 = vadd.f32 %v8857_v47, %v8855_v7  ;;  %v4004_v37 = vld [vmem:[#allocation2 + $0x60] sm:$0xe]  ;;  %v9056_v60 = vpop.f32.mrb[25].mxu0 }
 0x176   : > { %v4116_v61 = vsel %vm8015_vm14, %v4114_v40, %v4115_v57  ;;  %v9050_v13 = vsel %vm8015_vm14, %v6468_v23, %v4119_v36  ;;  %v4121_v44 = vrot.slane %v4119_v36, 4  ;;  %v3756_v21 = vrot.slane %v3755_v19, 4  ;;  %v4005_v52 = vld [vmem:[#allocation2 + $0x64] sm:$0xf]  ;;  %v9064_v32 = vpop.f32.mrb[26].mxu0 }
 0x177   : > { %v3751_v53 = vsel %vm7760_vm11, %v3746_v14, %v3750_v25  ;;  %v6483_v56 = vcombine.low %v4113_v50, %v4116_v61  ;;  %v9062_v57 = vadd.f32 %v8931_v1, %v8929_v18  ;;  %v9070_v47 = vadd.f32 %v8945_v46, %v8939_v28  ;;  %v4006_v25 = vld [vmem:[#allocation2 + $0x68] sm:$0x1]  ;;  %v4007_v59 = vld [vmem:[#allocation2 + $0x6c] sm:$0xe]  ;;  %v4008_v40 = vld [vmem:[#allocation2 + $0x70] sm:$0xf] }
 0x178   : > { %v4123_v7 = vsel %vm8015_vm14, %v4121_v44, %v4122_v30  ;;  %v3763_v51 = vshrl.u32 %v3504_v22, 16  ;;  %v3766_v6 = vshll.u32 %v3504_v22, 16  ;;  %v3761_v23 = vsel %vm7760_vm11, %v3756_v21, %v3760_v10  ;;  %v9075_v36 = vpop.f32.mrb[27].mxu0  ;;  %v9077_v14 = vpop.f32.mrb[24].mxu1  ;;  %v4009_v30 = vld [vmem:[#allocation2 + $0x74] sm:$0x1] }
 0x179   : > { %9647 = vst [vmem:[#allocation11_spill] sm:$0xff] %v9062_v57  ;;  %9648 = vst [vmem:[#allocation12_spill] sm:$0xff] %v9070_v47  ;;  %v6484_v18 = vcombine.low %v9050_v13, %v4123_v7  ;;  %v3772_v1 = vshll.u32 %v3505_v34, 16  ;;  %v3776_v50 = vshrl.u32 %v3505_v34, 16  ;;  %v6456_v19 = vcombine.low %v3751_v53, %v3761_v23  ;;  %v9079_v61 = vpop.f32.mrb[25].mxu1 }
 0x17a   : > { %v3765_v28 = vrot.slane %v3763_v51, 4  ;;  %v3768_v46 = vrot.slane %v3766_v6, 5  ;;  %v3782_v22 = vshll.u32 %v3506_v55, 16  ;;  %v6469_v10 = vrot.slane %v4004_v37, 9  ;;  %v9081_v13 = vpop.f32.mrb[26].mxu1 }
 0x17b   : > { %7341 = vmatmul.mubr.bf16.gmra.mrb[116].mxu0 %v6482_v58  ;;  %v3774_v58 = vrot.slane %v3772_v1, 5  ;;  %v3778_v44 = vrot.slane %v3776_v50, 4  ;;  %v4126_v21 = vrot.slane %v4005_v52, 5  ;;  %5581 = vmatprep.mubr.bf16.mxu1 %v6456_v19  ;;  %v4129_v47 = vrot.slane %v4006_v25, 5  ;;  %v9083_v49 = vpop.f32.mrb[27].mxu1 }
 0x17c   : > { %7344 = vmatprep.mubr.bf16.mxu0 %v6483_v56  ;;  %v3769_v34 = vor.u32 %v3768_v46, %v3765_v28  ;;  %v3784_v7 = vrot.slane %v3782_v22, 5  ;;  %v6470_v57 = vrot.slane %v4007_v59, 9  ;;  %5582 = vmatmul.mubr.bf16.gmra.mrb[116].mxu1 %v7522_v54  ;;  %v4133_v51 = vrot.slane %v4008_v40, 5  ;;  %v3507_v6 = vld [vmem:[#allocation2 + $0x9c] sm:$0xf]  ;;  %v7523_v46 = vld [vmem:[#allocation2 + $0x90] sm:$0xff]  }
 0x17d   : > { %v3779_v53 = vor.u32 %v3778_v44, %v3774_v58  ;;  %v4127_v55 = vsel %vm8015_vm14, %v6469_v10, %v4126_v21  ;;  %v4128_v56 = vrot.slane %v4126_v21, 4  ;;  %v4136_v37 = vrot.slane %v4009_v30, 5  ;;  %v3508_v59 = vld [vmem:[#allocation2 + $0xa0] sm:$0xf]  ;;  %v3509_v19 = vld [vmem:[#allocation2 + $0xa4] sm:$0x1] }
 0x17e   : > { %v3770_v23 = vrot.slane %v3769_v34, 4  ;;  %v9089_v52 = vadd.f32 %v8899_v17, %v8893_v4  ;;  %v9093_v25 = vadd.f32 %v8917_v29, %v8905_v43  ;;  %v9099_v50 = vsel %vm8015_vm14, %v6470_v57, %v4133_v51  ;;  %v4010_v28 = vld [vmem:[#allocation2 + $0x78] sm:$0xe]  ;;  %v4011_v22 = vld [vmem:[#allocation2 + $0x7c] sm:$0xf] }
 0x17f   : > { %v3780_v1 = vrot.slane %v3779_v53, 4  ;;  %v4130_v54 = vsel %vm8015_vm14, %v4128_v56, %v4129_v47  ;;  %v4135_v40 = vrot.slane %v4133_v51, 4  ;;  %v6978_v43 = vadd.f32 %v8981_v9, %v8979_v3  ;;  %v4012_v47 = vld [vmem:[#allocation2 + $0x80] sm:$0x1]  ;;  %v9107_v30 = vpop.f32.mrb[28].mxu1 }
 0x180   : > { %v3775_v4 = vsel %vm7760_vm11, %v3770_v23, %v3774_v58  ;;  %v6485_v17 = vcombine.low %v4127_v55, %v4130_v54  ;;  %v6981_v29 = vadd.f32 %v8991_v33, %v8985_v5  ;;  %v3787_v58 = vshrl.u32 %v3507_v6, 16  ;;  %v4013_v21 = vld [vmem:[#allocation2 + $0x84] sm:$0xe]  ;;  %v9115_v3 = vpop.f32.mrb[29].mxu1  ;;  %v4015_v53 = vld [vmem:[#allocation2 + $0x8c] sm:$0x1] }
 0x181   : > { %v3785_v57 = vsel %vm7760_vm11, %v3780_v1, %v3784_v7  ;;  %v4137_v44 = vsel %vm8015_vm14, %v4135_v40, %v4136_v37  ;;  %v3790_v10 = vshll.u32 %v3507_v6, 16  ;;  %v9113_v34 = vpop.f32.mrb[28].mxu0  ;;  %v9119_v33 = vadd.f32 %v6978_v43, %v8766_v24  ;;  %v4014_v7 = vld [vmem:[#allocation2 + $0x88] sm:$0xf]  ;;  %v9126_v56 = vpop.f32.mrb[30].mxu1 }
 0x182   : > { %v6457_v9 = vcombine.low %v3775_v4, %v3785_v57  ;;  %v6486_v5 = vcombine.low %v9099_v50, %v4137_v44  ;;  %v9124_v55 = vpop.f32.mrb[29].mxu0  ;;  %v3789_v51 = vrot.slane %v3787_v58, 4  ;;  %v3796_v23 = vshll.u32 %v3508_v59, 16  ;;  %v9130_v54 = vpop.f32.mrb[31].mxu1  ;;  %v3510_v44 = vld [vmem:[#allocation2 + $0xa8] sm:$0xf] }
 0x183   : > { %7345 = vmatmul.mubr.bf16.gmra.mrb[120].mxu0 %v6484_v18  ;;  %9649 = vst [vmem:[#allocation13_spill] sm:$0xff] %v9119_v33  ;;  %v9122_v18 = vadd.f32 %v6981_v29, %v8911_v39  ;;  %v3792_v6 = vrot.slane %v3790_v10, 5  ;;  %v3800_v37 = vshrl.u32 %v3508_v59, 16  ;;  %v9128_v1 = vpop.f32.mrb[30].mxu0  ;;  %v3806_v24 = vshll.u32 %v3509_v19, 16 }
 0x184   : > { %7348 = vmatprep.mubr.bf16.mxu0 %v6485_v17  ;;  %5589 = vmatprep.mubr.bf16.mxu1 %v6457_v9  ;;  %v6471_v50 = vrot.slane %v4010_v28, 9  ;;  %v4140_v40 = vrot.slane %v4011_v22, 5  ;;  %v4143_v39 = vrot.slane %v4012_v47, 5  ;;  %v9132_v4 = vpop.f32.mrb[31].mxu0  ;;  %v3798_v43 = vrot.slane %v3796_v23, 5 }
 0x185   : > { %9650 = vst [vmem:[#allocation14_spill] sm:$0xff] %v9122_v18  ;;  %5590 = vmatmul.mubr.bf16.gmra.mrb[120].mxu1 %v7523_v46  ;;  %v3793_v17 = vor.u32 %v3792_v6, %v3789_v51  ;;  %v3802_v29 = vrot.slane %v3800_v37, 4  ;;  %v6472_v57 = vrot.slane %v4013_v21, 9  ;;  %v3808_v58 = vrot.slane %v3806_v24, 5  ;;  %v3511_v22 = vld [vmem:[#allocation2 + $0xac] sm:$0xf] }
 0x186   : > { %v4141_v59 = vsel %vm8015_vm14, %v6471_v50, %v4140_v40  ;;  %v4142_v10 = vrot.slane %v4140_v40, 4  ;;  %v4147_v18 = vrot.slane %v4014_v7, 5  ;;  %v4150_v19 = vrot.slane %v4015_v53, 5  ;;  %v3512_v6 = vld [vmem:[#allocation2 + $0xb0] sm:$0x1] }
 0x187   : > { %v3794_v33 = vrot.slane %v3793_v17, 4  ;;  %v3803_v9 = vor.u32 %v3802_v29, %v3798_v43  ;;  %v9138_v28 = vadd.f32 %v8983_v35, %v8956_v8  ;;  %v9140_v46 = vpop.f32.mrb[32].mxu1  ;;  %v9148_v7 = vadd.f32 %v8997_v63, %v8987_v42  ;;  %v4016_v53 = vld [vmem:[#allocation2 + $0x90] sm:$0xe]  ;;  %v4017_v50 = vld [vmem:[#allocation2 + $0x94] sm:$0xf] }
 0x188   : > { %v4144_v47 = vsel %vm8015_vm14, %v4142_v10, %v4143_v39  ;;  %v4148_v21 = vsel %vm8015_vm14, %v6472_v57, %v4147_v18  ;;  %v4149_v51 = vrot.slane %v4147_v18, 4  ;;  %v9150_v23 = vpop.f32.mrb[33].mxu1  ;;  %v6984_v24 = vadd.f32 %v9032_v15, %v9027_v62  ;;  %v4018_v40 = vld [vmem:[#allocation2 + $0x98] sm:$0x1]  ;;  %v4019_v17 = vld [vmem:[#allocation2 + $0x9c] sm:$0xe] }
 0x189   : > { %v3799_v8 = vsel %vm7760_vm11, %v3794_v33, %v3798_v43  ;;  %v3804_v35 = vrot.slane %v3803_v9, 4  ;;  %v6487_v37 = vcombine.low %v4141_v59, %v4144_v47  ;;  %v9156_v18 = vpop.f32.mrb[34].mxu1  ;;  %v6987_v63 = vadd.f32 %v9036_v26, %v9034_v12  ;;  %v7524_v62 = vld [vmem:[#allocation2 + $0x9c] sm:$0xff]  }
 0x18a   : > { %v4151_v42 = vsel %vm8015_vm14, %v4149_v51, %v4150_v19  ;;  %v3811_v39 = vshrl.u32 %v3510_v44, 16  ;;  %v9162_v29 = vpop.f32.mrb[35].mxu1  ;;  %v9167_v43 = vadd.f32 %v6984_v24, %v8935_v41  ;;  %v3820_v57 = vshll.u32 %v3511_v22, 16  ;;  %v4020_v59 = vld [vmem:[#allocation2 + $0xa0] sm:$0xf] }
 0x18b   : > { %7349 = vmatmul.mubr.bf16.gmra.mrb[124].mxu0 %v6486_v5  ;;  %v3814_v5 = vshll.u32 %v3510_v44, 16  ;;  %v3809_v33 = vsel %vm7760_vm11, %v3804_v35, %v3808_v58  ;;  %v6488_v15 = vcombine.low %v4148_v21, %v4151_v42  ;;  %v9170_v9 = vadd.f32 %v6987_v63, %v8954_v11  ;;  %v4021_v44 = vld [vmem:[#allocation2 + $0xa4] sm:$0x1] }
 0x18c   : > { %7352 = vmatprep.mubr.bf16.mxu0 %v6487_v37  ;;  %v6458_v10 = vcombine.low %v3799_v8, %v3809_v33  ;;  %v3813_v12 = vrot.slane %v3811_v39, 4  ;;  %v9172_v19 = vpop.f32.mrb[32].mxu0  ;;  %v3822_v47 = vrot.slane %v3820_v57, 5  ;;  %v3824_v51 = vshrl.u32 %v3511_v22, 16 }
 0x18d   : > { %v3816_v26 = vrot.slane %v3814_v5, 5  ;;  %v3830_v58 = vshll.u32 %v3512_v6, 16  ;;  %v6473_v35 = vrot.slane %v4016_v53, 9  ;;  %v9174_v37 = vpop.f32.mrb[33].mxu0  ;;  %v4154_v21 = vrot.slane %v4017_v50, 5 }
 0x18e   : > { %5597 = vmatprep.mubr.bf16.mxu1 %v6458_v10  ;;  %v4157_v24 = vrot.slane %v4018_v40, 5  ;;  %v6474_v42 = vrot.slane %v4019_v17, 9  ;;  %v9176_v8 = vpop.f32.mrb[34].mxu0  ;;  %v3826_v11 = vrot.slane %v3824_v51, 4  ;;  %v4161_v39 = vrot.slane %v4020_v59, 5 }
 0x18f   : > { %v3817_v41 = vor.u32 %v3816_v26, %v3813_v12  ;;  %5598 = vmatmul.mubr.bf16.gmra.mrb[124].mxu1 %v7524_v62  ;;  %v3832_v63 = vrot.slane %v3830_v58, 5  ;;  %v4164_v5 = vrot.slane %v4021_v44, 5  ;;  %v9178_v33 = vpop.f32.mrb[35].mxu0  ;;  %v9180_v57 = vpop.f32.mrb[36].mxu1  ;;  %v4155_v6 = vsel %vm8015_vm14, %v6473_v35, %v4154_v21  ;;  %v3513_v40 = vld [vmem:[#allocation2 + $0xb4] sm:$0xf] }
 0x190   : > { %v4156_v53 = vrot.slane %v4154_v21, 4  ;;  %v9186_v50 = vadd.f32 %v9056_v60, %v9040_v0  ;;  %v9188_v17 = vpop.f32.mrb[37].mxu1  ;;  %v3827_v62 = vor.u32 %v3826_v11, %v3822_v47  ;;  %v4162_v59 = vsel %vm8015_vm14, %v6474_v42, %v4161_v39  ;;  %v3514_v51 = vld [vmem:[#allocation2 + $0xb8] sm:$0xf]  ;;  %v3515_v58 = vld [vmem:[#allocation2 + $0xbc] sm:$0x1] }
 0x191   : > { %v3818_v22 = vrot.slane %v3817_v41, 4  ;;  %v4163_v10 = vrot.slane %v4161_v39, 4  ;;  %v9194_v12 = vadd.f32 %v9075_v36, %v9064_v32  ;;  %v9196_v26 = vpop.f32.mrb[38].mxu1  ;;  %v6990_v60 = vadd.f32 %v9079_v61, %v9077_v14  ;;  %v4023_v42 = vld [vmem:[#allocation2 + $0xac] sm:$0xf] }
 0x192   : > { %v4158_v0 = vsel %vm8015_vm14, %v4156_v53, %v4157_v24  ;;  %v9206_v35 = vpop.f32.mrb[39].mxu1  ;;  %v3828_v32 = vrot.slane %v3827_v62, 4  ;;  %v3835_v21 = vshrl.u32 %v3513_v40, 16  ;;  %v4024_v61 = vld [vmem:[#allocation2 + $0xb0] sm:$0x1]  ;;  %v3848_v53 = vshrl.u32 %v3514_v51, 16 }
 0x193   : > { %7353 = vmatmul.mubr.bf16.gmra.mrb[128].mxu0 %v6488_v15  ;;  %v3823_v44 = vsel %vm7760_vm11, %v3818_v22, %v3822_v47  ;;  %v6993_v15 = vadd.f32 %v9083_v49, %v9081_v13  ;;  %v6489_v36 = vcombine.low %v4155_v6, %v4158_v0  ;;  %v4165_v41 = vsel %vm8015_vm14, %v4163_v10, %v4164_v5  ;;  %v4022_v47 = vld [vmem:[#allocation2 + $0xa8] sm:$0xe]  ;;  %v4025_v13 = vld [vmem:[#allocation2 + $0xb4] sm:$0xe]  ;;  %v4026_v62 = vld [vmem:[#allocation2 + $0xb8] sm:$0xf] }
 0x194   : > { %v6490_v11 = vcombine.low %v4162_v59, %v4165_v41  ;;  %v9211_v24 = vadd.f32 %v6990_v60, %v8995_v45  ;;  %v3838_v49 = vshll.u32 %v3513_v40, 16  ;;  %v3833_v39 = vsel %vm7760_vm11, %v3828_v32, %v3832_v63  ;;  %v7525_v22 = vld [vmem:[#allocation2 + $0xa8] sm:$0xff]   ;;  %v4027_v60 = vld [vmem:[#allocation2 + $0xbc] sm:$0x1] }
 0x195   : > { %v9214_v14 = vadd.f32 %v6993_v15, %v9007_v2  ;;  %7356 = vmatprep.mubr.bf16.mxu0 %v6489_v36  ;;  %v3837_v6 = vrot.slane %v3835_v21, 4  ;;  %v3844_v5 = vshll.u32 %v3514_v51, 16  ;;  %v6459_v10 = vcombine.low %v3823_v44, %v3833_v39 }
 0x196   : > { %9651 = vst [vmem:[#allocation15_spill] sm:$0xff] %v9211_v24  ;;  %v3840_v59 = vrot.slane %v3838_v49, 5  ;;  %v3854_v0 = vshll.u32 %v3515_v58, 16  ;;  %v6475_v45 = vrot.slane %v4022_v47, 9  ;;  %v3850_v2 = vrot.slane %v3848_v53, 4 }
 0x197   : > { %9652 = vst [vmem:[#allocation16_spill] sm:$0xff] %v9214_v14  ;;  %v3846_v41 = vrot.slane %v3844_v5, 5  ;;  %v4168_v15 = vrot.slane %v4023_v42, 5  ;;  %v4171_v40 = vrot.slane %v4024_v61, 5  ;;  %v9218_v14 = vpop.f32.mrb[36].mxu0  ;;  %v9220_v24 = vpop.f32.mrb[40].mxu1  ;;  %5605 = vmatprep.mubr.bf16.mxu1 %v6459_v10  ;;  %v9236_v53 = vadd.f32 %v9124_v55, %v9113_v34 }
 0x198   : > { %v3841_v63 = vor.u32 %v3840_v59, %v3837_v6  ;;  %v3856_v32 = vrot.slane %v3854_v0, 5  ;;  %v6476_v36 = vrot.slane %v4025_v13, 9  ;;  %v4175_v21 = vrot.slane %v4026_v62, 5  ;;  %v9222_v51 = vpop.f32.mrb[37].mxu0  ;;  %v9224_v44 = vpop.f32.mrb[41].mxu1  ;;  %5606 = vmatmul.mubr.bf16.gmra.mrb[128].mxu1 %v7525_v22 }
 0x199   : > { %v3851_v58 = vor.u32 %v3850_v2, %v3846_v41  ;;  %v4169_v47 = vsel %vm8015_vm14, %v6475_v45, %v4168_v15  ;;  %v4170_v42 = vrot.slane %v4168_v15, 4  ;;  %v4178_v49 = vrot.slane %v4027_v60, 5  ;;  %v9228_v61 = vpop.f32.mrb[38].mxu0  ;;  %v9230_v39 = vpop.f32.mrb[42].mxu1  ;;  %v3517_v60 = vld [vmem:[#allocation2 + $0xc4] sm:$0xf] }
 0x19a   : > { %v3842_v6 = vrot.slane %v3841_v63, 4  ;;  %v4176_v13 = vsel %vm8015_vm14, %v6476_v36, %v4175_v21  ;;  %v4177_v5 = vrot.slane %v4175_v21, 4  ;;  %v9238_v22 = vpop.f32.mrb[39].mxu0  ;;  %v9240_v62 = vpop.f32.mrb[43].mxu1  ;;  %v9246_v0 = vadd.f32 %v9132_v4, %v9128_v1  ;;  %v3518_v63 = vld [vmem:[#allocation2 + $0xc8] sm:$0x1] }
 0x19b   : > { %7357 = vmatmul.mubr.bf16.gmra.mrb[132].mxu0 %v6490_v11  ;;  %v3516_v11 = vld [vmem:[#allocation2 + $0xc0] sm:$0xf]  ;;  %v3852_v10 = vrot.slane %v3851_v58, 4  ;;  %v4172_v59 = vsel %vm8015_vm14, %v4170_v42, %v4171_v40  ;;  %v6996_v45 = vadd.f32 %v9115_v3, %v9107_v30  ;;  %v6999_v15 = vadd.f32 %v9130_v54, %v9126_v56  ;;  %v7526_v1 = vld [vmem:[#allocation2 + $0xb4] sm:$0xff]   ;;  %v4029_v21 = vld [vmem:[#allocation2 + $0xc4] sm:$0xf] }
 0x19c   : > { %v3847_v34 = vsel %vm7760_vm11, %v3842_v6, %v3846_v41  ;;  %v6491_v55 = vcombine.low %v4169_v47, %v4172_v59  ;;  %v4179_v2 = vsel %vm8015_vm14, %v4177_v5, %v4178_v49  ;;  %v3859_v30 = vshrl.u32 %v3516_v11, 16  ;;  %v4028_v3 = vld [vmem:[#allocation2 + $0xc0] sm:$0xe]  ;;  %v4030_v56 = vld [vmem:[#allocation2 + $0xc8] sm:$0x1] }
 0x19d   : > { %v3857_v40 = vsel %vm7760_vm11, %v3852_v10, %v3856_v32  ;;  %v6492_v4 = vcombine.low %v4176_v13, %v4179_v2  ;;  %v9259_v36 = vadd.f32 %v6996_v45, %v9044_v31  ;;  %v9262_v58 = vadd.f32 %v6999_v15, %v9054_v27  ;;  %v1229_v54 = vld [vmem:[#allocation2 + $0xcc] sm:$0x1]  ;;  %v1284_v31 = vld [vmem:[#allocation2 + $0xd4] sm:$0x1] }
 0x19e   : > { %v6460_v41 = vcombine.low %v3847_v34, %v3857_v40  ;;  %7360 = vmatprep.mubr.bf16.mxu0 %v6491_v55  ;;  %v3862_v47 = vshll.u32 %v3516_v11, 16  ;;  %v3868_v42 = vshll.u32 %v3517_v60, 16  ;;  %v3861_v49 = vrot.slane %v3859_v30, 4 }
 0x19f   : > { %v3872_v6 = vshrl.u32 %v3517_v60, 16  ;;  %v3878_v32 = vshll.u32 %v3518_v63, 16  ;;  %v9266_v13 = vadd.f32 %v9174_v37, %v9172_v19  ;;  %v7018_v5 = vpop.f32.mrb[44].mxu1  ;;  %v9270_v27 = vadd.f32 %v9178_v33, %v9176_v8 }
 0x1a0   : > { %5613 = vmatprep.mubr.bf16.mxu1 %v6460_v41  ;;  %v3864_v10 = vrot.slane %v3862_v47, 5  ;;  %v3870_v59 = vrot.slane %v3868_v42, 5  ;;  %v6477_v11 = vrot.slane %v4028_v3, 9  ;;  %v7019_v45 = vpop.f32.mrb[45].mxu1  ;;  %v4182_v60 = vrot.slane %v4029_v21, 5 }
 0x1a1   : > { %5614 = vmatmul.mubr.bf16.gmra.mrb[132].mxu1 %v7526_v1  ;;  %v3874_v34 = vrot.slane %v3872_v6, 4  ;;  %v4185_v55 = vrot.slane %v4030_v56, 5  ;;  %v7021_v2 = vpop.f32.mrb[46].mxu1  ;;  %v7002_v19 = vadd.f32 %v9150_v23, %v9140_v46  ;;  %v1230_v37 = vsel %vm7668_vm3, 0, %v1229_v54  ;;  %v3520_v23 = vld [vmem:[#allocation2 + $0xd0] sm:$0xf] }
 0x1a2   : > { %v3865_v15 = vor.u32 %v3864_v10, %v3861_v49  ;;  %v1285_v63 = vsel %vm7676_vm4, 0, %v1284_v31  ;;  %v7022_v8 = vpop.f32.mrb[47].mxu1  ;;  %v3880_v40 = vrot.slane %v3878_v32, 5  ;;  %v4183_v1 = vsel %vm8015_vm14, %v6477_v11, %v4182_v60  ;;  %1231 = vst [vmem:[#allocation2 + $0xcc] sm:$0x1] %v1230_v37  ;;  %v7527_v49 = vld [vmem:[#allocation2 + $0xc0] sm:$0xff]  }
 0x1a3   : > { %7361 = vmatmul.mubr.bf16.gmra.mrb[136].mxu0 %v6492_v4  ;;  %v3875_v33 = vor.u32 %v3874_v34, %v3870_v59  ;;  %v4184_v4 = vrot.slane %v4182_v60, 4  ;;  %1286 = vst [vmem:[#allocation2 + $0xd4] sm:$0x1] %v1285_v63  ;;  %v9281_v3 = vadd.f32 %v7002_v19, %v9089_v52  ;;  %v7005_v46 = vadd.f32 %v9162_v29, %v9156_v18 }
 0x1a4   : > { %v3866_v30 = vrot.slane %v3865_v15, 4  ;;  %v6924_v41 = vpop.f32.mrb[40].mxu0  ;;  %v3892_v6 = vshll.u32 %v3520_v23, 16  ;;  %v9296_v18 = vadd.f32 %v9222_v51, %v9218_v14  ;;  %v9300_v29 = vadd.f32 %v9238_v22, %v9228_v61 }
 0x1a5   : > { %v3876_v21 = vrot.slane %v3875_v33, 4  ;;  %v4186_v20 = vsel %vm8015_vm14, %v4184_v4, %v4185_v55  ;;  %v9290_v56 = vadd.f32 %v7005_v46, %v9093_v25  ;;  %v6925_v54 = vpop.f32.mrb[41].mxu0  ;;  %v7008_v25 = vadd.f32 %v9188_v17, %v9180_v57 }
 0x1a6   : > { %v3871_v47 = vsel %vm7760_vm11, %v3866_v30, %v3870_v59  ;;  %v6493_v42 = vcombine.low %v4183_v1, %v4186_v20  ;;  %v6927_v32 = vpop.f32.mrb[42].mxu0  ;;  %v7011_v10 = vadd.f32 %v9206_v35, %v9196_v26  ;;  %v9306_v59 = vadd.f32 %v6925_v54, %v6924_v41 }
 0x1a7   : > { %v3881_v52 = vsel %vm7760_vm11, %v3876_v21, %v3880_v40  ;;  %v6928_v11 = vpop.f32.mrb[43].mxu0  ;;  %v3896_v34 = vshrl.u32 %v3520_v23, 16  ;;  %v7014_v14 = vadd.f32 %v9224_v44, %v9220_v24  ;;  %v7017_v51 = vadd.f32 %v9240_v62, %v9230_v39  ;;  %v4032_v44 = vld [vmem:[#allocation2 + $0xd0] sm:$0xf] }
 0x1a8   : > { %v6461_v31 = vcombine.low %v3871_v47, %v3881_v52  ;;  %7364 = vmatprep.mubr.bf16.mxu0 %v6493_v42  ;;  %v9308_v60 = vadd.f32 %v6928_v11, %v6927_v32  ;;  %v9315_v57 = vadd.f32 %v7008_v25, %v9138_v28  ;;  %v9318_v17 = vadd.f32 %v7011_v10, %v9148_v7 }
 0x1a9   : > { %v1428_v61 = vld [vmem:[#allocation2 + $0xcc] sm:$0xf]  ;;  %v7020_v26 = vadd.f32 %v7019_v45, %v7018_v5  ;;  %v7023_v35 = vadd.f32 %v7022_v8, %v7021_v2  ;;  %v9325_v39 = vadd.f32 %v7014_v14, %v9186_v50  ;;  %v9328_v28 = vadd.f32 %v7017_v51, %v9194_v12 }
 0x1aa   : > { %5621 = vmatprep.mubr.bf16.mxu1 %v6461_v31  ;;  %v1432_v22 = vld [vmem:[#allocation2 + $0xd4] sm:$0x1]  ;;  %v1429_v15 = vsel %vm7715_vm6, 0, %v1428_v61  ;;  %v3894_v45 = vrot.slane %v3892_v6, 5  ;;  %v3898_v2 = vrot.slane %v3896_v34, 4  ;;  %v4189_v19 = vrot.slane %v4032_v44, 5 }
 0x1ab   : > { %5622 = vmatmul.mubr.bf16.gmra.mrb[136].mxu1 %v7527_v49  ;;  %v1433_v24 = vsel %vm7668_vm3, 0, %v1432_v22  ;;  %1430 = vst [vmem:[#allocation2 + $0xcc] sm:$0xf] %v1429_v15  ;;  %v9331_v7 = vadd.f32 %v7020_v26, %v9236_v53  ;;  %v9334_v62 = vadd.f32 %v7023_v35, %v9246_v0  ;;  %v7024_v5 = vpop.f32.mrb[48].mxu1 }
 0x1ac   : > { %1434 = vst [vmem:[#allocation2 + $0xd4] sm:$0x1] %v1433_v24  ;;  %v7025_v16 = vpop.f32.mrb[49].mxu1  ;;  %v3899_v40 = vor.u32 %v3898_v2, %v3894_v45  ;;  %v4191_v53 = vrot.slane %v4189_v19, 4 }
 0x1ad   : > { %v7026_v37 = vadd.f32 %v7025_v16, %v7024_v5  ;;  %v7027_v63 = vpop.f32.mrb[50].mxu1 }
 0x1ae   : > { %v7028_v50 = vpop.f32.mrb[51].mxu1 }
 0x1af   : > { %v9337_v33 = vadd.f32 %v7026_v37, %v9266_v13  ;;  %v7029_v12 = vadd.f32 %v7028_v50, %v7027_v63  ;;  %v3900_v13 = vrot.slane %v3899_v40, 4  ;;  %v9654_v50 = vld [vmem:[#allocation13_spill] sm:$0xff] }
 0x1b0   : > { %v6930_v8 = vpop.f32.mrb[44].mxu0 }
 0x1b1   : > { %v6931_v1 = vpop.f32.mrb[45].mxu0  ;;  %v9342_v30 = vadd.f32 %v7029_v12, %v9270_v27 }
 0x1b2   : > { %v9339_v4 = vadd.f32 %v6931_v1, %v6930_v8  ;;  %v6933_v0 = vpop.f32.mrb[46].mxu0  ;;  %v4031_v46 = vld [vmem:[#allocation2 + $0xcc] sm:$0xe] }
 0x1b3   : > { %v4033_v23 = vld [vmem:[#allocation2 + $0xd4] sm:$0x1]  ;;  %v3519_v21 = vld [vmem:[#allocation2 + $0xcc] sm:$0xf]  ;;  %v6478_v20 = vrot.slane %v4031_v46, 9  ;;  %v6934_v49 = vpop.f32.mrb[47].mxu0 }
 0x1b4   : > { %v4192_v41 = vrot.slane %v4033_v23, 5  ;;  %v3521_v47 = vld [vmem:[#allocation2 + $0xd4] sm:$0x1]  ;;  %v3883_v42 = vshrl.u32 %v3519_v21, 16  ;;  %v3886_v54 = vshll.u32 %v3519_v21, 16  ;;  %v6935_v14 = vadd.f32 %v6934_v49, %v6933_v0  ;;  %v7528_v63 = vld [vmem:[#allocation2 + $0xcc] sm:$0xff]  }
 0x1b5   : > { %v3902_v52 = vshll.u32 %v3521_v47, 16  ;;  %v7030_v6 = vpop.f32.mrb[52].mxu1  ;;  %v4190_v32 = vsel %vm8015_vm14, %v6478_v20, %v4189_v19  ;;  %v9655_v1 = vld [vmem:[#allocation14_spill] sm:$0xff] }
 0x1b6   : > { %v4193_v31 = vsel %vm8015_vm14, %v4191_v53, %v4192_v41  ;;  %v3885_v27 = vrot.slane %v3883_v42, 4  ;;  %v3888_v25 = vrot.slane %v3886_v54, 5  ;;  %v7031_v10 = vpop.f32.mrb[53].mxu1 }
 0x1b7   : > { %v6494_v11 = vcombine.low %v4190_v32, %v4193_v31  ;;  %v3904_v34 = vrot.slane %v3902_v52, 5  ;;  %v7032_v51 = vadd.f32 %v7031_v10, %v7030_v6  ;;  %v7033_v61 = vpop.f32.mrb[54].mxu1 }
 0x1b8   : > { %v3889_v22 = vor.u32 %v3888_v25, %v3885_v27  ;;  %v7088_v26 = vpop.f32.mrb[48].mxu0  ;;  %v7034_v35 = vpop.f32.mrb[55].mxu1 }
 0x1b9   : > { %7365 = vmatmul.mubr.bf16.gmra.mrb[140].mxu0 %v6494_v11  ;;  %v7089_v55 = vpop.f32.mrb[49].mxu0  ;;  %v9349_v15 = vadd.f32 %v7032_v51, %v9296_v18  ;;  %v7035_v24 = vadd.f32 %v7034_v35, %v7033_v61  ;;  %v3905_v38 = vsel %vm7760_vm11, %v3900_v13, %v3904_v34 }
 0x1ba   : > { %v3890_v44 = vrot.slane %v3889_v22, 4  ;;  %v7090_v5 = vadd.f32 %v7089_v55, %v7088_v26  ;;  %v7091_v2 = vpop.f32.mrb[50].mxu0  ;;  %v9656_v22 = vld [vmem:[#allocation15_spill] sm:$0xff]  ;;  %v9657_v55 = vld [vmem:[#allocation16_spill] sm:$0xff] }
 0x1bb   : > { %v7092_v16 = vpop.f32.mrb[51].mxu0  ;;  %v9354_v19 = vadd.f32 %v7035_v24, %v9300_v29 }
 0x1bc   : > { %v3895_v37 = vsel %vm7760_vm11, %v3890_v44, %v3894_v45  ;;  %v9359_v8 = vadd.f32 %v7090_v5, %v9654_v50  ;;  %v7093_v18 = vadd.f32 %v7092_v16, %v7091_v2 }
 0x1bd   : > { %v6462_v12 = vcombine.low %v3895_v37, %v3905_v38  ;;  %v7036_v40 = vpop.f32.mrb[56].mxu1  ;;  %v9658_v37 = vld [vmem:[#allocation5_spill] sm:$0xff] }
 0x1be   : > { %v9362_v53 = vadd.f32 %v7093_v18, %v9655_v1  ;;  %v7037_v0 = vpop.f32.mrb[57].mxu1 }
 0x1bf   : > { %5629 = vmatprep.mubr.bf16.mxu1 %v6462_v12  ;;  %v7038_v46 = vadd.f32 %v7037_v0, %v7036_v40  ;;  %v7039_v23 = vpop.f32.mrb[58].mxu1  ;;  %v9659_v40 = vld [vmem:[#allocation6_spill] sm:$0xff] }
 0x1c0   : > { %5630 = vmatmul.mubr.bf16.gmra.mrb[140].mxu1 %v7528_v63  ;;  %v7094_v29 = vpop.f32.mrb[52].mxu0  ;;  %v7040_v21 = vpop.f32.mrb[59].mxu1 }
 0x1c1   : > { %v7095_v20 = vpop.f32.mrb[53].mxu0  ;;  %v9365_v48 = vadd.f32 %v7038_v46, %v9306_v59  ;;  %v7041_v45 = vadd.f32 %v7040_v21, %v7039_v23 }
 0x1c2   : > { %v7096_v41 = vadd.f32 %v7095_v20, %v7094_v29  ;;  %v7097_v47 = vpop.f32.mrb[54].mxu0 }
 0x1c3   : > { %v7098_v42 = vpop.f32.mrb[55].mxu0  ;;  %v9368_v54 = vadd.f32 %v7041_v45, %v9308_v60 }
 0x1c4   : > { %v9371_v13 = vadd.f32 %v7096_v41, %v9167_v43  ;;  %v7099_v52 = vadd.f32 %v7098_v42, %v7097_v47 }
 0x1c5   : > { %v7042_v49 = vpop.f32.mrb[60].mxu1 }
 0x1c6   : > { %v9374_v6 = vadd.f32 %v7099_v52, %v9170_v9  ;;  %v7043_v32 = vpop.f32.mrb[61].mxu1  ;;  %v9660_v52 = vld [vmem:[#allocation7_spill] sm:$0xff] }
 0x1c7   : > { %v7044_v31 = vadd.f32 %v7043_v32, %v7042_v49  ;;  %v7045_v27 = vpop.f32.mrb[62].mxu1 }
 0x1c8   : > { %v7100_v59 = vpop.f32.mrb[56].mxu0  ;;  %v7046_v25 = vpop.f32.mrb[63].mxu1 }
 0x1c9   : > { %v7101_v10 = vpop.f32.mrb[57].mxu0  ;;  %v9377_v11 = vadd.f32 %v7044_v31, %v9339_v4  ;;  %v7047_v34 = vadd.f32 %v7046_v25, %v7045_v27 }
 0x1ca   : > { %v7102_v60 = vadd.f32 %v7101_v10, %v7100_v59  ;;  %v7103_v51 = vpop.f32.mrb[58].mxu0 }
 0x1cb   : > { %v7104_v61 = vpop.f32.mrb[59].mxu0  ;;  %v9379_v43 = vadd.f32 %v7047_v34, %v6935_v14 }
 0x1cc   : > { %v9382_v26 = vadd.f32 %v7102_v60, %v9656_v22  ;;  %v7105_v9 = vadd.f32 %v7104_v61, %v7103_v51 }
 0x1cd   : > { %v7048_v35 = vpop.f32.mrb[64].mxu1 }
 0x1ce   : > { %v9385_v24 = vadd.f32 %v7105_v9, %v9657_v55  ;;  %v7049_v44 = vpop.f32.mrb[65].mxu1 }
 0x1cf   : > { %v7050_v38 = vadd.f32 %v7049_v44, %v7048_v35  ;;  %v7051_v5 = vpop.f32.mrb[66].mxu1  ;;  %v9662_v44 = vld [vmem:[#allocation9_spill] sm:$0xff] }
 0x1d0   : > { %v7106_v2 = vpop.f32.mrb[60].mxu0  ;;  %v7052_v4 = vpop.f32.mrb[67].mxu1 }
 0x1d1   : > { %v7107_v16 = vpop.f32.mrb[61].mxu0  ;;  %v9388_v63 = vadd.f32 %v7050_v38, %v9658_v37  ;;  %v7053_v50 = vadd.f32 %v7052_v4, %v7051_v5 }
 0x1d2   : > { %v7108_v14 = vadd.f32 %v7107_v16, %v7106_v2  ;;  %v7109_v18 = vpop.f32.mrb[62].mxu0 }
 0x1d3   : > { %v7110_v12 = vpop.f32.mrb[63].mxu0  ;;  %v9391_v1 = vadd.f32 %v7053_v50, %v9659_v40 }
 0x1d4   : > { %v9394_v0 = vadd.f32 %v7108_v14, %v9259_v36  ;;  %v7111_v46 = vadd.f32 %v7110_v12, %v7109_v18  ;;  %v9661_v36 = vld [vmem:[#allocation8_spill] sm:$0xff] }
 0x1d5   : > { %v7054_v23 = vpop.f32.mrb[68].mxu1 }
 0x1d6   : > { %v9397_v29 = vadd.f32 %v7111_v46, %v9262_v58  ;;  %v7055_v21 = vpop.f32.mrb[69].mxu1 }
 0x1d7   : > { %v7056_v20 = vadd.f32 %v7055_v21, %v7054_v23  ;;  %v7057_v45 = vpop.f32.mrb[70].mxu1 }
 0x1d8   : > { %v7112_v41 = vpop.f32.mrb[64].mxu0  ;;  %v7058_v47 = vpop.f32.mrb[71].mxu1 }
 0x1d9   : > { %v7113_v42 = vpop.f32.mrb[65].mxu0  ;;  %v9400_v49 = vadd.f32 %v7056_v20, %v9660_v52  ;;  %v7059_v32 = vadd.f32 %v7058_v47, %v7057_v45 }
 0x1da   : > { %v7114_v31 = vadd.f32 %v7113_v42, %v7112_v41  ;;  %v7115_v27 = vpop.f32.mrb[66].mxu0 }
 0x1db   : > { %v7116_v59 = vpop.f32.mrb[67].mxu0  ;;  %v9403_v25 = vadd.f32 %v7059_v32, %v9661_v36 }
 0x1dc   : > { %v9406_v10 = vadd.f32 %v7114_v31, %v9281_v3  ;;  %v7117_v58 = vadd.f32 %v7116_v59, %v7115_v27  ;;  %v9663_v3 = vld [vmem:[#allocation10_spill] sm:$0xff] }
 0x1dd   : > { %v7060_v34 = vpop.f32.mrb[72].mxu1 }
 0x1de   : > { %v9409_v60 = vadd.f32 %v7117_v58, %v9290_v56  ;;  %v7061_v51 = vpop.f32.mrb[73].mxu1 }
 0x1df   : > { %v7062_v61 = vadd.f32 %v7061_v51, %v7060_v34  ;;  %v7063_v22 = vpop.f32.mrb[74].mxu1 }
 0x1e0   : > { %v7118_v9 = vpop.f32.mrb[68].mxu0  ;;  %v7064_v35 = vpop.f32.mrb[75].mxu1 }
 0x1e1   : > { %v7119_v55 = vpop.f32.mrb[69].mxu0  ;;  %v9412_v38 = vadd.f32 %v7062_v61, %v9662_v44  ;;  %v7065_v5 = vadd.f32 %v7064_v35, %v7063_v22  ;;  %v9664_v22 = vld [vmem:[#allocation11_spill] sm:$0xff] }
 0x1e2   : > { %v7120_v2 = vadd.f32 %v7119_v55, %v7118_v9  ;;  %v7121_v4 = vpop.f32.mrb[70].mxu0 }
 0x1e3   : > { %v7122_v16 = vpop.f32.mrb[71].mxu0  ;;  %v9415_v37 = vadd.f32 %v7065_v5, %v9663_v3 }
 0x1e4   : > { %v9418_v50 = vadd.f32 %v7120_v2, %v9315_v57  ;;  %v7123_v56 = vadd.f32 %v7122_v16, %v7121_v4 }
 0x1e6   : > { %v9421_v14 = vadd.f32 %v7123_v56, %v9318_v17 }
 0x1e8   : > { %v7124_v18 = vpop.f32.mrb[72].mxu0 }
 0x1e9   : > { %v7125_v12 = vpop.f32.mrb[73].mxu0 }
 0x1ea   : > { %v7126_v40 = vadd.f32 %v7125_v12, %v7124_v18  ;;  %v7127_v46 = vpop.f32.mrb[74].mxu0 }
 0x1eb   : > { %v7128_v23 = vpop.f32.mrb[75].mxu0 }
 0x1ec   : > { %v9424_v21 = vadd.f32 %v7126_v40, %v9325_v39  ;;  %v7129_v20 = vadd.f32 %v7128_v23, %v7127_v46 }
 0x1ee   : > { %v9427_v45 = vadd.f32 %v7129_v20, %v9328_v28 }
 0x1f0   : > { %v7130_v41 = vpop.f32.mrb[76].mxu0 }
 0x1f1   : > { %v7131_v47 = vpop.f32.mrb[77].mxu0 }
 0x1f2   : > { %v7132_v57 = vadd.f32 %v7131_v47, %v7130_v41  ;;  %v7133_v42 = vpop.f32.mrb[78].mxu0 }
 0x1f3   : > { %v7134_v52 = vpop.f32.mrb[79].mxu0 }
 0x1f4   : > { %v9430_v17 = vadd.f32 %v7132_v57, %v9331_v7  ;;  %v7135_v32 = vadd.f32 %v7134_v52, %v7133_v42 }
 0x1f6   : > { %v9433_v31 = vadd.f32 %v7135_v32, %v9334_v62  ;;  %v7066_v27 = vpop.f32.mrb[76].mxu1  ;;  %v9665_v62 = vld [vmem:[#allocation12_spill] sm:$0xff] }
 0x1f7   : > { %v7067_v39 = vpop.f32.mrb[77].mxu1 }
 0x1f8   : > { %v7136_v59 = vpop.f32.mrb[80].mxu0  ;;  %v7068_v36 = vadd.f32 %v7067_v39, %v7066_v27  ;;  %v7069_v34 = vpop.f32.mrb[78].mxu1 }
 0x1f9   : > { %v7137_v58 = vpop.f32.mrb[81].mxu0  ;;  %v7070_v61 = vpop.f32.mrb[79].mxu1 }
 0x1fa   : > { %v7138_v28 = vadd.f32 %v7137_v58, %v7136_v59  ;;  %v7139_v51 = vpop.f32.mrb[82].mxu0  ;;  %v9436_v9 = vadd.f32 %v7068_v36, %v9664_v22  ;;  %v7071_v35 = vadd.f32 %v7070_v61, %v7069_v34 }
 0x1fb   : > { %v7140_v55 = vpop.f32.mrb[83].mxu0 }
 0x1fc   : > { %v9439_v7 = vadd.f32 %v7138_v28, %v9337_v33  ;;  %v7141_v44 = vadd.f32 %v7140_v55, %v7139_v51  ;;  %v9442_v5 = vadd.f32 %v7071_v35, %v9665_v62 }
 0x1fe   : > { %v9445_v2 = vadd.f32 %v7141_v44, %v9342_v30  ;;  %v7200_v4 = vpop.f32.mrb[80].mxu1 }
 0x1ff   : > { %v7201_v3 = vpop.f32.mrb[81].mxu1 }
 0x200   : > { %v7142_v16 = vpop.f32.mrb[84].mxu0  ;;  %v7202_v18 = vadd.f32 %v7201_v3, %v7200_v4  ;;  %v7203_v12 = vpop.f32.mrb[82].mxu1 }
 0x201   : > { %v7143_v56 = vpop.f32.mrb[85].mxu0  ;;  %v7204_v23 = vpop.f32.mrb[83].mxu1 }
 0x202   : > { %v7144_v40 = vadd.f32 %v7143_v56, %v7142_v16  ;;  %v7145_v46 = vpop.f32.mrb[86].mxu0  ;;  %v7205_v41 = vadd.f32 %v7204_v23, %v7203_v12  ;;  %v9448_v33 = vadd.f32 %v7202_v18, %v9359_v8 }
 0x203   : > { %v7146_v20 = vpop.f32.mrb[87].mxu0 }
 0x204   : > { %v9451_v47 = vadd.f32 %v7144_v40, %v9349_v15  ;;  %v7147_v57 = vadd.f32 %v7146_v20, %v7145_v46  ;;  %v9454_v30 = vadd.f32 %v7205_v41, %v9362_v53 }
 0x206   : > { %v9457_v42 = vadd.f32 %v7147_v57, %v9354_v19  ;;  %v7206_v52 = vpop.f32.mrb[84].mxu1 }
 0x207   : > { %v7207_v27 = vpop.f32.mrb[85].mxu1 }
 0x208   : > { %v7148_v32 = vpop.f32.mrb[88].mxu0  ;;  %v7208_v39 = vadd.f32 %v7207_v27, %v7206_v52  ;;  %v7209_v36 = vpop.f32.mrb[86].mxu1 }
 0x209   : > { %v7149_v59 = vpop.f32.mrb[89].mxu0  ;;  %v7210_v8 = vpop.f32.mrb[87].mxu1 }
 0x20a   : > { %v7150_v58 = vadd.f32 %v7149_v59, %v7148_v32  ;;  %v7151_v34 = vpop.f32.mrb[90].mxu0  ;;  %v7211_v51 = vadd.f32 %v7210_v8, %v7209_v36  ;;  %v9460_v15 = vadd.f32 %v7208_v39, %v9371_v13 }
 0x20b   : > { %v7152_v28 = vpop.f32.mrb[91].mxu0 }
 0x20c   : > { %v9463_v53 = vadd.f32 %v7150_v58, %v9365_v48  ;;  %v7153_v61 = vadd.f32 %v7152_v28, %v7151_v34  ;;  %v9466_v19 = vadd.f32 %v7211_v51, %v9374_v6 }
 0x20e   : > { %v9469_v22 = vadd.f32 %v7153_v61, %v9368_v54  ;;  %v7212_v35 = vpop.f32.mrb[88].mxu1 }
 0x20f   : > { %v7213_v44 = vpop.f32.mrb[89].mxu1 }
 0x210   : > { %v7154_v55 = vpop.f32.mrb[92].mxu0  ;;  %v7214_v4 = vadd.f32 %v7213_v44, %v7212_v35  ;;  %v7215_v16 = vpop.f32.mrb[90].mxu1 }
 0x211   : > { %v7155_v62 = vpop.f32.mrb[93].mxu0  ;;  %v7216_v13 = vpop.f32.mrb[91].mxu1 }
 0x212   : > { %v7156_v3 = vadd.f32 %v7155_v62, %v7154_v55  ;;  %v7157_v56 = vpop.f32.mrb[94].mxu0  ;;  %v7217_v12 = vadd.f32 %v7216_v13, %v7215_v16  ;;  %v9472_v48 = vadd.f32 %v7214_v4, %v9382_v26 }
 0x213   : > { %v7158_v18 = vpop.f32.mrb[95].mxu0 }
 0x214   : > { %v9475_v6 = vadd.f32 %v7156_v3, %v9377_v11  ;;  %v7159_v40 = vadd.f32 %v7158_v18, %v7157_v56  ;;  %v9478_v54 = vadd.f32 %v7217_v12, %v9385_v24 }
 0x216   : > { %v9481_v46 = vadd.f32 %v7159_v40, %v9379_v43  ;;  %v7218_v23 = vpop.f32.mrb[92].mxu1 }
 0x217   : > { %v7219_v41 = vpop.f32.mrb[93].mxu1 }
 0x218   : > { %v7160_v20 = vpop.f32.mrb[96].mxu0  ;;  %v7220_v52 = vadd.f32 %v7219_v41, %v7218_v23  ;;  %v7221_v32 = vpop.f32.mrb[94].mxu1 }
 0x219   : > { %v7161_v57 = vpop.f32.mrb[97].mxu0  ;;  %v7222_v26 = vpop.f32.mrb[95].mxu1 }
 0x21a   : > { %v7162_v27 = vadd.f32 %v7161_v57, %v7160_v20  ;;  %v7163_v59 = vpop.f32.mrb[98].mxu0  ;;  %v7223_v36 = vadd.f32 %v7222_v26, %v7221_v32  ;;  %v9484_v11 = vadd.f32 %v7220_v52, %v9394_v0 }
 0x21b   : > { %v7164_v39 = vpop.f32.mrb[99].mxu0 }
 0x21c   : > { %v9487_v24 = vadd.f32 %v7162_v27, %v9388_v63  ;;  %v7165_v58 = vadd.f32 %v7164_v39, %v7163_v59  ;;  %v9490_v43 = vadd.f32 %v7223_v36, %v9397_v29 }
 0x21e   : > { %v9493_v34 = vadd.f32 %v7165_v58, %v9391_v1 }
 0x21f   : > { %v7224_v8 = vpop.f32.mrb[96].mxu1 }
 0x220   : > { %v7225_v28 = vpop.f32.mrb[97].mxu1 }
 0x221   : > { %v7166_v51 = vpop.f32.mrb[100].mxu0  ;;  %v7226_v61 = vadd.f32 %v7225_v28, %v7224_v8  ;;  %v7227_v35 = vpop.f32.mrb[98].mxu1 }
 0x222   : > { %v7167_v55 = vpop.f32.mrb[101].mxu0  ;;  %v7228_v44 = vpop.f32.mrb[99].mxu1 }
 0x223   : > { %v7168_v62 = vadd.f32 %v7167_v55, %v7166_v51  ;;  %v7169_v0 = vpop.f32.mrb[102].mxu0  ;;  %v7229_v4 = vadd.f32 %v7228_v44, %v7227_v35  ;;  %v9496_v63 = vadd.f32 %v7226_v61, %v9406_v10 }
 0x224   : > { %v7170_v16 = vpop.f32.mrb[103].mxu0 }
 0x225   : > { %v9499_v29 = vadd.f32 %v7168_v62, %v9400_v49  ;;  %v7171_v3 = vadd.f32 %v7170_v16, %v7169_v0  ;;  %v9502_v1 = vadd.f32 %v7229_v4, %v9409_v60 }
 0x227   : > { %v9505_v56 = vadd.f32 %v7171_v3, %v9403_v25 }
 0x22a   : > { %v7230_v13 = vpop.f32.mrb[100].mxu1 }
 0x22b   : > { %v7172_v18 = vpop.f32.mrb[104].mxu0  ;;  %v7231_v12 = vpop.f32.mrb[101].mxu1 }
 0x22c   : > { %v7173_v40 = vpop.f32.mrb[105].mxu0  ;;  %v7232_v23 = vadd.f32 %v7231_v12, %v7230_v13  ;;  %v7233_v20 = vpop.f32.mrb[102].mxu1 }
 0x22d   : > { %v7174_v41 = vadd.f32 %v7173_v40, %v7172_v18  ;;  %v7175_v10 = vpop.f32.mrb[106].mxu0  ;;  %v7234_v57 = vpop.f32.mrb[103].mxu1 }
 0x22e   : > { %v7176_v52 = vpop.f32.mrb[107].mxu0  ;;  %v7235_v32 = vadd.f32 %v7234_v57, %v7233_v20  ;;  %v9508_v49 = vadd.f32 %v7232_v23, %v9418_v50 }
 0x22f   : > { %v9511_v60 = vadd.f32 %v7174_v41, %v9412_v38  ;;  %v7177_v27 = vadd.f32 %v7176_v52, %v7175_v10 }
 0x230   : > { %v9514_v25 = vadd.f32 %v7235_v32, %v9421_v14 }
 0x231   : > { %v9517_v59 = vadd.f32 %v7177_v27, %v9415_v37 }
 0x233   : > { %v7236_v26 = vpop.f32.mrb[104].mxu1 }
 0x234   : > { %v7237_v39 = vpop.f32.mrb[105].mxu1 }
 0x235   : > { %v7238_v36 = vadd.f32 %v7237_v39, %v7236_v26  ;;  %v7239_v58 = vpop.f32.mrb[106].mxu1 }
 0x236   : > { %v7240_v8 = vpop.f32.mrb[107].mxu1 }
 0x237   : > { %v7241_v28 = vadd.f32 %v7240_v8, %v7239_v58  ;;  %v9520_v51 = vadd.f32 %v7238_v36, %v9424_v21 }
 0x239   : > { %v9523_v50 = vadd.f32 %v7241_v28, %v9427_v45 }
 0x23b   : > { %v7242_v61 = vpop.f32.mrb[108].mxu1 }
 0x23c   : > { %v7243_v14 = vpop.f32.mrb[109].mxu1 }
 0x23d   : > { %v7244_v37 = vadd.f32 %v7243_v14, %v7242_v61  ;;  %v7245_v62 = vpop.f32.mrb[110].mxu1 }
 0x23e   : > { %v7178_v38 = vpop.f32.mrb[108].mxu0  ;;  %v7246_v4 = vpop.f32.mrb[111].mxu1 }
 0x23f   : > { %v7179_v35 = vpop.f32.mrb[109].mxu0  ;;  %v7247_v21 = vadd.f32 %v7246_v4, %v7245_v62  ;;  %v9529_v13 = vadd.f32 %v7244_v37, %v9430_v17 }
 0x240   : > { %v7180_v55 = vadd.f32 %v7179_v35, %v7178_v38  ;;  %v7181_v44 = vpop.f32.mrb[110].mxu0 }
 0x241   : > { %v7182_v0 = vpop.f32.mrb[111].mxu0  ;;  %v9535_v18 = vadd.f32 %v7247_v21, %v9433_v31 }
 0x242   : > { %v9526_v16 = vadd.f32 %v7180_v55, %v9436_v9  ;;  %v7183_v3 = vadd.f32 %v7182_v0, %v7181_v44 }
 0x244   : > { %v9532_v45 = vadd.f32 %v7183_v3, %v9442_v5 }
 0x246   : > { %v7338_v12 = vpop.f32.mrb[112].mxu0 }
 0x247   : > { %v5681_v40 = vadd.f32 %v7338_v12, %v9460_v15  ;;  %v5672_v23 = vpop.f32.mrb[113].mxu0  ;;  %v7248_v57 = vpop.f32.mrb[112].mxu1 }
 0x248   : > { %v5673_v20 = vadd.f32 %v5672_v23, %v9448_v33  ;;  %v7339_v41 = vpop.f32.mrb[114].mxu0  ;;  %v7249_v31 = vpop.f32.mrb[113].mxu1 }
 0x249   : > { %v5684_v9 = vadd.f32 %v7339_v41, %v9466_v19  ;;  %v5675_v10 = vpop.f32.mrb[115].mxu0  ;;  %v7250_v15 = vadd.f32 %v7249_v31, %v7248_v57  ;;  %v7251_v52 = vpop.f32.mrb[114].mxu1  ;;  %v5998_v58 = vmul.f32 %v5681_v40, %v5681_v40 }
 0x24a   : > { %v5676_v17 = vadd.f32 %v5675_v10, %v9454_v30  ;;  %v5996_v33 = vmul.f32 %v5673_v20, %v5673_v20  ;;  %v7252_v26 = vpop.f32.mrb[115].mxu1 }
 0x24b   : > { %v6746_v5 = vpack.c.bf16 %v5684_v9, %v5681_v40  ;;  %v7253_v39 = vadd.f32 %v7252_v26, %v7251_v52  ;;  %v9550_v36 = vadd.f32 %v7250_v15, %v9439_v7  ;;  %v5999_v14 = vmul.f32 %v5684_v9, %v5684_v9 }
 0x24c   : > { %v6741_v32 = vpack.c.bf16 %v5676_v17, %v5673_v20  ;;  %v5959_v27 = vadd.f32 %v5676_v17, %v5673_v20  ;;  %v5997_v19 = vmul.f32 %v5676_v17, %v5676_v17 }
 0x24d   : > { %6833 = vst [vmem:[%s9545_s30 + $0x8] sm:$0xff] %v6746_v5   ;;  %v9555_v35 = vadd.f32 %v7253_v39, %v9445_v2 }
 0x24e   : > { %6742 = vst [vmem:[%s9545_s30] sm:$0xff] %v6741_v32   ;;  %v5960_v8 = vadd.f32 %v5959_v27, %v5681_v40  ;;  %v6028_v28 = vadd.f32 %v5997_v19, %v5996_v33  ;;  %v7342_v38 = vpop.f32.mrb[116].mxu0 }
 0x24f   : > { %v5697_v30 = vadd.f32 %v7342_v38, %v9484_v11  ;;  %v5688_v61 = vpop.f32.mrb[117].mxu0  ;;  %v7254_v12 = vpop.f32.mrb[116].mxu1 }
 0x250   : > { %v6029_v55 = vadd.f32 %v6028_v28, %v5998_v58  ;;  %v5689_v44 = vadd.f32 %v5688_v61, %v9472_v48  ;;  %v5961_v37 = vadd.f32 %v5960_v8, %v5684_v9  ;;  %v7343_v62 = vpop.f32.mrb[118].mxu0  ;;  %v7255_v2 = vpop.f32.mrb[117].mxu1 }
 0x251   : > { %v5700_v7 = vadd.f32 %v7343_v62, %v9490_v43  ;;  %v5691_v0 = vpop.f32.mrb[119].mxu0  ;;  %v7257_v48 = vpop.f32.mrb[118].mxu1  ;;  %v7256_v9 = vadd.f32 %v7255_v2, %v7254_v12  ;;  %v6002_v17 = vmul.f32 %v5697_v30, %v5697_v30 }
 0x252   : > { %v5962_v4 = vadd.f32 %v5961_v37, %v5689_v44  ;;  %v6000_v3 = vmul.f32 %v5689_v44, %v5689_v44  ;;  %v6030_v21 = vadd.f32 %v6029_v55, %v5999_v14  ;;  %v5692_v11 = vadd.f32 %v5691_v0, %v9478_v54  ;;  %v7258_v57 = vpop.f32.mrb[119].mxu1 }
 0x253   : > { %v6756_v40 = vpack.c.bf16 %v5700_v7, %v5697_v30  ;;  %v7259_v15 = vadd.f32 %v7258_v57, %v7257_v48  ;;  %v6003_v52 = vmul.f32 %v5700_v7, %v5700_v7  ;;  %v5584_v32 = vadd.f32 %v7256_v9, %v9451_v47 }
 0x254   : > { %v6031_v23 = vadd.f32 %v6030_v21, %v6000_v3  ;;  %v6751_v20 = vpack.c.bf16 %v5692_v11, %v5689_v44  ;;  %v5963_v41 = vadd.f32 %v5962_v4, %v5692_v11  ;;  %v6001_v10 = vmul.f32 %v5692_v11, %v5692_v11 }
 0x255   : > { %6835 = vst [vmem:[%s9545_s30 + $0x18] sm:$0xff] %v6756_v40   ;;  %v9566_v58 = vadd.f32 %v7259_v15, %v9457_v42 }
 0x256   : > { %6834 = vst [vmem:[%s9545_s30 + $0x10] sm:$0xff] %v6751_v20   ;;  %v5964_v43 = vadd.f32 %v5963_v41, %v5697_v30  ;;  %v6032_v31 = vadd.f32 %v6031_v23, %v6001_v10  ;;  %v7346_v5 = vpop.f32.mrb[120].mxu0 }
 0x257   : > { %v5713_v54 = vadd.f32 %v7346_v5, %v9508_v49  ;;  %v5704_v33 = vpop.f32.mrb[121].mxu0 }
 0x258   : > { %v6033_v27 = vadd.f32 %v6032_v31, %v6002_v17  ;;  %v5705_v19 = vadd.f32 %v5704_v33, %v9496_v63  ;;  %v5965_v26 = vadd.f32 %v5964_v43, %v5700_v7  ;;  %v7347_v39 = vpop.f32.mrb[122].mxu0  ;;  %v7260_v14 = vpop.f32.mrb[120].mxu1 }
 0x259   : > { %v5716_v8 = vadd.f32 %v7347_v39, %v9514_v25  ;;  %v5707_v28 = vpop.f32.mrb[123].mxu0  ;;  %v7261_v55 = vpop.f32.mrb[121].mxu1  ;;  %v6006_v4 = vmul.f32 %v5713_v54, %v5713_v54 }
 0x25a   : > { %v5966_v38 = vadd.f32 %v5965_v26, %v5705_v19  ;;  %v6004_v30 = vmul.f32 %v5705_v19, %v5705_v19  ;;  %v6034_v61 = vadd.f32 %v6033_v27, %v6003_v52  ;;  %v5708_v49 = vadd.f32 %v5707_v28, %v9502_v1  ;;  %v7263_v7 = vpop.f32.mrb[122].mxu1 }
 0x25b   : > { %v6766_v47 = vpack.c.bf16 %v5716_v8, %v5713_v54  ;;  %v7262_v42 = vadd.f32 %v7261_v55, %v7260_v14  ;;  %v7264_v0 = vpop.f32.mrb[123].mxu1  ;;  %v6007_v12 = vmul.f32 %v5716_v8, %v5716_v8 }
 0x25c   : > { %v6035_v44 = vadd.f32 %v6034_v61, %v6004_v30  ;;  %v6761_v63 = vpack.c.bf16 %v5708_v49, %v5705_v19  ;;  %v5967_v37 = vadd.f32 %v5966_v38, %v5708_v49  ;;  %v6005_v62 = vmul.f32 %v5708_v49, %v5708_v49 }
 0x25d   : > { %6837 = vst [vmem:[%s9545_s30 + $0x28] sm:$0xff] %v6766_v47   ;;  %v7265_v11 = vadd.f32 %v7264_v0, %v7263_v7  ;;  %v5592_v2 = vadd.f32 %v7262_v42, %v9463_v53 }
 0x25e   : > { %6836 = vst [vmem:[%s9545_s30 + $0x20] sm:$0xff] %v6761_v63   ;;  %v5968_v25 = vadd.f32 %v5967_v37, %v5713_v54  ;;  %v6036_v3 = vadd.f32 %v6035_v44, %v6005_v62  ;;  %v7350_v21 = vpop.f32.mrb[124].mxu0 }
 0x25f   : > { %v5729_v1 = vadd.f32 %v7350_v21, %v9529_v13  ;;  %v5720_v40 = vpop.f32.mrb[125].mxu0  ;;  %v9576_v48 = vadd.f32 %v7265_v11, %v9469_v22 }
 0x260   : > { %v6037_v23 = vadd.f32 %v6036_v3, %v6006_v4  ;;  %v5721_v20 = vadd.f32 %v5720_v40, %v9520_v51  ;;  %v5969_v41 = vadd.f32 %v5968_v25, %v5716_v8  ;;  %v7351_v10 = vpop.f32.mrb[126].mxu0 }
 0x261   : > { %v5732_v9 = vadd.f32 %v7351_v10, %v9535_v18  ;;  %v5723_v57 = vpop.f32.mrb[127].mxu0  ;;  %v6010_v27 = vmul.f32 %v5729_v1, %v5729_v1 }
 0x262   : > { %v5970_v17 = vadd.f32 %v5969_v41, %v5721_v20  ;;  %v6008_v43 = vmul.f32 %v5721_v20, %v5721_v20  ;;  %v6038_v31 = vadd.f32 %v6037_v23, %v6007_v12  ;;  %v5724_v13 = vadd.f32 %v5723_v57, %v9523_v50  ;;  %v7266_v54 = vpop.f32.mrb[124].mxu1 }
 0x263   : > { %v6776_v5 = vpack.c.bf16 %v5732_v9, %v5729_v1  ;;  %v7267_v33 = vpop.f32.mrb[125].mxu1  ;;  %v6011_v8 = vmul.f32 %v5732_v9, %v5732_v9 }
 0x264   : > { %v6039_v53 = vadd.f32 %v6038_v31, %v6008_v43  ;;  %v6771_v15 = vpack.c.bf16 %v5724_v13, %v5721_v20  ;;  %v5971_v52 = vadd.f32 %v5970_v17, %v5724_v13  ;;  %v6009_v51 = vmul.f32 %v5724_v13, %v5724_v13  ;;  %v7269_v39 = vpop.f32.mrb[126].mxu1 }
 0x265   : > { %6839 = vst [vmem:[%s9545_s30 + $0x38] sm:$0xff] %v6776_v5   ;;  %v7268_v18 = vadd.f32 %v7267_v33, %v7266_v54  ;;  %v7270_v30 = vpop.f32.mrb[127].mxu1 }
 0x266   : > { %6838 = vst [vmem:[%s9545_s30 + $0x30] sm:$0xff] %v6771_v15   ;;  %v5972_v22 = vadd.f32 %v5971_v52, %v5729_v1  ;;  %v6040_v19 = vadd.f32 %v6039_v53, %v6009_v51  ;;  %v7354_v26 = vpop.f32.mrb[128].mxu0  ;;  %v7271_v47 = vadd.f32 %v7270_v30, %v7269_v39 }
 0x267   : > { %v5745_v28 = vadd.f32 %v7354_v26, %v5584_v32  ;;  %v5736_v38 = vpop.f32.mrb[129].mxu0  ;;  %v5600_v63 = vadd.f32 %v7268_v18, %v9475_v6 }
 0x268   : > { %v6041_v50 = vadd.f32 %v6040_v19, %v6010_v27  ;;  %v5737_v61 = vadd.f32 %v5736_v38, %v9550_v36  ;;  %v5973_v49 = vadd.f32 %v5972_v22, %v5732_v9  ;;  %v7355_v14 = vpop.f32.mrb[130].mxu0  ;;  %v5603_v0 = vadd.f32 %v7271_v47, %v9481_v46 }
 0x269   : > { %v5748_v55 = vadd.f32 %v7355_v14, %v9566_v58  ;;  %v5739_v44 = vpop.f32.mrb[131].mxu0  ;;  %v6014_v21 = vmul.f32 %v5745_v28, %v5745_v28 }
 0x26a   : > { %v5974_v37 = vadd.f32 %v5973_v49, %v5737_v61  ;;  %v6012_v62 = vmul.f32 %v5737_v61, %v5737_v61  ;;  %v6042_v7 = vadd.f32 %v6041_v50, %v6011_v8  ;;  %v5740_v32 = vadd.f32 %v5739_v44, %v9555_v35 }
 0x26b   : > { %v6786_v42 = vpack.c.bf16 %v5748_v55, %v5745_v28  ;;  %v7272_v12 = vpop.f32.mrb[128].mxu1  ;;  %v6015_v6 = vmul.f32 %v5748_v55, %v5748_v55 }
 0x26c   : > { %v6043_v4 = vadd.f32 %v6042_v7, %v6012_v62  ;;  %v6781_v36 = vpack.c.bf16 %v5740_v32, %v5737_v61  ;;  %v5975_v25 = vadd.f32 %v5974_v37, %v5740_v32  ;;  %v6013_v3 = vmul.f32 %v5740_v32, %v5740_v32  ;;  %v7273_v23 = vpop.f32.mrb[129].mxu1 }
 0x26d   : > { %6841 = vst [vmem:[%s9545_s30 + $0x48] sm:$0xff] %v6786_v42   ;;  %v7274_v35 = vadd.f32 %v7273_v23, %v7272_v12  ;;  %v7275_v9 = vpop.f32.mrb[130].mxu1 }
 0x26e   : > { %6840 = vst [vmem:[%s9545_s30 + $0x40] sm:$0xff] %v6781_v36   ;;  %v5976_v11 = vadd.f32 %v5975_v25, %v5745_v28  ;;  %v6044_v58 = vadd.f32 %v6043_v4, %v6013_v3  ;;  %v7358_v1 = vpop.f32.mrb[132].mxu0  ;;  %v7276_v43 = vpop.f32.mrb[131].mxu1 }
 0x26f   : > { %v5761_v40 = vadd.f32 %v7358_v1, %v5600_v63  ;;  %v5752_v20 = vpop.f32.mrb[133].mxu0  ;;  %v7277_v15 = vadd.f32 %v7276_v43, %v7275_v9  ;;  %v5608_v54 = vadd.f32 %v7274_v35, %v9487_v24 }
 0x270   : > { %v6045_v41 = vadd.f32 %v6044_v58, %v6014_v21  ;;  %v5753_v10 = vadd.f32 %v5752_v20, %v5592_v2  ;;  %v5977_v46 = vadd.f32 %v5976_v11, %v5748_v55  ;;  %v7359_v57 = vpop.f32.mrb[134].mxu0 }
 0x271   : > { %v5764_v17 = vadd.f32 %v7359_v57, %v5603_v0  ;;  %v5755_v31 = vpop.f32.mrb[135].mxu0  ;;  %v5611_v2 = vadd.f32 %v7277_v15, %v9493_v34  ;;  %v6018_v39 = vmul.f32 %v5761_v40, %v5761_v40 }
 0x272   : > { %v5978_v13 = vadd.f32 %v5977_v46, %v5753_v10  ;;  %v6016_v5 = vmul.f32 %v5753_v10, %v5753_v10  ;;  %v6046_v53 = vadd.f32 %v6045_v41, %v6015_v6  ;;  %v5756_v51 = vadd.f32 %v5755_v31, %v9576_v48 }
 0x273   : > { %v6796_v52 = vpack.c.bf16 %v5764_v17, %v5761_v40  ;;  %v6019_v24 = vmul.f32 %v5764_v17, %v5764_v17 }
 0x274   : > { %v6047_v33 = vadd.f32 %v6046_v53, %v6016_v5  ;;  %v6791_v27 = vpack.c.bf16 %v5756_v51, %v5753_v10  ;;  %v5979_v22 = vadd.f32 %v5978_v13, %v5756_v51  ;;  %v6017_v19 = vmul.f32 %v5756_v51, %v5756_v51  ;;  %v7278_v26 = vpop.f32.mrb[132].mxu1 }
 0x275   : > { %6843 = vst [vmem:[%s9545_s30 + $0x58] sm:$0xff] %v6796_v52   ;;  %v7279_v38 = vpop.f32.mrb[133].mxu1 }
 0x276   : > { %v7362_v18 = vpop.f32.mrb[136].mxu0  ;;  %6842 = vst [vmem:[%s9545_s30 + $0x50] sm:$0xff] %v6791_v27   ;;  %v5980_v8 = vadd.f32 %v5979_v22, %v5761_v40  ;;  %v6048_v28 = vadd.f32 %v6047_v33, %v6017_v19  ;;  %v7280_v50 = vadd.f32 %v7279_v38, %v7278_v26  ;;  %v7281_v48 = vpop.f32.mrb[134].mxu1 }
 0x277   : > { %v5768_v30 = vpop.f32.mrb[137].mxu0  ;;  %v7282_v34 = vpop.f32.mrb[135].mxu1 }
 0x278   : > { %v5769_v61 = vadd.f32 %v5768_v30, %v5608_v54  ;;  %v7363_v49 = vpop.f32.mrb[138].mxu0  ;;  %v6049_v14 = vadd.f32 %v6048_v28, %v6018_v39  ;;  %v5981_v47 = vadd.f32 %v5980_v8, %v5764_v17  ;;  %v5616_v44 = vadd.f32 %v7280_v50, %v9499_v29 }
 0x279   : > { %v5771_v55 = vpop.f32.mrb[139].mxu0  ;;  %v7283_v37 = vadd.f32 %v7282_v34, %v7281_v48 }
 0x27a   : > { %v6020_v63 = vmul.f32 %v5769_v61, %v5769_v61  ;;  %v5772_v62 = vadd.f32 %v5771_v55, %v5611_v2  ;;  %v5982_v7 = vadd.f32 %v5981_v47, %v5769_v61  ;;  %v6050_v32 = vadd.f32 %v6049_v14, %v6019_v24 }
 0x27b   : > { %v5777_v42 = vadd.f32 %v7362_v18, %v5616_v44  ;;  %v5619_v0 = vadd.f32 %v7283_v37, %v9505_v56 }
 0x27c   : > { %v6801_v4 = vpack.c.bf16 %v5772_v62, %v5769_v61  ;;  %v6021_v36 = vmul.f32 %v5772_v62, %v5772_v62  ;;  %v6051_v25 = vadd.f32 %v6050_v32, %v6020_v63  ;;  %v5983_v3 = vadd.f32 %v5982_v7, %v5772_v62 }
 0x27d   : > { %v6022_v21 = vmul.f32 %v5777_v42, %v5777_v42  ;;  %v5780_v11 = vadd.f32 %v7363_v49, %v5619_v0 }
 0x27e   : > { %6844 = vst [vmem:[%s9545_s30 + $0x60] sm:$0xff] %v6801_v4   ;;  %v5984_v58 = vadd.f32 %v5983_v3, %v5777_v42  ;;  %v6052_v12 = vadd.f32 %v6051_v25, %v6021_v36  ;;  %v7284_v6 = vpop.f32.mrb[136].mxu1 }
 0x27f   : > { %v6806_v1 = vpack.c.bf16 %v5780_v11, %v5777_v42  ;;  %v6023_v29 = vmul.f32 %v5780_v11, %v5780_v11  ;;  %v7285_v23 = vpop.f32.mrb[137].mxu1 }
 0x280   : > { %v6053_v40 = vadd.f32 %v6052_v12, %v6022_v21  ;;  %v5985_v20 = vadd.f32 %v5984_v58, %v5780_v11  ;;  %v7286_v41 = vadd.f32 %v7285_v23, %v7284_v6  ;;  %v7287_v35 = vpop.f32.mrb[138].mxu1 }
 0x281   : > { %6845 = vst [vmem:[%s9545_s30 + $0x68] sm:$0xff] %v6806_v1   ;;  %v7288_v56 = vpop.f32.mrb[139].mxu1 }
 0x282   : > { %v6054_v10 = vadd.f32 %v6053_v40, %v6023_v29  ;;  %v7289_v46 = vadd.f32 %v7288_v56, %v7287_v35  ;;  %v5624_v9 = vadd.f32 %v7286_v41, %v9511_v60 }
 0x284   : > { %v5627_v57 = vadd.f32 %v7289_v46, %v9517_v59 }
 0x28c   : > { %v7366_v17 = vpop.f32.mrb[140].mxu0 }
 0x28d   : > { %v5784_v43 = vpop.f32.mrb[141].mxu0 }
 0x28e   : > { %v5785_v31 = vadd.f32 %v5784_v43, %v5624_v9  ;;  %v7367_v13 = vpop.f32.mrb[142].mxu0 }
 0x28f   : > { %v5787_v5 = vpop.f32.mrb[143].mxu0 }
 0x290   : > { %v5986_v53 = vadd.f32 %v5985_v20, %v5785_v31  ;;  %v6024_v15 = vmul.f32 %v5785_v31, %v5785_v31  ;;  %v5788_v52 = vadd.f32 %v5787_v5, %v5627_v57 }
 0x292   : > { %v6055_v51 = vadd.f32 %v6054_v10, %v6024_v15  ;;  %v6811_v54 = vpack.c.bf16 %v5788_v52, %v5785_v31  ;;  %v5987_v33 = vadd.f32 %v5986_v53, %v5788_v52  ;;  %v6025_v2 = vmul.f32 %v5788_v52, %v5788_v52 }
 0x293   : > { %v7290_v27 = vpop.f32.mrb[140].mxu1 }
 0x294   : > { %6846 = vst [vmem:[%s9545_s30 + $0x70] sm:$0xff] %v6811_v54   ;;  %v6056_v22 = vadd.f32 %v6055_v51, %v6025_v2  ;;  %v7291_v19 = vpop.f32.mrb[141].mxu1 }
 0x295   : > { %v7292_v60 = vadd.f32 %v7291_v19, %v7290_v27  ;;  %v7293_v26 = vpop.f32.mrb[142].mxu1 }
 0x296   : > { %v7294_v59 = vpop.f32.mrb[143].mxu1 }
 0x297   : > { %v5632_v18 = vadd.f32 %v7292_v60, %v9526_v16  ;;  %v7295_v39 = vadd.f32 %v7294_v59, %v7293_v26 }
 0x299   : > { %v5793_v8 = vadd.f32 %v7366_v17, %v5632_v18  ;;  %v5635_v28 = vadd.f32 %v7295_v39, %v9532_v45 }
 0x29b   : > { %v5988_v38 = vadd.f32 %v5987_v33, %v5793_v8  ;;  %v6026_v30 = vmul.f32 %v5793_v8, %v5793_v8  ;;  %v5796_v50 = vadd.f32 %v7367_v13, %v5635_v28 }
 0x29d   : > { %v6057_v61 = vadd.f32 %v6056_v22, %v6026_v30  ;;  %v6816_v48 = vpack.c.bf16 %v5796_v50, %v5793_v8  ;;  %v5989_v49 = vadd.f32 %v5988_v38, %v5796_v50  ;;  %v6027_v24 = vmul.f32 %v5796_v50, %v5796_v50 }
 0x29f   : > { %6847 = vst [vmem:[%s9545_s30 + $0x78] sm:$0xff] %v6816_v48   ;;  %v5990_v14 = vrot.slane %v5989_v49, 4  ;;  %v6058_v47 = vadd.f32 %v6057_v61, %v6027_v24 }
 0x2a1   : > { %v5991_v34 = vadd.f32 %v5990_v14, %v5989_v49  ;;  %v6059_v55 = vrot.slane %v6058_v47, 4 }
 0x2a3   : > { %v5992_v44 = vrot.slane %v5991_v34, 2  ;;  %v6060_v63 = vadd.f32 %v6059_v55, %v6058_v47 }
 0x2a5   : > { %v5993_v16 = vadd.f32 %v5992_v44, %v5991_v34  ;;  %v6061_v37 = vrot.slane %v6060_v63, 2 }
 0x2a7   : > { %v5994_v62 = vrot.slane %v5993_v16, 1  ;;  %v6062_v7 = vadd.f32 %v6061_v37, %v6060_v63 }
 0x2a9   : > { %v6063_v45 = vrot.slane %v6062_v7, 1  ;;  %v5995_v32 = vadd.f32 %v5994_v62, %v5993_v16 }
 0x2ab   : > { %v6064_v42 = vadd.f32 %v6063_v45, %v6062_v7 }
 0x2ad   : > { %v6066_v0 = vsel %vm1068_vm0, %v5995_v32, %v6064_v42 }
 0x2ae   : > { %6067 = vst [vmem:[%s465_s12] sm:$0x3] %v6066_v0 }
 0x2af PF: > { %s18_s2 = sadd.s32 1, %s7555_s2   ;;  %s9666_s24 = smov %s7551_s1 }
 0x2b0   : > { %p15_p5 = scmp.ge.s32.totalorder %s18_s2, 4   ;;  %s9667_s1 = smov %s9669_s25 }
 0x2b2   :  { %17 = sbr.rel (!%p15_p5) target bundleno = 2 (0x2), region = 112 }

</bundles_post_ra>
